<compile_context>
chip_gen: v7x
topology: tpu7x:2x2x1
jax: 0.10.0
libtpu: 0.0.40
codegen_flags: <defaults>
</compile_context>

<pallas_src>
import jax
import jax.numpy as jnp
from jax import lax
from jax.experimental import pallas as pl
from jax.experimental.pallas import tpu as pltpu


def _make_block_kernel(H, W, Cin, Cout, stride, identity, mm_dtype):
    Ho = (H + 2 - 3) // stride + 1
    Wo = (W + 2 - 3) // stride + 1
    Hp1, Wp1 = H + 2, W + 2
    Hp2, Wp2 = Ho + 2, Wo + 2

    def zero_halo(pad_ref, Hp, Wp, C):
        # Zero only the 1-pixel border; the interior is overwritten anyway.
        zrow = jnp.zeros((1, Wp, C), jnp.float32)
        zcol = jnp.zeros((Hp, 1, C), jnp.float32)
        pad_ref[0:1, :, :] = zrow
        pad_ref[Hp - 1:Hp, :, :] = zrow
        pad_ref[:, 0:1, :] = zcol
        pad_ref[:, Wp - 1:Wp, :] = zcol

    def build_cols(pad_ref, col_ref, Hn, Wn, s, Ci):
        # im2col: write the 9 shifted taps once into a (Hn*Wn, 9*Ci) slab.
        for kh in range(3):
            for kw in range(3):
                if s == 1:
                    tap = pad_ref[kh:kh + Hn, kw:kw + Wn, :]
                else:
                    # stride applied once at slab-build time (strided VMEM read)
                    tap = pad_ref[pl.ds(kh, Hn, stride=s),
                                  pl.ds(kw, Wn, stride=s), :]
                t = kh * 3 + kw
                col_ref[:, t * Ci:(t + 1) * Ci] = (
                    tap.reshape(Hn * Wn, Ci).astype(mm_dtype))

    def kernel(*refs):
        x_ref, s1_ref, b1_ref, w1_ref, b2_ref, w2_ref = refs[:6]
        rest = refs[6:]
        if identity:
            o_ref, pad1, col1, pad2, col2 = rest
            wsc_ref = None
        else:
            wsc_ref, o_ref, pad1, col1, pad2, col2 = rest

        # ---- bn1 + relu1 (f32 elementwise) -> zero-halo padded buffer ----
        zero_halo(pad1, Hp1, Wp1, Cin)
        x = x_ref[...].astype(jnp.float32)                       # (H, W, Cin)
        a = jnp.maximum(x * s1_ref[...] + b1_ref[...], 0.0)
        pad1[1:H + 1, 1:W + 1, :] = a

        # ---- conv1 (3x3, stride) as ONE im2col matmul; bn2 scale folded into
        #      w1, so bn2 + relu2 reduces to max(c1 + b2, 0). ----
        build_cols(pad1, col1, Ho, Wo, stride, Cin)
        c1 = jnp.dot(col1[...], w1_ref[...], preferred_element_type=jnp.float32)
        m = jnp.maximum(c1 + b2_ref[...], 0.0)                   # (Ho*Wo, Cout)

        # ---- conv2 (3x3, stride 1) as ONE im2col matmul ----
        zero_halo(pad2, Hp2, Wp2, Cout)
        pad2[1:Ho + 1, 1:Wo + 1, :] = m.reshape(Ho, Wo, Cout)
        build_cols(pad2, col2, Ho, Wo, 1, Cout)
        c2 = jnp.dot(col2[...], w2_ref[...], preferred_element_type=jnp.float32)

        # ---- shortcut (computed last so big temporaries die early) ----
        if identity:
            sc = x_ref[...].astype(jnp.float32).reshape(Ho * Wo, Cout)
        else:
            if stride == 1:
                a_s = pad1[1:H + 1, 1:W + 1, :]
            else:
                a_s = pad1[pl.ds(1, Ho, stride=stride),
                           pl.ds(1, Wo, stride=stride), :]
            sc = jnp.dot(a_s.reshape(Ho * Wo, Cin).astype(mm_dtype), wsc_ref[...],
                         preferred_element_type=jnp.float32)

        o_ref[...] = (sc + c2).astype(o_ref.dtype)

    scratch = [
        pltpu.VMEM((Hp1, Wp1, Cin), jnp.float32),   # padded bn1-relu activation
        pltpu.VMEM((Ho * Wo, 9 * Cin), mm_dtype),   # im2col slab for conv1
        pltpu.VMEM((Hp2, Wp2, Cout), jnp.float32),  # padded bn2-relu activation
        pltpu.VMEM((Ho * Wo, 9 * Cout), mm_dtype),  # im2col slab for conv2
    ]
    return kernel, scratch, (Ho, Wo)


def wrn_basic_block_nhwc(x_nhwc, params, *, stride, eps=1e-5,
                         matmul_dtype=jnp.bfloat16):
    """Fused WRNBasicBlock forward on an NHWC activation (preferred layout)."""
    N, H, W, Cin = x_nhwc.shape
    Cout = params["w1"].shape[0]
    identity = (Cin == Cout) and (stride == 1)

    # Fold eval-mode BatchNorm into per-channel scale / shift.
    def fold(g, b, m, v):
        s = g / jnp.sqrt(v + eps)
        return s, b - m * s

    s1, b1 = fold(params["bn1_gamma"], params["bn1_beta"],
                  params["bn1_mean"], params["bn1_var"])
    s2, b2 = fold(params["bn2_gamma"], params["bn2_beta"],
                  params["bn2_mean"], params["bn2_var"])

    # conv1 weights: OIHW -> HWIO, fold bn2 scale into the output channels,
    # flatten to (9*Cin, Cout) in (kh, kw, ci) row order (matches the slab).
    w1 = (jnp.transpose(params["w1"], (2, 3, 1, 0)).astype(jnp.float32)
          * s2[None, None, None, :]).reshape(9 * Cin, Cout).astype(matmul_dtype)
    w2 = jnp.transpose(params["w2"], (2, 3, 1, 0)).astype(jnp.float32)
    w2 = w2.reshape(9 * Cout, Cout).astype(matmul_dtype)

    kernel, scratch, (Ho, Wo) = _make_block_kernel(
        H, W, Cin, Cout, stride, identity, matmul_dtype)

    inputs = [x_nhwc,
              s1.reshape(1, Cin).astype(jnp.float32),
              b1.reshape(1, Cin).astype(jnp.float32),
              w1,
              b2.reshape(1, Cout).astype(jnp.float32),
              w2]
    in_specs = [
        pl.BlockSpec((None, H, W, Cin), lambda n: (n, 0, 0, 0)),
        pl.BlockSpec((1, Cin), lambda n: (0, 0)),
        pl.BlockSpec((1, Cin), lambda n: (0, 0)),
        pl.BlockSpec((9 * Cin, Cout), lambda n: (0, 0)),
        pl.BlockSpec((1, Cout), lambda n: (0, 0)),
        pl.BlockSpec((9 * Cout, Cout), lambda n: (0, 0)),
    ]
    if not identity:
        # shortcut weight (Cout, Cin, 1, 1) -> (Cin, Cout)
        wsc = jnp.transpose(params["w_sc"][:, :, 0, 0], (1, 0)).astype(matmul_dtype)
        inputs.append(wsc)
        in_specs.append(pl.BlockSpec((Cin, Cout), lambda n: (0, 0)))

    out_flat = pl.pallas_call(
        kernel,
        out_shape=jax.ShapeDtypeStruct((N, Ho * Wo, Cout), x_nhwc.dtype),
        grid=(N,),
        in_specs=in_specs,
        out_specs=pl.BlockSpec((None, Ho * Wo, Cout), lambda n: (n, 0, 0)),
        scratch_shapes=scratch,
        compiler_params=pltpu.CompilerParams(
            dimension_semantics=("parallel",),
            vmem_limit_bytes=64 * 1024 * 1024),
    )(*inputs)
    return out_flat.reshape(N, Ho, Wo, Cout)


def wrn_basic_block(x_nchw, params, *, stride, eps=1e-5,
                    matmul_dtype=jnp.bfloat16):
    """PyTorch-layout (NCHW) convenience wrapper around the NHWC kernel."""
    # TODO(synk): when chaining blocks, keep activations NHWC end-to-end and
    #             call wrn_basic_block_nhwc directly to avoid these transposes.
    x_nhwc = jnp.transpose(x_nchw, (0, 2, 3, 1))
    out = wrn_basic_block_nhwc(x_nhwc, params, stride=stride, eps=eps,
                               matmul_dtype=matmul_dtype)
    return jnp.transpose(out, (0, 3, 1, 2))


# ------------------------- pure-JAX reference ------------------------------
def reference_block(x_nchw, params, *, stride, eps=1e-5):
    N, Cin, H, W = x_nchw.shape
    Cout = params["w1"].shape[0]
    identity = (Cin == Cout) and (stride == 1)
    x = jnp.transpose(x_nchw, (0, 2, 3, 1)).astype(jnp.float32)

    def bn_relu(t, g, b, m, v):
        return jnp.maximum((t - m) / jnp.sqrt(v + eps) * g + b, 0.0)

    def conv(t, w_oihw, s, p):
        w = jnp.transpose(w_oihw, (2, 3, 1, 0))
        return lax.conv_general_dilated(t, w, (s, s), [(p, p), (p, p)],
                                        dimension_numbers=("NHWC", "HWIO", "NHWC"))

    a = bn_relu(x, params["bn1_gamma"], params["bn1_beta"],
                params["bn1_mean"], params["bn1_var"])
    c1 = conv(a, params["w1"], stride, 1)
    m = bn_relu(c1, params["bn2_gamma"], params["bn2_beta"],
                params["bn2_mean"], params["bn2_var"])
    c2 = conv(m, params["w2"], 1, 1)
    sc = x if identity else conv(a, params["w_sc"], stride, 0)
    return jnp.transpose(sc + c2, (0, 3, 1, 2))


def init_params(key, in_planes, out_planes, need_shortcut):
    ks = jax.random.split(key, 10)
    p = {
        "bn1_gamma": jax.random.uniform(ks[0], (in_planes,), jnp.float32, 0.5, 1.5),
        "bn1_beta":  jax.random.normal(ks[1], (in_planes,), jnp.float32) * 0.1,
        "bn1_mean":  jax.random.normal(ks[2], (in_planes,), jnp.float32) * 0.1,
        "bn1_var":   jax.random.uniform(ks[3], (in_planes,), jnp.float32, 0.5, 1.5),
        "w1":        jax.random.normal(ks[4], (out_planes, in_planes, 3, 3), jnp.float32) * 0.1,
        "bn2_gamma": jax.random.uniform(ks[5], (out_planes,), jnp.float32, 0.5, 1.5),
        "bn2_beta":  jax.random.normal(ks[6], (out_planes,), jnp.float32) * 0.1,
        "bn2_mean":  jax.random.normal(ks[7], (out_planes,), jnp.float32) * 0.1,
        "bn2_var":   jax.random.uniform(ks[8], (out_planes,), jnp.float32, 0.5, 1.5),
        "w2":        jax.random.normal(ks[9], (out_planes, out_planes, 3, 3), jnp.float32) * 0.1,
    }
    if need_shortcut:
        p["w_sc"] = jax.random.normal(jax.random.fold_in(key, 99),
                                      (out_planes, in_planes, 1, 1), jnp.float32) * 0.1
    return p


if __name__ == "__main__":
    key = jax.random.PRNGKey(0)
    kx, kp1, kp2 = jax.random.split(key, 3)

    x = jax.random.normal(kx, (2, 8, 16, 16), jnp.float32)   # NCHW, like PyTorch

    # Config A: in==out, stride 1 -> identity shortcut.
    pA = init_params(kp1, 8, 8, need_shortcut=False)
    # Config B: in!=out, stride 1 -> 1x1 projection shortcut.
    # Config C: in!=out, stride 2 -> strided conv + strided 1x1 projection.
    pB = init_params(kp2, 8, 16, need_shortcut=True)

    configs = [("A identity  s=1", pA, 1, (2, 8, 16, 16)),
               ("B projection s=1", pB, 1, (2, 16, 16, 16)),
               ("C projection s=2", pB, 2, (2, 16, 8, 8))]

    for name, p, s, shape in configs:
        ref = reference_block(x, p, stride=s)

        # exact-path check (f32 matmul operands)
        out = jax.block_until_ready(
            wrn_basic_block(x, p, stride=s, matmul_dtype=jnp.float32))
        assert out.shape == shape, (name, out.shape)
        assert jnp.allclose(out, ref, atol=2e-4, rtol=2e-4), f"{name}: f32 mismatch"

        # performance-path check (bf16 matmul operands, f32 accumulation)
        out_bf = jax.block_until_ready(
            wrn_basic_block(x, p, stride=s, matmul_dtype=jnp.bfloat16))
        assert out_bf.shape == shape, (name, out_bf.shape)
        assert jnp.allclose(out_bf, ref, atol=1e-1, rtol=1e-1), f"{name}: bf16 mismatch"

    print("KERNEL_OK")
</pallas_src>

<mosaic_0001>
module attributes {stable_mosaic.version = 11 : i64} {
  func.func @kernel(%arg0: i32, %arg1: memref<1x16x16x8xf32, #tpu.memory_space<vmem>>, %arg2: memref<1x8xf32, #tpu.memory_space<vmem>>, %arg3: memref<1x8xf32, #tpu.memory_space<vmem>>, %arg4: memref<72x8xf32, #tpu.memory_space<vmem>>, %arg5: memref<1x8xf32, #tpu.memory_space<vmem>>, %arg6: memref<72x8xf32, #tpu.memory_space<vmem>>, %arg7: memref<1x256x8xf32, #tpu.memory_space<vmem>>, %arg8: memref<18x18x8xf32, #tpu.memory_space<vmem>>, %arg9: memref<256x72xf32, #tpu.memory_space<vmem>>, %arg10: memref<18x18x8xf32, #tpu.memory_space<vmem>>, %arg11: memref<256x72xf32, #tpu.memory_space<vmem>>) attributes {dimension_semantics = [#tpu.dimension_semantics<parallel>], iteration_bounds = array<i64: 2>, scalar_prefetch = 0 : i64, scratch_operands = 4 : i64, tpu.core_type = #tpu.core_type<tc>, window_params = [{transform_indices = @transform_0, window_bounds = array<i64: 1, 16, 16, 8>}, {pipeline_mode = #tpu.pipeline_mode<synchronous>, transform_indices = @transform_1, window_bounds = array<i64: 1, 8>}, {pipeline_mode = #tpu.pipeline_mode<synchronous>, transform_indices = @transform_2, window_bounds = array<i64: 1, 8>}, {pipeline_mode = #tpu.pipeline_mode<synchronous>, transform_indices = @transform_3, window_bounds = array<i64: 72, 8>}, {pipeline_mode = #tpu.pipeline_mode<synchronous>, transform_indices = @transform_4, window_bounds = array<i64: 1, 8>}, {pipeline_mode = #tpu.pipeline_mode<synchronous>, transform_indices = @transform_5, window_bounds = array<i64: 72, 8>}, {transform_indices = @transform_6, window_bounds = array<i64: 1, 256, 8>}]} {
    %cst = arith.constant 0.000000e+00 : f32
    %0 = vector.broadcast %cst : f32 to vector<1x18x8xf32>
    %cst_0 = arith.constant 0.000000e+00 : f32
    %1 = vector.broadcast %cst_0 : f32 to vector<18x1x8xf32>
    %c0 = arith.constant 0 : index
    %c0_1 = arith.constant 0 : index
    %c0_2 = arith.constant 0 : index
    %2 = vector.load %arg8[%c0, %c0_1, %c0_2] : memref<18x18x8xf32, #tpu.memory_space<vmem>>, vector<1x18x8xf32>
    tpu.vector_store %arg8[%c0, %c0_1, %c0_2], %0 {strides = array<i32>} : memref<18x18x8xf32, #tpu.memory_space<vmem>>, vector<1x18x8xf32>,
    %c17 = arith.constant 17 : index
    %c0_3 = arith.constant 0 : index
    %c0_4 = arith.constant 0 : index
    %3 = vector.load %arg8[%c17, %c0_3, %c0_4] : memref<18x18x8xf32, #tpu.memory_space<vmem>>, vector<1x18x8xf32>
    tpu.vector_store %arg8[%c17, %c0_3, %c0_4], %0 {strides = array<i32>} : memref<18x18x8xf32, #tpu.memory_space<vmem>>, vector<1x18x8xf32>,
    %c0_5 = arith.constant 0 : index
    %c0_6 = arith.constant 0 : index
    %c0_7 = arith.constant 0 : index
    %4 = vector.load %arg8[%c0_5, %c0_6, %c0_7] : memref<18x18x8xf32, #tpu.memory_space<vmem>>, vector<18x1x8xf32>
    tpu.vector_store %arg8[%c0_5, %c0_6, %c0_7], %1 {strides = array<i32>} : memref<18x18x8xf32, #tpu.memory_space<vmem>>, vector<18x1x8xf32>,
    %c0_8 = arith.constant 0 : index
    %c17_9 = arith.constant 17 : index
    %c0_10 = arith.constant 0 : index
    %5 = vector.load %arg8[%c0_8, %c17_9, %c0_10] : memref<18x18x8xf32, #tpu.memory_space<vmem>>, vector<18x1x8xf32>
    tpu.vector_store %arg8[%c0_8, %c17_9, %c0_10], %1 {strides = array<i32>} : memref<18x18x8xf32, #tpu.memory_space<vmem>>, vector<18x1x8xf32>,
    %c0_11 = arith.constant 0 : index
    %c0_12 = arith.constant 0 : index
    %c0_13 = arith.constant 0 : index
    %c0_14 = arith.constant 0 : index
    %6 = vector.load %arg1[%c0_11, %c0_12, %c0_13, %c0_14] : memref<1x16x16x8xf32, #tpu.memory_space<vmem>>, vector<1x16x16x8xf32>
    %7 = vector.shape_cast %6 : vector<1x16x16x8xf32> to vector<16x16x8xf32>
    %c0_15 = arith.constant 0 : index
    %c0_16 = arith.constant 0 : index
    %8 = vector.load %arg2[%c0_15, %c0_16] : memref<1x8xf32, #tpu.memory_space<vmem>>, vector<1x8xf32>
    %9 = vector.shape_cast %8 : vector<1x8xf32> to vector<1x1x8xf32>
    %10 = vector.broadcast %9 : vector<1x1x8xf32> to vector<16x16x8xf32>
    %11 = arith.mulf %7, %10 : vector<16x16x8xf32>
    %c0_17 = arith.constant 0 : index
    %c0_18 = arith.constant 0 : index
    %12 = vector.load %arg3[%c0_17, %c0_18] : memref<1x8xf32, #tpu.memory_space<vmem>>, vector<1x8xf32>
    %13 = vector.shape_cast %12 : vector<1x8xf32> to vector<1x1x8xf32>
    %14 = vector.broadcast %13 : vector<1x1x8xf32> to vector<16x16x8xf32>
    %15 = arith.addf %11, %14 : vector<16x16x8xf32>
    %cst_19 = arith.constant 0.000000e+00 : f32
    %16 = vector.broadcast %cst_19 : f32 to vector<16x16x8xf32>
    %17 = arith.maximumf %15, %16 : vector<16x16x8xf32>
    %c1 = arith.constant 1 : index
    %c1_20 = arith.constant 1 : index
    %c0_21 = arith.constant 0 : index
    %18 = vector.load %arg8[%c1, %c1_20, %c0_21] : memref<18x18x8xf32, #tpu.memory_space<vmem>>, vector<16x16x8xf32>
    tpu.vector_store %arg8[%c1, %c1_20, %c0_21], %17 {strides = array<i32>} : memref<18x18x8xf32, #tpu.memory_space<vmem>>, vector<16x16x8xf32>,
    %c0_22 = arith.constant 0 : index
    %c0_23 = arith.constant 0 : index
    %c0_24 = arith.constant 0 : index
    %19 = vector.load %arg8[%c0_22, %c0_23, %c0_24] : memref<18x18x8xf32, #tpu.memory_space<vmem>>, vector<16x16x8xf32>
    %20 = vector.shape_cast %19 : vector<16x16x8xf32> to vector<256x8xf32>
    %c0_25 = arith.constant 0 : index
    %c0_26 = arith.constant 0 : index
    %21 = vector.load %arg9[%c0_25, %c0_26] : memref<256x72xf32, #tpu.memory_space<vmem>>, vector<256x8xf32>
    tpu.vector_store %arg9[%c0_25, %c0_26], %20 {strides = array<i32>} : memref<256x72xf32, #tpu.memory_space<vmem>>, vector<256x8xf32>,
    %c0_27 = arith.constant 0 : index
    %c1_28 = arith.constant 1 : index
    %c0_29 = arith.constant 0 : index
    %22 = vector.load %arg8[%c0_27, %c1_28, %c0_29] : memref<18x18x8xf32, #tpu.memory_space<vmem>>, vector<16x16x8xf32>
    %23 = vector.shape_cast %22 : vector<16x16x8xf32> to vector<256x8xf32>
    %c0_30 = arith.constant 0 : index
    %c8 = arith.constant 8 : index
    %24 = vector.load %arg9[%c0_30, %c8] : memref<256x72xf32, #tpu.memory_space<vmem>>, vector<256x8xf32>
    tpu.vector_store %arg9[%c0_30, %c8], %23 {strides = array<i32>} : memref<256x72xf32, #tpu.memory_space<vmem>>, vector<256x8xf32>,
    %c0_31 = arith.constant 0 : index
    %c2 = arith.constant 2 : index
    %c0_32 = arith.constant 0 : index
    %25 = vector.load %arg8[%c0_31, %c2, %c0_32] : memref<18x18x8xf32, #tpu.memory_space<vmem>>, vector<16x16x8xf32>
    %26 = vector.shape_cast %25 : vector<16x16x8xf32> to vector<256x8xf32>
    %c0_33 = arith.constant 0 : index
    %c16 = arith.constant 16 : index
    %27 = vector.load %arg9[%c0_33, %c16] : memref<256x72xf32, #tpu.memory_space<vmem>>, vector<256x8xf32>
    tpu.vector_store %arg9[%c0_33, %c16], %26 {strides = array<i32>} : memref<256x72xf32, #tpu.memory_space<vmem>>, vector<256x8xf32>,
    %c1_34 = arith.constant 1 : index
    %c0_35 = arith.constant 0 : index
    %c0_36 = arith.constant 0 : index
    %28 = vector.load %arg8[%c1_34, %c0_35, %c0_36] : memref<18x18x8xf32, #tpu.memory_space<vmem>>, vector<16x16x8xf32>
    %29 = vector.shape_cast %28 : vector<16x16x8xf32> to vector<256x8xf32>
    %c0_37 = arith.constant 0 : index
    %c24 = arith.constant 24 : index
    %30 = vector.load %arg9[%c0_37, %c24] : memref<256x72xf32, #tpu.memory_space<vmem>>, vector<256x8xf32>
    tpu.vector_store %arg9[%c0_37, %c24], %29 {strides = array<i32>} : memref<256x72xf32, #tpu.memory_space<vmem>>, vector<256x8xf32>,
    %c1_38 = arith.constant 1 : index
    %c1_39 = arith.constant 1 : index
    %c0_40 = arith.constant 0 : index
    %31 = vector.load %arg8[%c1_38, %c1_39, %c0_40] : memref<18x18x8xf32, #tpu.memory_space<vmem>>, vector<16x16x8xf32>
    %32 = vector.shape_cast %31 : vector<16x16x8xf32> to vector<256x8xf32>
    %c0_41 = arith.constant 0 : index
    %c32 = arith.constant 32 : index
    %33 = vector.load %arg9[%c0_41, %c32] : memref<256x72xf32, #tpu.memory_space<vmem>>, vector<256x8xf32>
    tpu.vector_store %arg9[%c0_41, %c32], %32 {strides = array<i32>} : memref<256x72xf32, #tpu.memory_space<vmem>>, vector<256x8xf32>,
    %c1_42 = arith.constant 1 : index
    %c2_43 = arith.constant 2 : index
    %c0_44 = arith.constant 0 : index
    %34 = vector.load %arg8[%c1_42, %c2_43, %c0_44] : memref<18x18x8xf32, #tpu.memory_space<vmem>>, vector<16x16x8xf32>
    %35 = vector.shape_cast %34 : vector<16x16x8xf32> to vector<256x8xf32>
    %c0_45 = arith.constant 0 : index
    %c40 = arith.constant 40 : index
    %36 = vector.load %arg9[%c0_45, %c40] : memref<256x72xf32, #tpu.memory_space<vmem>>, vector<256x8xf32>
    tpu.vector_store %arg9[%c0_45, %c40], %35 {strides = array<i32>} : memref<256x72xf32, #tpu.memory_space<vmem>>, vector<256x8xf32>,
    %c2_46 = arith.constant 2 : index
    %c0_47 = arith.constant 0 : index
    %c0_48 = arith.constant 0 : index
    %37 = vector.load %arg8[%c2_46, %c0_47, %c0_48] : memref<18x18x8xf32, #tpu.memory_space<vmem>>, vector<16x16x8xf32>
    %38 = vector.shape_cast %37 : vector<16x16x8xf32> to vector<256x8xf32>
    %c0_49 = arith.constant 0 : index
    %c48 = arith.constant 48 : index
    %39 = vector.load %arg9[%c0_49, %c48] : memref<256x72xf32, #tpu.memory_space<vmem>>, vector<256x8xf32>
    tpu.vector_store %arg9[%c0_49, %c48], %38 {strides = array<i32>} : memref<256x72xf32, #tpu.memory_space<vmem>>, vector<256x8xf32>,
    %c2_50 = arith.constant 2 : index
    %c1_51 = arith.constant 1 : index
    %c0_52 = arith.constant 0 : index
    %40 = vector.load %arg8[%c2_50, %c1_51, %c0_52] : memref<18x18x8xf32, #tpu.memory_space<vmem>>, vector<16x16x8xf32>
    %41 = vector.shape_cast %40 : vector<16x16x8xf32> to vector<256x8xf32>
    %c0_53 = arith.constant 0 : index
    %c56 = arith.constant 56 : index
    %42 = vector.load %arg9[%c0_53, %c56] : memref<256x72xf32, #tpu.memory_space<vmem>>, vector<256x8xf32>
    tpu.vector_store %arg9[%c0_53, %c56], %41 {strides = array<i32>} : memref<256x72xf32, #tpu.memory_space<vmem>>, vector<256x8xf32>,
    %c2_54 = arith.constant 2 : index
    %c2_55 = arith.constant 2 : index
    %c0_56 = arith.constant 0 : index
    %43 = vector.load %arg8[%c2_54, %c2_55, %c0_56] : memref<18x18x8xf32, #tpu.memory_space<vmem>>, vector<16x16x8xf32>
    %44 = vector.shape_cast %43 : vector<16x16x8xf32> to vector<256x8xf32>
    %c0_57 = arith.constant 0 : index
    %c64 = arith.constant 64 : index
    %45 = vector.load %arg9[%c0_57, %c64] : memref<256x72xf32, #tpu.memory_space<vmem>>, vector<256x8xf32>
    tpu.vector_store %arg9[%c0_57, %c64], %44 {strides = array<i32>} : memref<256x72xf32, #tpu.memory_space<vmem>>, vector<256x8xf32>,
    %c0_58 = arith.constant 0 : index
    %c0_59 = arith.constant 0 : index
    %46 = vector.load %arg9[%c0_58, %c0_59] : memref<256x72xf32, #tpu.memory_space<vmem>>, vector<256x72xf32>
    %c0_60 = arith.constant 0 : index
    %c0_61 = arith.constant 0 : index
    %47 = vector.load %arg4[%c0_60, %c0_61] : memref<72x8xf32, #tpu.memory_space<vmem>>, vector<72x8xf32>
    %cst_62 = arith.constant dense<0.000000e+00> : vector<256x8xf32>
    %48 = tpu.matmul %46, %47, %cst_62 {dimension_numbers = #tpu.dot_dimension_numbers<[1], [0], [0], [1], [0, 0, 1, 1], [], []>} : vector<256x72xf32>, vector<72x8xf32>, vector<256x8xf32> -> vector<256x8xf32>
    %c0_63 = arith.constant 0 : index
    %c0_64 = arith.constant 0 : index
    %49 = vector.load %arg5[%c0_63, %c0_64] : memref<1x8xf32, #tpu.memory_space<vmem>>, vector<1x8xf32>
    %50 = vector.broadcast %49 : vector<1x8xf32> to vector<256x8xf32>
    %51 = arith.addf %48, %50 : vector<256x8xf32>
    %cst_65 = arith.constant 0.000000e+00 : f32
    %52 = vector.broadcast %cst_65 : f32 to vector<256x8xf32>
    %53 = arith.maximumf %51, %52 : vector<256x8xf32>
    %cst_66 = arith.constant 0.000000e+00 : f32
    %54 = vector.broadcast %cst_66 : f32 to vector<1x18x8xf32>
    %cst_67 = arith.constant 0.000000e+00 : f32
    %55 = vector.broadcast %cst_67 : f32 to vector<18x1x8xf32>
    %c0_68 = arith.constant 0 : index
    %c0_69 = arith.constant 0 : index
    %c0_70 = arith.constant 0 : index
    %56 = vector.load %arg10[%c0_68, %c0_69, %c0_70] : memref<18x18x8xf32, #tpu.memory_space<vmem>>, vector<1x18x8xf32>
    tpu.vector_store %arg10[%c0_68, %c0_69, %c0_70], %54 {strides = array<i32>} : memref<18x18x8xf32, #tpu.memory_space<vmem>>, vector<1x18x8xf32>,
    %c17_71 = arith.constant 17 : index
    %c0_72 = arith.constant 0 : index
    %c0_73 = arith.constant 0 : index
    %57 = vector.load %arg10[%c17_71, %c0_72, %c0_73] : memref<18x18x8xf32, #tpu.memory_space<vmem>>, vector<1x18x8xf32>
    tpu.vector_store %arg10[%c17_71, %c0_72, %c0_73], %54 {strides = array<i32>} : memref<18x18x8xf32, #tpu.memory_space<vmem>>, vector<1x18x8xf32>,
    %c0_74 = arith.constant 0 : index
    %c0_75 = arith.constant 0 : index
    %c0_76 = arith.constant 0 : index
    %58 = vector.load %arg10[%c0_74, %c0_75, %c0_76] : memref<18x18x8xf32, #tpu.memory_space<vmem>>, vector<18x1x8xf32>
    tpu.vector_store %arg10[%c0_74, %c0_75, %c0_76], %55 {strides = array<i32>} : memref<18x18x8xf32, #tpu.memory_space<vmem>>, vector<18x1x8xf32>,
    %c0_77 = arith.constant 0 : index
    %c17_78 = arith.constant 17 : index
    %c0_79 = arith.constant 0 : index
    %59 = vector.load %arg10[%c0_77, %c17_78, %c0_79] : memref<18x18x8xf32, #tpu.memory_space<vmem>>, vector<18x1x8xf32>
    tpu.vector_store %arg10[%c0_77, %c17_78, %c0_79], %55 {strides = array<i32>} : memref<18x18x8xf32, #tpu.memory_space<vmem>>, vector<18x1x8xf32>,
    %60 = vector.shape_cast %53 : vector<256x8xf32> to vector<16x16x8xf32>
    %c1_80 = arith.constant 1 : index
    %c1_81 = arith.constant 1 : index
    %c0_82 = arith.constant 0 : index
    %61 = vector.load %arg10[%c1_80, %c1_81, %c0_82] : memref<18x18x8xf32, #tpu.memory_space<vmem>>, vector<16x16x8xf32>
    tpu.vector_store %arg10[%c1_80, %c1_81, %c0_82], %60 {strides = array<i32>} : memref<18x18x8xf32, #tpu.memory_space<vmem>>, vector<16x16x8xf32>,
    %c0_83 = arith.constant 0 : index
    %c0_84 = arith.constant 0 : index
    %c0_85 = arith.constant 0 : index
    %62 = vector.load %arg10[%c0_83, %c0_84, %c0_85] : memref<18x18x8xf32, #tpu.memory_space<vmem>>, vector<16x16x8xf32>
    %63 = vector.shape_cast %62 : vector<16x16x8xf32> to vector<256x8xf32>
    %c0_86 = arith.constant 0 : index
    %c0_87 = arith.constant 0 : index
    %64 = vector.load %arg11[%c0_86, %c0_87] : memref<256x72xf32, #tpu.memory_space<vmem>>, vector<256x8xf32>
    tpu.vector_store %arg11[%c0_86, %c0_87], %63 {strides = array<i32>} : memref<256x72xf32, #tpu.memory_space<vmem>>, vector<256x8xf32>,
    %c0_88 = arith.constant 0 : index
    %c1_89 = arith.constant 1 : index
    %c0_90 = arith.constant 0 : index
    %65 = vector.load %arg10[%c0_88, %c1_89, %c0_90] : memref<18x18x8xf32, #tpu.memory_space<vmem>>, vector<16x16x8xf32>
    %66 = vector.shape_cast %65 : vector<16x16x8xf32> to vector<256x8xf32>
    %c0_91 = arith.constant 0 : index
    %c8_92 = arith.constant 8 : index
    %67 = vector.load %arg11[%c0_91, %c8_92] : memref<256x72xf32, #tpu.memory_space<vmem>>, vector<256x8xf32>
    tpu.vector_store %arg11[%c0_91, %c8_92], %66 {strides = array<i32>} : memref<256x72xf32, #tpu.memory_space<vmem>>, vector<256x8xf32>,
    %c0_93 = arith.constant 0 : index
    %c2_94 = arith.constant 2 : index
    %c0_95 = arith.constant 0 : index
    %68 = vector.load %arg10[%c0_93, %c2_94, %c0_95] : memref<18x18x8xf32, #tpu.memory_space<vmem>>, vector<16x16x8xf32>
    %69 = vector.shape_cast %68 : vector<16x16x8xf32> to vector<256x8xf32>
    %c0_96 = arith.constant 0 : index
    %c16_97 = arith.constant 16 : index
    %70 = vector.load %arg11[%c0_96, %c16_97] : memref<256x72xf32, #tpu.memory_space<vmem>>, vector<256x8xf32>
    tpu.vector_store %arg11[%c0_96, %c16_97], %69 {strides = array<i32>} : memref<256x72xf32, #tpu.memory_space<vmem>>, vector<256x8xf32>,
    %c1_98 = arith.constant 1 : index
    %c0_99 = arith.constant 0 : index
    %c0_100 = arith.constant 0 : index
    %71 = vector.load %arg10[%c1_98, %c0_99, %c0_100] : memref<18x18x8xf32, #tpu.memory_space<vmem>>, vector<16x16x8xf32>
    %72 = vector.shape_cast %71 : vector<16x16x8xf32> to vector<256x8xf32>
    %c0_101 = arith.constant 0 : index
    %c24_102 = arith.constant 24 : index
    %73 = vector.load %arg11[%c0_101, %c24_102] : memref<256x72xf32, #tpu.memory_space<vmem>>, vector<256x8xf32>
    tpu.vector_store %arg11[%c0_101, %c24_102], %72 {strides = array<i32>} : memref<256x72xf32, #tpu.memory_space<vmem>>, vector<256x8xf32>,
    %c1_103 = arith.constant 1 : index
    %c1_104 = arith.constant 1 : index
    %c0_105 = arith.constant 0 : index
    %74 = vector.load %arg10[%c1_103, %c1_104, %c0_105] : memref<18x18x8xf32, #tpu.memory_space<vmem>>, vector<16x16x8xf32>
    %75 = vector.shape_cast %74 : vector<16x16x8xf32> to vector<256x8xf32>
    %c0_106 = arith.constant 0 : index
    %c32_107 = arith.constant 32 : index
    %76 = vector.load %arg11[%c0_106, %c32_107] : memref<256x72xf32, #tpu.memory_space<vmem>>, vector<256x8xf32>
    tpu.vector_store %arg11[%c0_106, %c32_107], %75 {strides = array<i32>} : memref<256x72xf32, #tpu.memory_space<vmem>>, vector<256x8xf32>,
    %c1_108 = arith.constant 1 : index
    %c2_109 = arith.constant 2 : index
    %c0_110 = arith.constant 0 : index
    %77 = vector.load %arg10[%c1_108, %c2_109, %c0_110] : memref<18x18x8xf32, #tpu.memory_space<vmem>>, vector<16x16x8xf32>
    %78 = vector.shape_cast %77 : vector<16x16x8xf32> to vector<256x8xf32>
    %c0_111 = arith.constant 0 : index
    %c40_112 = arith.constant 40 : index
    %79 = vector.load %arg11[%c0_111, %c40_112] : memref<256x72xf32, #tpu.memory_space<vmem>>, vector<256x8xf32>
    tpu.vector_store %arg11[%c0_111, %c40_112], %78 {strides = array<i32>} : memref<256x72xf32, #tpu.memory_space<vmem>>, vector<256x8xf32>,
    %c2_113 = arith.constant 2 : index
    %c0_114 = arith.constant 0 : index
    %c0_115 = arith.constant 0 : index
    %80 = vector.load %arg10[%c2_113, %c0_114, %c0_115] : memref<18x18x8xf32, #tpu.memory_space<vmem>>, vector<16x16x8xf32>
    %81 = vector.shape_cast %80 : vector<16x16x8xf32> to vector<256x8xf32>
    %c0_116 = arith.constant 0 : index
    %c48_117 = arith.constant 48 : index
    %82 = vector.load %arg11[%c0_116, %c48_117] : memref<256x72xf32, #tpu.memory_space<vmem>>, vector<256x8xf32>
    tpu.vector_store %arg11[%c0_116, %c48_117], %81 {strides = array<i32>} : memref<256x72xf32, #tpu.memory_space<vmem>>, vector<256x8xf32>,
    %c2_118 = arith.constant 2 : index
    %c1_119 = arith.constant 1 : index
    %c0_120 = arith.constant 0 : index
    %83 = vector.load %arg10[%c2_118, %c1_119, %c0_120] : memref<18x18x8xf32, #tpu.memory_space<vmem>>, vector<16x16x8xf32>
    %84 = vector.shape_cast %83 : vector<16x16x8xf32> to vector<256x8xf32>
    %c0_121 = arith.constant 0 : index
    %c56_122 = arith.constant 56 : index
    %85 = vector.load %arg11[%c0_121, %c56_122] : memref<256x72xf32, #tpu.memory_space<vmem>>, vector<256x8xf32>
    tpu.vector_store %arg11[%c0_121, %c56_122], %84 {strides = array<i32>} : memref<256x72xf32, #tpu.memory_space<vmem>>, vector<256x8xf32>,
    %c2_123 = arith.constant 2 : index
    %c2_124 = arith.constant 2 : index
    %c0_125 = arith.constant 0 : index
    %86 = vector.load %arg10[%c2_123, %c2_124, %c0_125] : memref<18x18x8xf32, #tpu.memory_space<vmem>>, vector<16x16x8xf32>
    %87 = vector.shape_cast %86 : vector<16x16x8xf32> to vector<256x8xf32>
    %c0_126 = arith.constant 0 : index
    %c64_127 = arith.constant 64 : index
    %88 = vector.load %arg11[%c0_126, %c64_127] : memref<256x72xf32, #tpu.memory_space<vmem>>, vector<256x8xf32>
    tpu.vector_store %arg11[%c0_126, %c64_127], %87 {strides = array<i32>} : memref<256x72xf32, #tpu.memory_space<vmem>>, vector<256x8xf32>,
    %c0_128 = arith.constant 0 : index
    %c0_129 = arith.constant 0 : index
    %89 = vector.load %arg11[%c0_128, %c0_129] : memref<256x72xf32, #tpu.memory_space<vmem>>, vector<256x72xf32>
    %c0_130 = arith.constant 0 : index
    %c0_131 = arith.constant 0 : index
    %90 = vector.load %arg6[%c0_130, %c0_131] : memref<72x8xf32, #tpu.memory_space<vmem>>, vector<72x8xf32>
    %cst_132 = arith.constant dense<0.000000e+00> : vector<256x8xf32>
    %91 = tpu.matmul %89, %90, %cst_132 {dimension_numbers = #tpu.dot_dimension_numbers<[1], [0], [0], [1], [0, 0, 1, 1], [], []>} : vector<256x72xf32>, vector<72x8xf32>, vector<256x8xf32> -> vector<256x8xf32>
    %c0_133 = arith.constant 0 : index
    %c0_134 = arith.constant 0 : index
    %c0_135 = arith.constant 0 : index
    %c0_136 = arith.constant 0 : index
    %92 = vector.load %arg1[%c0_133, %c0_134, %c0_135, %c0_136] : memref<1x16x16x8xf32, #tpu.memory_space<vmem>>, vector<1x16x16x8xf32>
    %93 = vector.shape_cast %92 : vector<1x16x16x8xf32> to vector<16x16x8xf32>
    %94 = vector.shape_cast %93 : vector<16x16x8xf32> to vector<256x8xf32>
    %95 = arith.addf %94, %91 : vector<256x8xf32>
    %c0_137 = arith.constant 0 : index
    %c0_138 = arith.constant 0 : index
    %c0_139 = arith.constant 0 : index
    %96 = vector.load %arg7[%c0_137, %c0_138, %c0_139] : memref<1x256x8xf32, #tpu.memory_space<vmem>>, vector<1x256x8xf32>
    %97 = vector.shape_cast %96 : vector<1x256x8xf32> to vector<256x8xf32>
    %98 = vector.shape_cast %95 : vector<256x8xf32> to vector<1x256x8xf32>
    tpu.vector_store %arg7[%c0_137, %c0_138, %c0_139], %98 {strides = array<i32>} : memref<1x256x8xf32, #tpu.memory_space<vmem>>, vector<1x256x8xf32>,
    return
  }
  func.func @transform_0(%arg0: i32) -> (i32, i32, i32, i32) {
    %c0_i32 = arith.constant 0 : i32
    %c0_i32_0 = arith.constant 0 : i32
    %c0_i32_1 = arith.constant 0 : i32
    %c0_i32_2 = arith.constant 0 : i32
    return %arg0, %c0_i32, %c0_i32_0, %c0_i32_1 : i32, i32, i32, i32
  }
  func.func @transform_1(%arg0: i32) -> (i32, i32) {
    %c0_i32 = arith.constant 0 : i32
    %c0_i32_0 = arith.constant 0 : i32
    %c0_i32_1 = arith.constant 0 : i32
    return %c0_i32, %c0_i32_0 : i32, i32
  }
  func.func @transform_2(%arg0: i32) -> (i32, i32) {
    %c0_i32 = arith.constant 0 : i32
    %c0_i32_0 = arith.constant 0 : i32
    %c0_i32_1 = arith.constant 0 : i32
    return %c0_i32, %c0_i32_0 : i32, i32
  }
  func.func @transform_3(%arg0: i32) -> (i32, i32) {
    %c0_i32 = arith.constant 0 : i32
    %c0_i32_0 = arith.constant 0 : i32
    %c0_i32_1 = arith.constant 0 : i32
    return %c0_i32, %c0_i32_0 : i32, i32
  }
  func.func @transform_4(%arg0: i32) -> (i32, i32) {
    %c0_i32 = arith.constant 0 : i32
    %c0_i32_0 = arith.constant 0 : i32
    %c0_i32_1 = arith.constant 0 : i32
    return %c0_i32, %c0_i32_0 : i32, i32
  }
  func.func @transform_5(%arg0: i32) -> (i32, i32) {
    %c0_i32 = arith.constant 0 : i32
    %c0_i32_0 = arith.constant 0 : i32
    %c0_i32_1 = arith.constant 0 : i32
    return %c0_i32, %c0_i32_0 : i32, i32
  }
  func.func @transform_6(%arg0: i32) -> (i32, i32, i32) {
    %c0_i32 = arith.constant 0 : i32
    %c0_i32_0 = arith.constant 0 : i32
    %c0_i32_1 = arith.constant 0 : i32
    return %arg0, %c0_i32, %c0_i32_0 : i32, i32, i32
  }
}

</mosaic_0001>

<bundles_post_ra>
// kernel: tpu_custom_call.1
= control target key start
LH: loop header
LB: loop body
LE: loop exit
PB: predicated region body
PF: predicated region fallthrough
CT: control target
= control target key end

     0   :  { %11 = vsyncpa [#allocation7], 0  ;;  %s8183_s0 = inlined_call_operand.hbm [shape: f32[2,16,16,8], index: 0, kind: input, shape index: {}]   ;;  %s8184_s1 = inlined_call_operand.hbm [shape: f32[1,8], index: 1, kind: input, shape index: {}]   ;;  %s8185_s2 = inlined_call_operand.hbm [shape: f32[1,8], index: 2, kind: input, shape index: {}]   ;;  %s8186_s3 = inlined_call_operand.hbm [shape: f32[72,8], index: 3, kind: input, shape index: {}]   ;;  %s8187_s4 = inlined_call_operand.hbm [shape: f32[1,8], index: 4, kind: input, shape index: {}]   ;;  %s8188_s5 = inlined_call_operand.hbm [shape: f32[72,8], index: 5, kind: input, shape index: {}]   ;;  %s8189_s6 = inlined_call_operand.hbm [shape: f32[2,256,8], index: 6, kind: output, shape index: {}]  }
   0x1   :  { %13 = vsyncpa [#allocation7 + $0x1], 0 }
   0x2   :  { %14 = vsyncpa [#allocation10], 0 }
   0x3   :  { %15 = vsyncpa [#allocation13], 0 }
   0x4   :  { %16 = vsyncpa [#allocation16], 0 }
   0x5   :  { %17 = vsyncpa [#allocation8], 0 }
   0x6   :  { %19 = vsyncpa [#allocation8 + $0x1], 0  ;;  %s5591_s21 = smov 0   ;;  %s5593_s22 = smov 0  }
   0x7   :  { %s5595_s23 = smov 0   ;;  %s5597_s24 = smov 0  }
   0x8 LB: > { %s5537_s25 = smov [#allocation9]   ;;  %s5612_s27 = sadd.s32 4294967295, %s5535_s24   ;;  %s5535_s24 = sphi %s5597_s24, %s8304_s24   ;;  %s5531_s23 = sphi %s5595_s23, %s8303_s23   ;;  %s5527_s22 = sphi %s5593_s22, %s8302_s22   ;;  %s5523_s21 = sphi %s5591_s21, %s8301_s21  }
   0x9   : > { %s200_s26 = sshll.u32 %s5537_s25, 4  ;;  %p4840_p0 = scmp.ge.s32.totalorder %s5535_s24, 1  ;;  %s5617_s26 = int_to_ptr.vmem [resolvable:$true] %s200_s26 }
   0xa   : > { %p8190_p1 = scmp.eq.s32.totalorder %s5612_s27, 0  ;;  %p187_p2 = scmp.lt.s32.totalorder %s5535_s24, 3 }
   0xb   : > { %s5538_s29 = smov [#allocation12]   ;;  %s5539_s8 = smov [#allocation11]  }
   0xc   : > { %p5619_p3 = pnand %p4840_p0, %p187_p2  ;;  %s221_s30 = sshll.u32 %s5538_s29, 4  ;;  %s5626_s30 = int_to_ptr.vmem [resolvable:$true] %s221_s30 }
   0xd   : > { %s211_s9 = sshll.u32 %s5539_s8, 4  ;;  %s5287_s12 = scalar_lea.hbm %s8184_s1, 16  ;;  %s5634_s9 = int_to_ptr.vmem [resolvable:$true] %s211_s9 }
   0xe   : > { %s8223_s28 = scalar_select %p5619_p3, 1, 0 }
   0xf   : > { %p5202_p5 = pneg %p5619_p3  ;;  %p5288_p7 = scmp.ne.s32.totalorder %s8184_s1, %s5287_s12 }
  0x10   : > { %p5294_p11 = scmp.lt.u32.totalorder %s5287_s12, %s8184_s1 }
  0x11   : > { %p5630_p6 = pnand %p5202_p5, %p8190_p1 }
  0x13   : > { %p5644_p8 = pneg %p5630_p6 }
  0x15   : > { %p5290_p9 = pnand %p5644_p8, %p5288_p7 }
  0x17   : > { %p5291_p10 = pneg %p5290_p9 }
  0x19   : > { %p5296_p12 = pnand %p5294_p11, %p5291_p10 }
  0x1b   : > { %5299 = shalt.err (!%p5296_p12)
}
  0x1c   : > { %s5300_s18 = scalar_lea.vmem %s5617_s26, 16  ;;  %s5307_s19 = scalar_lea.vmem %s5617_s26, 32 }
  0x1d   : > { %p5301_p13 = scmp.ne.s32.totalorder %s5617_s26, %s5300_s18  ;;  %p5308_p5 = scmp.lt.s32.totalorder %s5617_s26, %s5617_s26 }
  0x1e   : > { %p5309_p7 = scmp.lt.s32.totalorder %s5307_s19, %s5300_s18 }
  0x1f   : > { %p5303_p0 = pnand %p5301_p13, %p5644_p8 }
  0x20   : > { %p5310_p9 = por %p5309_p7, %p5308_p5 }
  0x21   : > { %p5304_p2 = pneg %p5303_p0 }
  0x23   : > { %p5311_p4 = pnand %p5310_p9, %p5304_p2 }
  0x25   : > { %5314 = shalt.err (!%p5311_p4)
}
  0x26   : > { %5205 = dma.hbm_to_vmem [thread:$0]  (!%p5630_p6), %s8184_s1, 16, %s5617_s26, [#allocation10]  }
  0x27   : > { %s5315_s10 = scalar_lea.hbm %s8186_s3, 1152 }
  0x28   : > { %p5316_p10 = scmp.ne.s32.totalorder %s8186_s3, %s5315_s10  ;;  %p5322_p4 = scmp.lt.u32.totalorder %s5315_s10, %s8186_s3 }
  0x2a   : > { %p5318_p11 = pnand %p5316_p10, %p5644_p8 }
  0x2c   : > { %p5319_p12 = pneg %p5318_p11 }
  0x2e   : > { %p5324_p13 = pnand %p5322_p4, %p5319_p12 }
  0x30   : > { %5327 = shalt.err (!%p5324_p13)
}
  0x31   : > { %s5328_s26 = scalar_lea.vmem %s5626_s30, 1152  ;;  %p5336_p7 = scmp.lt.s32.totalorder %s5626_s30, %s5626_s30 }
  0x32   : > { %p5329_p0 = scmp.ne.s32.totalorder %s5626_s30, %s5328_s26  ;;  %p5337_p9 = scmp.lt.s32.totalorder %s5328_s26, %s5328_s26 }
  0x34   : > { %p5331_p2 = pnand %p5329_p0, %p5644_p8  ;;  %p5338_p10 = por %p5337_p9, %p5336_p7 }
  0x36   : > { %p5332_p5 = pneg %p5331_p2 }
  0x38   : > { %p5339_p11 = pnand %p5338_p10, %p5332_p5 }
  0x3a   : > { %5342 = shalt.err (!%p5339_p11)
}
  0x3b   : > { %s5540_s16 = smov 128   ;;  %s5541_s17 = smov 8  }
  0x3c   : > { %5211 = dma.hbm_to_vmem [thread:$0]  (!%p5630_p6), %s8186_s3, 1152, %s5626_s30, [#allocation13], %s5540_s16, %s5540_s16, %s5541_s17  }
  0x3d   : > { %s5343_s29 = scalar_lea.hbm %s8185_s2, 16 }
  0x3e   : > { %p5344_p12 = scmp.ne.s32.totalorder %s8185_s2, %s5343_s29  ;;  %p5350_p0 = scmp.lt.u32.totalorder %s5343_s29, %s8185_s2 }
  0x40   : > { %p5346_p4 = pnand %p5344_p12, %p5644_p8 }
  0x42   : > { %p5347_p13 = pneg %p5346_p4 }
  0x44   : > { %p5352_p2 = pnand %p5350_p0, %p5347_p13 }
  0x46   : > { %5355 = shalt.err (!%p5352_p2)
}
  0x47   : > { %s5356_s30 = scalar_lea.vmem %s5634_s9, 16  ;;  %s5363_s13 = scalar_lea.vmem %s5634_s9, 32 }
  0x48   : > { %p5357_p5 = scmp.ne.s32.totalorder %s5634_s9, %s5356_s30  ;;  %p5364_p10 = scmp.lt.s32.totalorder %s5634_s9, %s5634_s9 }
  0x49   : > { %p5365_p11 = scmp.lt.s32.totalorder %s5363_s13, %s5356_s30 }
  0x4a   : > { %p5359_p7 = pnand %p5357_p5, %p5644_p8 }
  0x4b   : > { %p5366_p12 = por %p5365_p11, %p5364_p10 }
  0x4c   : > { %p5360_p9 = pneg %p5359_p7 }
  0x4e   : > { %p5367_p4 = pnand %p5366_p12, %p5360_p9 }
  0x50   : > { %5370 = shalt.err (!%p5367_p4)
}
  0x51   : > { %5208 = dma.hbm_to_vmem [thread:$0]  (!%p5630_p6), %s8185_s2, 16, %s5634_s9, [#allocation10]  }
  0x52   : > { %s5542_s18 = smov [#allocation14]   ;;  %s5543_s20 = smov [#allocation15]  }
  0x53   : > { %s235_s19 = sshll.u32 %s5542_s18, 4  ;;  %s245_s25 = sshll.u32 %s5543_s20, 4  ;;  %s236_s19 = int_to_ptr.vmem [resolvable:$true] %s235_s19  ;;  %s246_s25 = int_to_ptr.vmem [resolvable:$true] %s245_s25 }
  0x54   : > { %s5371_s10 = scalar_lea.hbm %s8187_s4, 16 }
  0x55   : > { %p5372_p13 = scmp.ne.s32.totalorder %s8187_s4, %s5371_s10  ;;  %p5378_p5 = scmp.lt.u32.totalorder %s5371_s10, %s8187_s4 }
  0x57   : > { %p5374_p0 = pnand %p5372_p13, %p5644_p8 }
  0x59   : > { %p5375_p2 = pneg %p5374_p0 }
  0x5b   : > { %p5380_p7 = pnand %p5378_p5, %p5375_p2 }
  0x5d   : > { %5383 = shalt.err (!%p5380_p7)
}
  0x5e   : > { %s5384_s9 = scalar_lea.vmem %s236_s19, 16  ;;  %s5391_s14 = scalar_lea.vmem %s236_s19, 32 }
  0x5f   : > { %p5385_p9 = scmp.ne.s32.totalorder %s236_s19, %s5384_s9  ;;  %p5392_p12 = scmp.lt.s32.totalorder %s236_s19, %s236_s19 }
  0x60   : > { %p5393_p4 = scmp.lt.s32.totalorder %s5391_s14, %s5384_s9 }
  0x61   : > { %p5387_p10 = pnand %p5385_p9, %p5644_p8 }
  0x62   : > { %p5394_p1 = por %p5393_p4, %p5392_p12 }
  0x63   : > { %p5388_p11 = pneg %p5387_p10 }
  0x65   : > { %p5395_p3 = pnand %p5394_p1, %p5388_p11 }
  0x67   : > { %5398 = shalt.err (!%p5395_p3)
}
  0x68   : > { %5214 = dma.hbm_to_vmem [thread:$0]  (!%p5630_p6), %s8187_s4, 16, %s236_s19, [#allocation13]  }
  0x69   : > { %s5399_s8 = scalar_lea.hbm %s8188_s5, 1152 }
  0x6a   : > { %p5400_p13 = scmp.ne.s32.totalorder %s8188_s5, %s5399_s8  ;;  %p5406_p3 = scmp.lt.u32.totalorder %s5399_s8, %s8188_s5 }
  0x6c   : > { %p5402_p0 = pnand %p5400_p13, %p5644_p8 }
  0x6e   : > { %p5403_p1 = pneg %p5402_p0 }
  0x70   : > { %p5408_p2 = pnand %p5406_p3, %p5403_p1 }
  0x72   : > { %5411 = shalt.err (!%p5408_p2)
}
  0x73   : > { %s5412_s13 = scalar_lea.vmem %s246_s25, 1152  ;;  %p5420_p10 = scmp.lt.s32.totalorder %s246_s25, %s246_s25 }
  0x74   : > { %p5413_p5 = scmp.ne.s32.totalorder %s246_s25, %s5412_s13  ;;  %p5421_p11 = scmp.lt.s32.totalorder %s5412_s13, %s5412_s13 }
  0x76   : > { %p5415_p7 = pnand %p5413_p5, %p5644_p8  ;;  %p5422_p12 = por %p5421_p11, %p5420_p10 }
  0x78   : > { %p5416_p9 = pneg %p5415_p7 }
  0x7a   : > { %p5423_p4 = pnand %p5422_p12, %p5416_p9 }
  0x7c   : > { %5426 = shalt.err (!%p5423_p4)
}
  0x7d   : > { %5217 = dma.hbm_to_vmem [thread:$0]  (!%p5630_p6), %s8188_s5, 1152, %s246_s25, [#allocation16], %s5540_s16, %s5540_s16, %s5541_s17  }
  0x7e   : > { %s4839_s7 = sadd.s32 4294967294, %s5535_s24   ;;  %s5757_s15 = sadd.s32 1, %s5535_s24  }
  0x7f   : > { %s32_s14 = sadd.s32 1, %s5531_s23  ;;  %s29_s26 = ssub.s32 %s5535_s24, %s5757_s15 }
  0x80   : > { %p39_p8 = scmp.ne.s32.totalorder %s5531_s23, %s5527_s22  ;;  %p30_p13 = scmp.eq.s32.totalorder %s29_s26, 0 }
  0x81   : > { %p40_p0 = scmp.eq.s32.totalorder %s5535_s24, 0  ;;  %p45_p1 = scmp.ne.s32.totalorder %s5527_s22, %s5523_s21 }
  0x82   : > { %p174_p3 = scmp.eq.s32.totalorder %s5612_s27, 1  ;;  %p8226_p5 = scmp.eq.s32.totalorder %s5612_s27, 0 }
  0x83   : > { %s5769_s18 = scalar_select %p30_p13, %s5531_s23, %s32_s14  }
  0x84   : > { %p41_p2 = por %p40_p0, %p39_p8  ;;  %p5773_p7 = por %p8226_p5, %p45_p1 }
  0x85   : > { %p5777_p6 = por %p174_p3, %p39_p8  ;;  %p180_p9 = scmp.eq.s32.totalorder %s4839_s7, 1 }
  0x86   : > { %p5231_p10 = scmp.lt.s32.totalorder %s5535_s24, 2  ;;  %s259_s29 = sand.u32 1, %s5531_s23  }
  0x87   : > { %s8228_s25 = scalar_select %p5777_p6, 1, 0 }
  0x88   : > { %p5783_p11 = por %p180_p9, %p45_p1  ;;  %s4847_s10 = sshll.u32 %s259_s29, 8 }
  0x89   : > { %s4930_s11 = sshll.u32 %s5535_s24, 12  ;;  %s263_s19 = scalar_lea.vmem [#allocation6], %s4847_s10 }
  0x8a   : > { %s8229_s8 = scalar_select %p5783_p11, 1, 0 }
  0x8b   : > { %s5791_s13 = scalar_lea.hbm %s8183_s0, %s4930_s11  ;;  %s270_s9 = sshll.u32 %s263_s19, 4  ;;  %s5797_s9 = int_to_ptr.vmem [resolvable:$true] %s270_s9 }
  0x8c   : > { %p5793_p12 = pnand %p5231_p10, %p41_p2  ;;  %s5799_s14 = scalar_lea.sflag [#allocation7], %s259_s29 }
  0x8d   : > { %s5427_s26 = scalar_lea.hbm %s5791_s13, 4096  ;;  %s5432_s12 = scalar_lea.hbm %s8183_s0, 8192 }
  0x8e   : > { %p5428_p4 = scmp.ne.s32.totalorder %s5791_s13, %s5427_s26  ;;  %p5429_p8 = pneg %p5793_p12 }
  0x8f   : > { %p5433_p1 = scmp.lt.u32.totalorder %s5791_s13, %s8183_s0  ;;  %p5434_p3 = scmp.lt.u32.totalorder %s5432_s12, %s5427_s26 }
  0x90   : > { %p5430_p13 = pnand %p5429_p8, %p5428_p4  ;;  %p5436_p5 = scmp.lt.u32.totalorder %s5427_s26, %s5791_s13 }
  0x91   : > { %p5435_p2 = por %p5434_p3, %p5433_p1 }
  0x92   : > { %p5431_p0 = pneg %p5430_p13 }
  0x93   : > { %p5437_p9 = por %p5436_p5, %p5435_p2 }
  0x95   : > { %p5438_p10 = pnand %p5437_p9, %p5431_p0 }
  0x97   : > { %5441 = shalt.err (!%p5438_p10)
}
  0x98   : > { %s5442_s29 = scalar_lea.vmem %s5797_s9, 4096  ;;  %s5544_s10 = smov [#allocation6]  }
  0x99   : > { %p5443_p4 = scmp.ne.s32.totalorder %s5797_s9, %s5442_s29  ;;  %s5447_s11 = sshll.u32 %s5544_s10, 4  ;;  %s5448_s11 = int_to_ptr.vmem [resolvable:$false] %s5447_s11 }
  0x9a   : > { %s5449_s30 = scalar_lea.vmem %s5448_s11, 8192  ;;  %p5450_p6 = scmp.lt.s32.totalorder %s5797_s9, %s5448_s11 }
  0x9b   : > { %p5445_p13 = pnand %p5443_p4, %p5429_p8  ;;  %p5451_p1 = scmp.lt.s32.totalorder %s5449_s30, %s5442_s29 }
  0x9d   : > { %p5446_p11 = pneg %p5445_p13  ;;  %p5452_p3 = por %p5451_p1, %p5450_p6 }
  0x9f   : > { %p5453_p2 = pnand %p5452_p3, %p5446_p11 }
  0xa1   : > { %5456 = shalt.err (!%p5453_p2)
}
  0xa2   : > { %5221 = dma.hbm_to_vmem [thread:$0]  (!%p5793_p12), %s5791_s13, 4096, %s5797_s9, %s5799_s14, %s5540_s16, %s5540_s16, %s5541_s17  }
  0xa3   : > { %p8231_p8 = scmp.ne.s32.totalorder %s8223_s28, 0 }
  0xa5   : > { %282 = sbr.rel (%p8231_p8) target bundleno = 1884 (0x75c), region = 44 }
  0xac   : > { %s5833_s26 = sand.u32 1, %s5527_s22  }
  0xad   : > { %s4851_s12 = sshll.u32 %s5833_s26, 8  ;;  %s285_s19 = scalar_lea.sflag [#allocation7], %s5833_s26 }
  0xae   : > { %s5839_s7 = scalar_lea.vmem [#allocation6], %s4851_s12 }
  0xaf   : > { %5502 = dma.done.wait (%p5773_p7), %s285_s19, 4096  }
  0xb0   : > { %5504 = vsyncadd (%p5773_p7), %s285_s19, 4294963200  ;;  %p8232_p6 = scmp.eq.s32.totalorder %s5612_s27, 0 }
  0xb2   : > { %5506 = dma.done.wait (%p8232_p6), [#allocation10], 32   ;;  %p8233_p11 = pmov %p8232_p6 }
  0xb3   : > { %p8234_p12 = pmov %p8232_p6 }
  0xb4   : > { %5508 = vsyncadd (%p8233_p11), [#allocation10], 4294967264 }
  0xb5   : > { %5510 = dma.done.wait (%p8234_p12), [#allocation13], 1168   ;;  %p8235_p0 = pmov %p8232_p6 }
  0xb7   : > { %5512 = vsyncadd (%p8235_p0), [#allocation13], 4294966128  ;;  %p8236_p5 = pmov %p8235_p0 }
  0xb8   : > { %p8237_p9 = pmov %p8235_p0 }
  0xb9   : > { %5514 = dma.done.wait (%p8236_p5), [#allocation16], 1152  }
  0xba   : > { %5516 = vsyncadd (%p8237_p9), [#allocation16], 4294966144  ;;  %vm337_vm0 = vcmask 64512   ;;  %vm346_vm1 = vcmask 57344   ;;  %v5545_v0 = vmov 0.0   ;;  %vm340_vm2 = vcmask 58368  }
  0xbb   : > { %338 = vst.msk [vmem:[#allocation2] sm:$0xff] %vm337_vm0, %v5545_v0  ;;  %339 = vst.msk [vmem:[#allocation2 + $0x8] sm:$0xff] %vm337_vm0, %v5545_v0  ;;  %v383_v1 = vld [vmem:[%s5839_s7] sm:$0xff]  ;;  %v384_v6 = vld [vmem:[%s5839_s7 + $0x8] sm:$0xff]  ;;  %s5546_s28 = smov 8   ;;  %s5547_s16 = smov 16  }
  0xbc   : > { %343 = vst.msk [vmem:[#allocation2 + $0x198] sm:$0xff] %vm337_vm0, %v5545_v0  ;;  %344 = vst.msk [vmem:[#allocation2 + $0x1a0] sm:$0xff] %vm337_vm0, %v5545_v0  ;;  %v6022_v2 = vld [vmem:[#allocation9] ss:$0 sm:$0xff]  ;;  %v6024_v3 = vld [vmem:[#allocation11] ss:$0 sm:$0xff] }
  0xbd   : > { %348 = vst.msk [vmem:[#allocation2 + $0x18] sm:$0x1] %vm346_vm1, %v5545_v0  ;;  %349 = vst.msk [vmem:[#allocation2 + $0x30] sm:$0x1] %vm346_vm1, %v5545_v0  ;;  %v422_v5 = vmul.f32 %v6022_v2, %v383_v1  ;;  %v385_v7 = vld [vmem:[%s5839_s7 + $0x10] sm:$0xff]  ;;  %v423_v9 = vmul.f32 %v6022_v2, %v384_v6  ;;  %v386_v11 = vld [vmem:[%s5839_s7 + $0x18] sm:$0xff] }
  0xbe   : > { %350 = vst.msk [vmem:[#allocation2 + $0x48] sm:$0x1] %vm346_vm1, %v5545_v0  ;;  %351 = vst.msk [vmem:[#allocation2 + $0x60] sm:$0x1] %vm346_vm1, %v5545_v0  ;;  %v424_v10 = vmul.f32 %v6022_v2, %v385_v7  ;;  %v387_v12 = vld [vmem:[%s5839_s7 + $0x20] sm:$0xff]  ;;  %v425_v14 = vmul.f32 %v6022_v2, %v386_v11  ;;  %v388_v16 = vld [vmem:[%s5839_s7 + $0x28] sm:$0xff] }
  0xbf   : > { %352 = vst.msk [vmem:[#allocation2 + $0x78] sm:$0x1] %vm346_vm1, %v5545_v0  ;;  %353 = vst.msk [vmem:[#allocation2 + $0x90] sm:$0x1] %vm346_vm1, %v5545_v0  ;;  %v461_v13 = vadd.f32 %v6024_v3, %v422_v5  ;;  %v426_v15 = vmul.f32 %v6022_v2, %v387_v12  ;;  %v389_v17 = vld [vmem:[%s5839_s7 + $0x30] sm:$0xff]  ;;  %v390_v18 = vld [vmem:[%s5839_s7 + $0x38] sm:$0xff]  ;;  %v462_v19 = vadd.f32 %v6024_v3, %v423_v9 }
  0xc0   : > { %354 = vst.msk [vmem:[#allocation2 + $0xa8] sm:$0x1] %vm346_vm1, %v5545_v0  ;;  %355 = vst.msk [vmem:[#allocation2 + $0xc0] sm:$0x1] %vm346_vm1, %v5545_v0  ;;  %v463_v20 = vadd.f32 %v6024_v3, %v424_v10  ;;  %v427_v21 = vmul.f32 %v6022_v2, %v388_v16  ;;  %v428_v22 = vmul.f32 %v6022_v2, %v389_v17  ;;  %v391_v23 = vld [vmem:[%s5839_s7 + $0x40] sm:$0xff]  ;;  %v392_v28 = vld [vmem:[%s5839_s7 + $0x48] sm:$0xff] }
  0xc1   : > { %356 = vst.msk [vmem:[#allocation2 + $0xd8] sm:$0x1] %vm346_vm1, %v5545_v0  ;;  %357 = vst.msk [vmem:[#allocation2 + $0xf0] sm:$0x1] %vm346_vm1, %v5545_v0  ;;  %v493_v24 = vmax.f32 %v461_v13, 0.0  ;;  %v464_v25 = vadd.f32 %v6024_v3, %v425_v14  ;;  %v465_v26 = vadd.f32 %v6024_v3, %v426_v15  ;;  %v429_v27 = vmul.f32 %v6022_v2, %v390_v18  ;;  %v393_v29 = vld [vmem:[%s5839_s7 + $0x50] sm:$0xff] }
  0xc2   : > { %358 = vst.msk [vmem:[#allocation2 + $0x108] sm:$0x1] %vm346_vm1, %v5545_v0  ;;  %359 = vst.msk [vmem:[#allocation2 + $0x120] sm:$0x1] %vm346_vm1, %v5545_v0  ;;  %v622_v4 = vld [vmem:[#allocation2 + $0x1] sm:$0xff]  ;;  %v494_v30 = vmax.f32 %v462_v19, 0.0  ;;  %v466_v32 = vadd.f32 %v6024_v3, %v427_v21  ;;  %v467_v33 = vadd.f32 %v6024_v3, %v428_v22  ;;  %v430_v39 = vmul.f32 %v6022_v2, %v391_v23 }
  0xc3   : > { %360 = vst.msk [vmem:[#allocation2 + $0x138] sm:$0x1] %vm346_vm1, %v5545_v0  ;;  %361 = vst.msk [vmem:[#allocation2 + $0x150] sm:$0x1] %vm346_vm1, %v5545_v0  ;;  %686 = vrot.lane.b32.xlu0 %v622_v4, %s5546_s28  ;;  %v495_v31 = vmax.f32 %v463_v20, 0.0  ;;  %v394_v34 = vld [vmem:[%s5839_s7 + $0x58] sm:$0xff]  ;;  %v468_v38 = vadd.f32 %v6024_v3, %v429_v27  ;;  %v431_v44 = vmul.f32 %v6022_v2, %v392_v28 }
  0xc4   : > { %362 = vst.msk [vmem:[#allocation2 + $0x168] sm:$0x1] %vm346_vm1, %v5545_v0  ;;  %363 = vst.msk [vmem:[#allocation2 + $0x180] sm:$0x1] %vm346_vm1, %v5545_v0  ;;  %v395_v35 = vld [vmem:[%s5839_s7 + $0x60] sm:$0xff]  ;;  %v496_v36 = vmax.f32 %v464_v25, 0.0  ;;  %v432_v45 = vmul.f32 %v6022_v2, %v393_v29  ;;  %v469_v48 = vadd.f32 %v6024_v3, %v430_v39  ;;  %v433_v49 = vmul.f32 %v6022_v2, %v394_v34 }
  0xc5   : > { %366 = vst.msk [vmem:[#allocation2 + $0x29] sm:$0x1] %vm346_vm1, %v5545_v0  ;;  %367 = vst.msk [vmem:[#allocation2 + $0x41] sm:$0x1] %vm346_vm1, %v5545_v0  ;;  %v497_v37 = vmax.f32 %v465_v26, 0.0  ;;  %v396_v40 = vld [vmem:[%s5839_s7 + $0x68] sm:$0xff]  ;;  %v434_v50 = vmul.f32 %v6022_v2, %v395_v35  ;;  %v470_v51 = vadd.f32 %v6024_v3, %v431_v44 }
  0xc6   : > { %368 = vst.msk [vmem:[#allocation2 + $0x59] sm:$0x1] %vm346_vm1, %v5545_v0  ;;  %369 = vst.msk [vmem:[#allocation2 + $0x71] sm:$0x1] %vm346_vm1, %v5545_v0  ;;  %v397_v41 = vld [vmem:[%s5839_s7 + $0x70] sm:$0xff]  ;;  %v498_v42 = vmax.f32 %v466_v32, 0.0  ;;  %v471_v52 = vadd.f32 %v6024_v3, %v432_v45  ;;  %v435_v53 = vmul.f32 %v6022_v2, %v396_v40  ;;  %v472_v57 = vadd.f32 %v6024_v3, %v433_v49 }
  0xc7   : > { %370 = vst.msk [vmem:[#allocation2 + $0x89] sm:$0x1] %vm346_vm1, %v5545_v0  ;;  %371 = vst.msk [vmem:[#allocation2 + $0xa1] sm:$0x1] %vm346_vm1, %v5545_v0  ;;  %v499_v43 = vmax.f32 %v467_v33, 0.0  ;;  %v398_v46 = vld [vmem:[%s5839_s7 + $0x78] sm:$0xff]  ;;  %v436_v54 = vmul.f32 %v6022_v2, %v397_v41  ;;  %v473_v58 = vadd.f32 %v6024_v3, %v434_v50 }
  0xc8   : > { %372 = vst.msk [vmem:[#allocation2 + $0xb9] sm:$0x1] %vm346_vm1, %v5545_v0  ;;  %373 = vst.msk [vmem:[#allocation2 + $0xd1] sm:$0x1] %vm346_vm1, %v5545_v0  ;;  %v500_v47 = vmax.f32 %v468_v38, 0.0  ;;  %v399_v55 = vld [vmem:[%s5839_s7 + $0x80] sm:$0xff]  ;;  %v437_v59 = vmul.f32 %v6022_v2, %v398_v46  ;;  %v474_v1 = vadd.f32 %v6024_v3, %v435_v53 }
  0xc9   : > { %374 = vst.msk [vmem:[#allocation2 + $0xe9] sm:$0x1] %vm346_vm1, %v5545_v0  ;;  %375 = vst.msk [vmem:[#allocation2 + $0x101] sm:$0x1] %vm346_vm1, %v5545_v0  ;;  %v501_v56 = vmax.f32 %v469_v48, 0.0  ;;  %v400_v60 = vld [vmem:[%s5839_s7 + $0x88] sm:$0xff]  ;;  %v475_v4 = vadd.f32 %v6024_v3, %v436_v54  ;;  %v438_v11 = vmul.f32 %v6022_v2, %v399_v55 }
  0xca   : > { %376 = vst.msk [vmem:[#allocation2 + $0x119] sm:$0x1] %vm346_vm1, %v5545_v0  ;;  %377 = vst.msk [vmem:[#allocation2 + $0x131] sm:$0x1] %vm346_vm1, %v5545_v0  ;;  %v401_v61 = vld [vmem:[%s5839_s7 + $0x90] sm:$0xff]  ;;  %v402_v62 = vld [vmem:[%s5839_s7 + $0x98] sm:$0xff]  ;;  %v476_v10 = vadd.f32 %v6024_v3, %v437_v59  ;;  %v439_v17 = vmul.f32 %v6022_v2, %v400_v60 }
  0xcb   : > { %378 = vst.msk [vmem:[#allocation2 + $0x149] sm:$0x1] %vm346_vm1, %v5545_v0  ;;  %379 = vst.msk [vmem:[#allocation2 + $0x161] sm:$0x1] %vm346_vm1, %v5545_v0  ;;  %v502_v63 = vmax.f32 %v470_v51, 0.0  ;;  %v403_v5 = vld [vmem:[%s5839_s7 + $0xa0] sm:$0xff]  ;;  %v440_v18 = vmul.f32 %v6022_v2, %v401_v61  ;;  %v477_v23 = vadd.f32 %v6024_v3, %v438_v11 }
  0xcc   : > { %380 = vst.msk [vmem:[#allocation2 + $0x179] sm:$0x1] %vm346_vm1, %v5545_v0  ;;  %381 = vst.msk [vmem:[#allocation2 + $0x191] sm:$0x1] %vm346_vm1, %v5545_v0  ;;  %v559_v7 = vld [vmem:[#allocation2 + $0x8] sm:$0xff]  ;;  %v505_v9 = vmax.f32 %v473_v58, 0.0  ;;  %v442_v25 = vmul.f32 %v6022_v2, %v403_v5  ;;  %v478_v27 = vadd.f32 %v6024_v3, %v439_v17 }
  0xcd   : > { %2569 = vst.msk [vmem:[#allocation4] sm:$0xff] %vm337_vm0, %v5545_v0  ;;  %2570 = vst.msk [vmem:[#allocation4 + $0x8] sm:$0xff] %vm337_vm0, %v5545_v0  ;;  %v404_v12 = vld [vmem:[%s5839_s7 + $0xa8] sm:$0xff]  ;;  %v405_v13 = vld [vmem:[%s5839_s7 + $0xb0] sm:$0xff]  ;;  %v506_v15 = vmax.f32 %v474_v1, 0.0  ;;  %v507_v16 = vmax.f32 %v475_v4, 0.0  ;;  %v479_v28 = vadd.f32 %v6024_v3, %v440_v18 }
  0xce   : > { %2573 = vst.msk [vmem:[#allocation4 + $0x198] sm:$0xff] %vm337_vm0, %v5545_v0  ;;  %2574 = vst.msk [vmem:[#allocation4 + $0x1a0] sm:$0xff] %vm337_vm0, %v5545_v0  ;;  %v406_v19 = vld [vmem:[%s5839_s7 + $0xb8] sm:$0xff]  ;;  %v508_v22 = vmax.f32 %v476_v10, 0.0  ;;  %v443_v29 = vmul.f32 %v6022_v2, %v404_v12  ;;  %v509_v33 = vmax.f32 %v477_v23, 0.0  ;;  %v481_v35 = vadd.f32 %v6024_v3, %v442_v25  ;;  %v409_v38 = vld [vmem:[%s5839_s7 + $0xd0] sm:$0xff] }
  0xcf   : > { %2577 = vst.msk [vmem:[#allocation4 + $0x18] sm:$0x1] %vm346_vm1, %v5545_v0  ;;  %2578 = vst.msk [vmem:[#allocation4 + $0x30] sm:$0x1] %vm346_vm1, %v5545_v0  ;;  %v510_v39 = vmax.f32 %v478_v27, 0.0  ;;  %v511_v40 = vmax.f32 %v479_v28, 0.0  ;;  %v448_v54 = vmul.f32 %v6022_v2, %v409_v38 }
  0xd0   : > { %2579 = vst.msk [vmem:[#allocation4 + $0x48] sm:$0x1] %vm346_vm1, %v5545_v0  ;;  %2580 = vst.msk [vmem:[#allocation4 + $0x60] sm:$0x1] %vm346_vm1, %v5545_v0  ;;  %v482_v41 = vadd.f32 %v6024_v3, %v443_v29  ;;  %v411_v44 = vld [vmem:[%s5839_s7 + $0xe0] sm:$0xff]  ;;  %v513_v46 = vmax.f32 %v481_v35, 0.0 }
  0xd1   : > { %2581 = vst.msk [vmem:[#allocation4 + $0x78] sm:$0x1] %vm346_vm1, %v5545_v0  ;;  %2582 = vst.msk [vmem:[#allocation4 + $0x90] sm:$0x1] %vm346_vm1, %v5545_v0  ;;  %v412_v49 = vld [vmem:[%s5839_s7 + $0xe8] sm:$0xff]  ;;  %v450_v61 = vmul.f32 %v6022_v2, %v411_v44  ;;  %vm782_vm3 = vcmask 130112  }
  0xd2   : > { %2583 = vst.msk [vmem:[#allocation4 + $0xa8] sm:$0x1] %vm346_vm1, %v5545_v0  ;;  %2584 = vst.msk [vmem:[#allocation4 + $0xc0] sm:$0x1] %vm346_vm1, %v5545_v0  ;;  %v514_v51 = vmax.f32 %v482_v41, 0.0  ;;  %s5548_s17 = smov 24  }
  0xd3   : > { %2585 = vst.msk [vmem:[#allocation4 + $0xd8] sm:$0x1] %vm346_vm1, %v5545_v0  ;;  %2586 = vst.msk [vmem:[#allocation4 + $0xf0] sm:$0x1] %vm346_vm1, %v5545_v0  ;;  %v489_v5 = vadd.f32 %v6024_v3, %v450_v61  ;;  %vm975_vm4 = vcmask 195712   ;;  %s5549_s20 = smov 32  }
  0xd4   : > { %2587 = vst.msk [vmem:[#allocation4 + $0x108] sm:$0x1] %vm346_vm1, %v5545_v0  ;;  %2588 = vst.msk [vmem:[#allocation4 + $0x120] sm:$0x1] %vm346_vm1, %v5545_v0  ;;  %vm1168_vm5 = vcmask 261312   ;;  %s5550_s13 = smov 40  }
  0xd5   : > { %2589 = vst.msk [vmem:[#allocation4 + $0x138] sm:$0x1] %vm346_vm1, %v5545_v0  ;;  %2590 = vst.msk [vmem:[#allocation4 + $0x150] sm:$0x1] %vm346_vm1, %v5545_v0  ;;  %v521_v12 = vmax.f32 %v489_v5, 0.0  ;;  %vm1361_vm6 = vcmask 326912  }
  0xd6   : > { %2591 = vst.msk [vmem:[#allocation4 + $0x168] sm:$0x1] %vm346_vm1, %v5545_v0  ;;  %2592 = vst.msk [vmem:[#allocation4 + $0x180] sm:$0x1] %vm346_vm1, %v5545_v0  ;;  %s5551_s9 = smov 48   ;;  %vm1554_vm7 = vcmask 392512  }
  0xd7   : > { %2595 = vst.msk [vmem:[#allocation4 + $0x29] sm:$0x1] %vm346_vm1, %v5545_v0  ;;  %2596 = vst.msk [vmem:[#allocation4 + $0x41] sm:$0x1] %vm346_vm1, %v5545_v0  ;;  %s5552_s14 = smov 56   ;;  %s5553_s29 = smov 64  }
  0xd8   : > { %2597 = vst.msk [vmem:[#allocation4 + $0x59] sm:$0x1] %vm346_vm1, %v5545_v0  ;;  %2598 = vst.msk [vmem:[#allocation4 + $0x71] sm:$0x1] %vm346_vm1, %v5545_v0  ;;  %vm1748_vm8 = vcmask 458112   ;;  %vm1941_vm9 = vcmask 523712  }
  0xd9   : > { %2599 = vst.msk [vmem:[#allocation4 + $0x89] sm:$0x1] %vm346_vm1, %v5545_v0  ;;  %2600 = vst.msk [vmem:[#allocation4 + $0xa1] sm:$0x1] %vm346_vm1, %v5545_v0  ;;  %vm2134_vm10 = vcmask 589312   ;;  %vm2215_vm11 = vcmask 588800  }
  0xda   : > { %2601 = vst.msk [vmem:[#allocation4 + $0xb9] sm:$0x1] %vm346_vm1, %v5545_v0  ;;  %2602 = vst.msk [vmem:[#allocation4 + $0xd1] sm:$0x1] %vm346_vm1, %v5545_v0  ;;  %s7975_s10 = scalar_lea.vmem [#allocation17], %s4851_s12  ;;  %s4931_s11 = sshll.u32 %s5612_s27, 12 }
  0xdb   : > { %2603 = vst.msk [vmem:[#allocation4 + $0xe9] sm:$0x1] %vm346_vm1, %v5545_v0  ;;  %2604 = vst.msk [vmem:[#allocation4 + $0x101] sm:$0x1] %vm346_vm1, %v5545_v0  ;;  %s4718_s30 = sshll.u32 %s7975_s10, 4  ;;  %s4705_s27 = scalar_lea.sflag [#allocation8], %s5833_s26  ;;  %s8134_s30 = int_to_ptr.vmem [resolvable:$true] %s4718_s30 }
  0xdc   : > { %2605 = vst.msk [vmem:[#allocation4 + $0x119] sm:$0x1] %vm346_vm1, %v5545_v0  ;;  %2606 = vst.msk [vmem:[#allocation4 + $0x131] sm:$0x1] %vm346_vm1, %v5545_v0  ;;  %p8298_p10 = scmp.ne.s32.totalorder %s8228_s25, 0 }
  0xdd   : > { %2607 = vst.msk [vmem:[#allocation4 + $0x149] sm:$0x1] %vm346_vm1, %v5545_v0  ;;  %2608 = vst.msk [vmem:[#allocation4 + $0x161] sm:$0x1] %vm346_vm1, %v5545_v0 }
  0xde   : > { %2609 = vst.msk [vmem:[#allocation4 + $0x179] sm:$0x1] %vm346_vm1, %v5545_v0  ;;  %2610 = vst.msk [vmem:[#allocation4 + $0x191] sm:$0x1] %vm346_vm1, %v5545_v0 }
  0xdf   : > { %347 = vst.msk [vmem:[#allocation2] sm:$0x1] %vm346_vm1, %v5545_v0  ;;  %364 = vst.msk [vmem:[#allocation2 + $0x198] sm:$0x1] %vm346_vm1, %v5545_v0 }
  0xe0   : > { %2576 = vst.msk [vmem:[#allocation4] sm:$0x1] %vm346_vm1, %v5545_v0  ;;  %2593 = vst.msk [vmem:[#allocation4 + $0x198] sm:$0x1] %vm346_vm1, %v5545_v0 }
  0xe1   : > { %341 = vst.msk [vmem:[#allocation2 + $0x10] sm:$0x3] %vm340_vm2, %v5545_v0  ;;  %345 = vst.msk [vmem:[#allocation2 + $0x1a8] sm:$0x3] %vm340_vm2, %v5545_v0 }
  0xe2   : > { %2571 = vst.msk [vmem:[#allocation4 + $0x10] sm:$0x3] %vm340_vm2, %v5545_v0  ;;  %2575 = vst.msk [vmem:[#allocation4 + $0x1a8] sm:$0x3] %vm340_vm2, %v5545_v0 }
  0xe3   : > { %365 = vst.msk [vmem:[#allocation2 + $0x11] sm:$0x1] %vm346_vm1, %v5545_v0  ;;  %382 = vst.msk [vmem:[#allocation2 + $0x1a9] sm:$0x1] %vm346_vm1, %v5545_v0 }
  0xe4   : > { %2594 = vst.msk [vmem:[#allocation4 + $0x11] sm:$0x1] %vm346_vm1, %v5545_v0  ;;  %2611 = vst.msk [vmem:[#allocation4 + $0x1a9] sm:$0x1] %vm346_vm1, %v5545_v0  ;;  %v503_v0 = vmax.f32 %v471_v52, 0.0 }
  0xe5   : > { %526 = vst.msk [vmem:[#allocation2 + $0x19] sm:$0xff] %vm337_vm0, %v493_v24  ;;  %527 = vst.msk [vmem:[#allocation2 + $0x21] sm:$0xff] %vm337_vm0, %v494_v30  ;;  %v441_v24 = vmul.f32 %v6022_v2, %v402_v62  ;;  %v444_v30 = vmul.f32 %v6022_v2, %v405_v13 }
  0xe6   : > { %528 = vst.msk [vmem:[#allocation2 + $0x31] sm:$0xff] %vm337_vm0, %v495_v31  ;;  %529 = vst.msk [vmem:[#allocation2 + $0x39] sm:$0xff] %vm337_vm0, %v496_v36  ;;  %v558_v6 = vld [vmem:[#allocation2] sm:$0xff]  ;;  %v445_v36 = vmul.f32 %v6022_v2, %v406_v19 }
  0xe7   : > { %530 = vst.msk [vmem:[#allocation2 + $0x49] sm:$0xff] %vm337_vm0, %v497_v37  ;;  %531 = vst.msk [vmem:[#allocation2 + $0x51] sm:$0xff] %vm337_vm0, %v498_v42  ;;  %v407_v31 = vld [vmem:[%s5839_s7 + $0xc0] sm:$0xff]  ;;  %v480_v34 = vadd.f32 %v6024_v3, %v441_v24  ;;  %v408_v37 = vld [vmem:[%s5839_s7 + $0xc8] sm:$0xff]  ;;  %v483_v42 = vadd.f32 %v6024_v3, %v444_v30 }
  0xe8   : > { %v623_v8 = vld [vmem:[#allocation2 + $0x9] sm:$0xff]  ;;  %532 = vst.msk [vmem:[#allocation2 + $0x61] sm:$0xff] %vm337_vm0, %v499_v43  ;;  %533 = vst.msk [vmem:[#allocation2 + $0x69] sm:$0xff] %vm337_vm0, %v500_v47  ;;  %v410_v43 = vld [vmem:[%s5839_s7 + $0xd8] sm:$0xff]  ;;  %v484_v47 = vadd.f32 %v6024_v3, %v445_v36  ;;  %v446_v48 = vmul.f32 %v6022_v2, %v407_v31  ;;  %v447_v53 = vmul.f32 %v6022_v2, %v408_v37 }
  0xe9   : > { %688 = vrot.lane.b32.xlu0 %v623_v8, %s5546_s28  ;;  %534 = vst.msk [vmem:[#allocation2 + $0x79] sm:$0xff] %vm337_vm0, %v501_v56  ;;  %v504_v8 = vmax.f32 %v472_v57, 0.0  ;;  %590 = vst.msk [vmem:[#allocation3] sm:$0xff] %vm337_vm0, %v558_v6  ;;  %v512_v45 = vmax.f32 %v480_v34, 0.0  ;;  %v515_v52 = vmax.f32 %v483_v42, 0.0  ;;  %v449_v60 = vmul.f32 %v6022_v2, %v410_v43 }
  0xea   : > { %591 = vst.msk [vmem:[#allocation3 + $0x8] sm:$0xff] %vm337_vm0, %v559_v7  ;;  %535 = vst.msk [vmem:[#allocation2 + $0x81] sm:$0xff] %vm337_vm0, %v502_v63  ;;  %v516_v58 = vmax.f32 %v484_v47, 0.0  ;;  %v485_v59 = vadd.f32 %v6024_v3, %v446_v48  ;;  %v486_v62 = vadd.f32 %v6024_v3, %v447_v53  ;;  %v487_v63 = vadd.f32 %v6024_v3, %v448_v54 }
  0xeb   : > { %536 = vst.msk [vmem:[#allocation2 + $0x91] sm:$0xff] %vm337_vm0, %v503_v0  ;;  %537 = vst.msk [vmem:[#allocation2 + $0x99] sm:$0xff] %vm337_vm0, %v504_v8  ;;  %v451_v0 = vmul.f32 %v6022_v2, %v412_v49  ;;  %v488_v4 = vadd.f32 %v6024_v3, %v449_v60 }
  0xec   : > { %v6094_v14 = vld [vmem:[#allocation2 + $0x19] sm:$0xff]  ;;  %538 = vst.msk [vmem:[#allocation2 + $0xa9] sm:$0xff] %vm337_vm0, %v505_v9  ;;  %v6114_v26 = vld [vmem:[#allocation2 + $0x21] sm:$0xff]  ;;  %539 = vst.msk [vmem:[#allocation2 + $0xb1] sm:$0xff] %vm337_vm0, %v506_v15  ;;  %v517_v1 = vmax.f32 %v485_v59, 0.0  ;;  %v518_v7 = vmax.f32 %v486_v62, 0.0 }
  0xed   : > { %v6101_v20 = vld [vmem:[#allocation2 + $0x18] sm:$0xff]  ;;  %690 = vrot.lane.b32.xlu1 %v6094_v14, %s5546_s28  ;;  %540 = vst.msk [vmem:[#allocation2 + $0xc1] sm:$0xff] %vm337_vm0, %v507_v16  ;;  %541 = vst.msk [vmem:[#allocation2 + $0xc9] sm:$0xff] %vm337_vm0, %v508_v22  ;;  %v6151_v55 = vld [vmem:[#allocation2 + $0x20] sm:$0xff]  ;;  %v519_v8 = vmax.f32 %v487_v63, 0.0  ;;  %v490_v9 = vadd.f32 %v6024_v3, %v451_v0  ;;  %v520_v11 = vmax.f32 %v488_v4, 0.0 }
  0xee   : > { %v6105_v21 = vld [vmem:[#allocation2 + $0x31] sm:$0xff]  ;;  %592 = vst.msk [vmem:[#allocation3 + $0x10] sm:$0xff] %vm337_vm0, %v6101_v20  ;;  %v6125_v32 = vld [vmem:[#allocation2 + $0x49] sm:$0xff]  ;;  %542 = vst.msk [vmem:[#allocation2 + $0xd9] sm:$0xff] %vm337_vm0, %v509_v33 }
  0xef   : > { %694 = vrot.lane.b32.xlu0 %v6105_v21, %s5546_s28  ;;  %v6143_v50 = vld [vmem:[#allocation2 + $0x39] sm:$0xff]  ;;  %543 = vst.msk [vmem:[#allocation2 + $0xe1] sm:$0xff] %vm337_vm0, %v510_v39  ;;  %544 = vst.msk [vmem:[#allocation2 + $0xf1] sm:$0xff] %vm337_vm0, %v511_v40  ;;  %v6153_v56 = vld [vmem:[#allocation2 + $0x30] sm:$0xff]  ;;  %v522_v13 = vmax.f32 %v490_v9, 0.0 }
  0xf0   : > { %v6155_v57 = vld [vmem:[#allocation2 + $0x61] sm:$0xff]  ;;  %545 = vst.msk [vmem:[#allocation2 + $0xf9] sm:$0xff] %vm337_vm0, %v512_v45  ;;  %546 = vst.msk [vmem:[#allocation2 + $0x109] sm:$0xff] %vm337_vm0, %v513_v46  ;;  %v6176_v6 = vld [vmem:[#allocation2 + $0x51] sm:$0xff] }
  0xf1   : > { %692 = vrot.lane.b32.xlu1 %v6114_v26, %s5546_s28  ;;  %593 = vst.msk [vmem:[#allocation3 + $0x18] sm:$0xff] %vm337_vm0, %v6151_v55  ;;  %594 = vst.msk [vmem:[#allocation3 + $0x20] sm:$0xff] %vm337_vm0, %v6153_v56  ;;  %v6181_v10 = vld [vmem:[#allocation2 + $0x79] sm:$0xff]  ;;  %v6188_v16 = vld [vmem:[#allocation2 + $0x48] sm:$0xff] }
  0xf2   : > { %547 = vst.msk [vmem:[#allocation2 + $0x111] sm:$0xff] %vm337_vm0, %v514_v51  ;;  %548 = vst.msk [vmem:[#allocation2 + $0x121] sm:$0xff] %vm337_vm0, %v515_v52  ;;  %v6186_v15 = vld [vmem:[#allocation2 + $0x38] sm:$0xff]  ;;  %v6198_v17 = vld [vmem:[#allocation2 + $0x69] sm:$0xff] }
  0xf3   : > { %698 = vrot.lane.b32.xlu0 %v6125_v32, %s5546_s28  ;;  %549 = vst.msk [vmem:[#allocation2 + $0x129] sm:$0xff] %vm337_vm0, %v516_v58  ;;  %550 = vst.msk [vmem:[#allocation2 + $0x139] sm:$0xff] %vm337_vm0, %v517_v1  ;;  %v6203_v18 = vld [vmem:[#allocation2 + $0x91] sm:$0xff]  ;;  %v6207_v19 = vld [vmem:[#allocation2 + $0x81] sm:$0xff] }
  0xf4   : > { %551 = vst.msk [vmem:[#allocation2 + $0x141] sm:$0xff] %vm337_vm0, %v518_v7  ;;  %552 = vst.msk [vmem:[#allocation2 + $0x151] sm:$0xff] %vm337_vm0, %v519_v8  ;;  %v6211_v22 = vld [vmem:[#allocation2 + $0x50] sm:$0xff]  ;;  %v6213_v23 = vld [vmem:[#allocation2 + $0x60] sm:$0xff] }
  0xf5   : > { %696 = vrot.lane.b32.xlu1 %v6143_v50, %s5546_s28  ;;  %553 = vst.msk [vmem:[#allocation2 + $0x159] sm:$0xff] %vm337_vm0, %v520_v11  ;;  %554 = vst.msk [vmem:[#allocation2 + $0x169] sm:$0xff] %vm337_vm0, %v521_v12  ;;  %v6215_v24 = vld [vmem:[#allocation2 + $0xa9] sm:$0xff]  ;;  %v6223_v25 = vld [vmem:[#allocation2 + $0x99] sm:$0xff] }
  0xf6   : > { %595 = vst.msk [vmem:[#allocation3 + $0x28] sm:$0xff] %vm337_vm0, %v6186_v15  ;;  %596 = vst.msk [vmem:[#allocation3 + $0x30] sm:$0xff] %vm337_vm0, %v6188_v16  ;;  %v6227_v27 = vld [vmem:[#allocation2 + $0xc1] sm:$0xff]  ;;  %v6233_v29 = vld [vmem:[#allocation2 + $0x78] sm:$0xff] }
  0xf7   : > { %702 = vrot.lane.b32.xlu0 %v6155_v57, %s5546_s28  ;;  %555 = vst.msk [vmem:[#allocation2 + $0x171] sm:$0xff] %vm337_vm0, %v522_v13  ;;  %597 = vst.msk [vmem:[#allocation3 + $0x38] sm:$0xff] %vm337_vm0, %v6211_v22  ;;  %v6229_v28 = vld [vmem:[#allocation2 + $0x68] sm:$0xff]  ;;  %v6235_v30 = vld [vmem:[#allocation2 + $0x80] sm:$0xff] }
  0xf8   : > { %598 = vst.msk [vmem:[#allocation3 + $0x40] sm:$0xff] %vm337_vm0, %v6213_v23  ;;  %599 = vst.msk [vmem:[#allocation3 + $0x48] sm:$0xff] %vm337_vm0, %v6229_v28  ;;  %v6237_v31 = vld [vmem:[#allocation2 + $0x90] sm:$0xff]  ;;  %v6247_v34 = vld [vmem:[#allocation2 + $0x98] sm:$0xff] }
  0xf9   : > { %700 = vrot.lane.b32.xlu1 %v6176_v6, %s5546_s28  ;;  %v6239_v33 = vld [vmem:[#allocation2 + $0xb1] sm:$0xff]  ;;  %600 = vst.msk [vmem:[#allocation3 + $0x50] sm:$0xff] %vm337_vm0, %v6233_v29  ;;  %601 = vst.msk [vmem:[#allocation3 + $0x58] sm:$0xff] %vm337_vm0, %v6235_v30  ;;  %v6249_v35 = vld [vmem:[#allocation2 + $0xa8] sm:$0xff] }
  0xfa   : > { %602 = vst.msk [vmem:[#allocation3 + $0x60] sm:$0xff] %vm337_vm0, %v6237_v31  ;;  %v6251_v36 = vld [vmem:[#allocation2 + $0xb0] sm:$0xff]  ;;  %603 = vst.msk [vmem:[#allocation3 + $0x68] sm:$0xff] %vm337_vm0, %v6247_v34  ;;  %v6261_v37 = vld [vmem:[#allocation2 + $0xc0] sm:$0xff] }
  0xfb   : > { %706 = vrot.lane.b32.xlu0 %v6181_v10, %s5546_s28  ;;  %604 = vst.msk [vmem:[#allocation3 + $0x70] sm:$0xff] %vm337_vm0, %v6249_v35  ;;  %605 = vst.msk [vmem:[#allocation3 + $0x78] sm:$0xff] %vm337_vm0, %v6251_v36  ;;  %v6263_v38 = vld [vmem:[#allocation2 + $0xc8] sm:$0xff]  ;;  %v6265_v39 = vld [vmem:[#allocation2 + $0xd8] sm:$0xff] }
  0xfc   : > { %606 = vst.msk [vmem:[#allocation3 + $0x80] sm:$0xff] %vm337_vm0, %v6261_v37  ;;  %607 = vst.msk [vmem:[#allocation3 + $0x88] sm:$0xff] %vm337_vm0, %v6263_v38  ;;  %v6275_v40 = vld [vmem:[#allocation2 + $0xe0] sm:$0xff]  ;;  %v6277_v41 = vld [vmem:[#allocation2 + $0xf0] sm:$0xff] }
  0xfd   : > { %704 = vrot.lane.b32.xlu1 %v6198_v17, %s5546_s28  ;;  %608 = vst.msk [vmem:[#allocation3 + $0x90] sm:$0xff] %vm337_vm0, %v6265_v39  ;;  %v6279_v42 = vld [vmem:[#allocation2 + $0xf8] sm:$0xff]  ;;  %609 = vst.msk [vmem:[#allocation3 + $0x98] sm:$0xff] %vm337_vm0, %v6275_v40  ;;  %v6289_v44 = vld [vmem:[#allocation2 + $0x108] sm:$0xff] }
  0xfe   : > { %v6281_v43 = vld [vmem:[#allocation2 + $0xd9] sm:$0xff]  ;;  %610 = vst.msk [vmem:[#allocation3 + $0xa0] sm:$0xff] %vm337_vm0, %v6277_v41  ;;  %611 = vst.msk [vmem:[#allocation3 + $0xa8] sm:$0xff] %vm337_vm0, %v6279_v42  ;;  %v6295_v45 = vld [vmem:[#allocation2 + $0x110] sm:$0xff] }
  0xff   : > { %710 = vrot.lane.b32.xlu0 %v6203_v18, %s5546_s28  ;;  %612 = vst.msk [vmem:[#allocation3 + $0xb0] sm:$0xff] %vm337_vm0, %v6289_v44  ;;  %v6297_v46 = vld [vmem:[#allocation2 + $0xc9] sm:$0xff]  ;;  %613 = vst.msk [vmem:[#allocation3 + $0xb8] sm:$0xff] %vm337_vm0, %v6295_v45  ;;  %v6303_v47 = vld [vmem:[#allocation2 + $0xf1] sm:$0xff] }
 0x100   : > { %v6305_v48 = vld [vmem:[#allocation2 + $0x120] sm:$0xff]  ;;  %v6311_v49 = vld [vmem:[#allocation2 + $0x128] sm:$0xff]  ;;  %v6321_v53 = vld [vmem:[#allocation2 + $0x138] sm:$0xff] }
 0x101   : > { %708 = vrot.lane.b32.xlu1 %v6207_v19, %s5546_s28  ;;  %614 = vst.msk [vmem:[#allocation3 + $0xc0] sm:$0xff] %vm337_vm0, %v6305_v48  ;;  %v6313_v51 = vld [vmem:[#allocation2 + $0xe1] sm:$0xff]  ;;  %615 = vst.msk [vmem:[#allocation3 + $0xc8] sm:$0xff] %vm337_vm0, %v6311_v49  ;;  %v6319_v52 = vld [vmem:[#allocation2 + $0x109] sm:$0xff] }
 0x102   : > { %616 = vst.msk [vmem:[#allocation3 + $0xd0] sm:$0xff] %vm337_vm0, %v6321_v53  ;;  %v6327_v54 = vld [vmem:[#allocation2 + $0x140] sm:$0xff]  ;;  %v6337_v60 = vld [vmem:[#allocation2 + $0x150] sm:$0xff]  ;;  %v6343_v61 = vld [vmem:[#allocation2 + $0x158] sm:$0xff] }
 0x103   : > { %714 = vrot.lane.b32.xlu0 %v6215_v24, %s5546_s28  ;;  %v6329_v58 = vld [vmem:[#allocation2 + $0xf9] sm:$0xff]  ;;  %617 = vst.msk [vmem:[#allocation3 + $0xd8] sm:$0xff] %vm337_vm0, %v6327_v54  ;;  %v6335_v59 = vld [vmem:[#allocation2 + $0x121] sm:$0xff]  ;;  %618 = vst.msk [vmem:[#allocation3 + $0xe0] sm:$0xff] %vm337_vm0, %v6337_v60 }
 0x104   : > { %v6345_v62 = vld [vmem:[#allocation2 + $0x111] sm:$0xff]  ;;  %619 = vst.msk [vmem:[#allocation3 + $0xe8] sm:$0xff] %vm337_vm0, %v6343_v61  ;;  %v6351_v63 = vld [vmem:[#allocation2 + $0x139] sm:$0xff]  ;;  %v6353_v0 = vld [vmem:[#allocation2 + $0x168] sm:$0xff] }
 0x105   : > { %712 = vrot.lane.b32.xlu1 %v6223_v25, %s5546_s28  ;;  %8238 = vst [vmem:[#allocation23_spill] sm:$0xff] %v6345_v62  ;;  %8239 = vst [vmem:[#allocation24_spill] sm:$0xff] %v6351_v63  ;;  %v413_v1 = vld [vmem:[%s5839_s7 + $0xf0] sm:$0xff]  ;;  %v414_v9 = vld [vmem:[%s5839_s7 + $0xf8] sm:$0xff] }
 0x106   : > { %620 = vst.msk [vmem:[#allocation3 + $0xf0] sm:$0xff] %vm337_vm0, %v6353_v0  ;;  %v452_v4 = vmul.f32 %v6022_v2, %v413_v1  ;;  %v6361_v5 = vld [vmem:[#allocation2 + $0x170] sm:$0xff]  ;;  %v453_v12 = vmul.f32 %v6022_v2, %v414_v9  ;;  %v6387_v2 = vld [vmem:[#allocation2 + $0x159] sm:$0xff] }
 0x107   : > { %718 = vrot.lane.b32.xlu0 %v6227_v27, %s5546_s28  ;;  %v6363_v7 = vld [vmem:[#allocation2 + $0x129] sm:$0xff]  ;;  %621 = vst.msk [vmem:[#allocation3 + $0xf8] sm:$0xff] %vm337_vm0, %v6361_v5  ;;  %v6371_v11 = vld [vmem:[#allocation2 + $0x151] sm:$0xff]  ;;  %v6396_v9 = vld [vmem:[#allocation2 + $0x1a] sm:$0xff] }
 0x108   : > { %v491_v8 = vadd.f32 %v6024_v3, %v452_v4  ;;  %v492_v1 = vadd.f32 %v6024_v3, %v453_v12  ;;  %v815_v3 = vld [vmem:[#allocation2 + $0x2] sm:$0xff]  ;;  %8241 = vst [vmem:[#allocation26_spill] sm:$0xff] %v6396_v9  ;;  %v816_v12 = vld [vmem:[#allocation2 + $0xa] sm:$0xff] }
 0x109   : > { %716 = vrot.lane.b32.xlu1 %v6239_v33, %s5546_s28 }
 0x10a   : > { %v523_v13 = vmax.f32 %v491_v8, 0.0  ;;  %v524_v4 = vmax.f32 %v492_v1, 0.0  ;;  %v6393_v8 = vld [vmem:[#allocation2 + $0x171] sm:$0xff]  ;;  %v6405_v1 = vld [vmem:[#allocation2 + $0x22] sm:$0xff] }
 0x10b   : > { %722 = vrot.lane.b32.xlu0 %v6281_v43, %s5546_s28  ;;  %8240 = vst [vmem:[#allocation25_spill] sm:$0xff] %v6393_v8  ;;  %8243 = vst [vmem:[#allocation28_spill] sm:$0xff] %v6405_v1 }
 0x10c   : > { %556 = vst.msk [vmem:[#allocation2 + $0x181] sm:$0xff] %vm337_vm0, %v523_v13  ;;  %557 = vst.msk [vmem:[#allocation2 + $0x189] sm:$0xff] %vm337_vm0, %v524_v4  ;;  %v6402_v13 = vld [vmem:[#allocation2 + $0x32] sm:$0xff]  ;;  %v6409_v4 = vld [vmem:[#allocation2 + $0x4a] sm:$0xff] }
 0x10d   : > { %720 = vrot.lane.b32.xlu1 %v6297_v46, %s5546_s28  ;;  %8242 = vst [vmem:[#allocation27_spill] sm:$0xff] %v6402_v13  ;;  %8244 = vst [vmem:[#allocation29_spill] sm:$0xff] %v6409_v4 }
 0x10f   : > { %726 = vrot.lane.b32.xlu0 %v6303_v47, %s5546_s28 }
 0x111   : > { %724 = vrot.lane.b32.xlu1 %v6313_v51, %s5546_s28 }
 0x113   : > { %730 = vrot.lane.b32.xlu0 %v6319_v52, %s5546_s28 }
 0x115   : > { %728 = vrot.lane.b32.xlu1 %v6329_v58, %s5546_s28 }
 0x117   : > { %734 = vrot.lane.b32.xlu0 %v6335_v59, %s5546_s28 }
 0x119   : > { %732 = vrot.lane.b32.xlu1 %v6345_v62, %s5546_s28  ;;  %v6377_v62 = vld [vmem:[#allocation2 + $0x141] sm:$0xff] }
 0x11b   : > { %738 = vrot.lane.b32.xlu0 %v6351_v63, %s5546_s28  ;;  %v6382_v63 = vld [vmem:[#allocation2 + $0x169] sm:$0xff] }
 0x11d   : > { %736 = vrot.lane.b32.xlu1 %v6363_v7, %s5546_s28 }
 0x11f   : > { %742 = vrot.lane.b32.xlu0 %v6371_v11, %s5546_s28 }
 0x121   : > { %740 = vrot.lane.b32.xlu1 %v6377_v62, %s5546_s28 }
 0x123   : > { %746 = vrot.lane.b32.xlu0 %v6382_v63, %s5546_s28 }
 0x125   : > { %744 = vrot.lane.b32.xlu1 %v6387_v2, %s5546_s28 }
 0x127   : > { %879 = vrot.lane.b32.xlu0 %v815_v3, %s5547_s16  ;;  %v6413_v3 = vld [vmem:[#allocation2 + $0x3a] sm:$0xff] }
 0x128   : > { %8245 = vst [vmem:[#allocation30_spill] sm:$0xff] %v6413_v3 }
 0x129   : > { %748 = vrot.lane.b32.xlu1 %v6393_v8, %s5546_s28  ;;  %v6481_v8 = vld [vmem:[#allocation2 + $0x122] sm:$0xff] }
 0x12a   : > { %8262 = vst [vmem:[#allocation47_spill] sm:$0xff] %v6481_v8 }
 0x12b   : > { %883 = vrot.lane.b32.xlu0 %v6396_v9, %s5547_s16  ;;  %v6417_v9 = vld [vmem:[#allocation2 + $0x62] sm:$0xff] }
 0x12c   : > { %8246 = vst [vmem:[#allocation31_spill] sm:$0xff] %v6417_v9 }
 0x12d   : > { %881 = vrot.lane.b32.xlu1 %v816_v12, %s5547_s16  ;;  %v6421_v12 = vld [vmem:[#allocation2 + $0x52] sm:$0xff] }
 0x12e   : > { %8247 = vst [vmem:[#allocation32_spill] sm:$0xff] %v6421_v12 }
 0x12f   : > { %887 = vrot.lane.b32.xlu0 %v6402_v13, %s5547_s16  ;;  %v6425_v13 = vld [vmem:[#allocation2 + $0x7a] sm:$0xff] }
 0x130   : > { %8248 = vst [vmem:[#allocation33_spill] sm:$0xff] %v6425_v13 }
 0x131   : > { %885 = vrot.lane.b32.xlu1 %v6405_v1, %s5547_s16  ;;  %v6429_v1 = vld [vmem:[#allocation2 + $0x6a] sm:$0xff] }
 0x132   : > { %8249 = vst [vmem:[#allocation34_spill] sm:$0xff] %v6429_v1 }
 0x133   : > { %891 = vrot.lane.b32.xlu0 %v6409_v4, %s5547_s16  ;;  %v6433_v4 = vld [vmem:[#allocation2 + $0x92] sm:$0xff] }
 0x134   : > { %8250 = vst [vmem:[#allocation35_spill] sm:$0xff] %v6433_v4 }
 0x135   : > { %889 = vrot.lane.b32.xlu1 %v6413_v3, %s5547_s16  ;;  %v6437_v3 = vld [vmem:[#allocation2 + $0x82] sm:$0xff] }
 0x136   : > { %8251 = vst [vmem:[#allocation36_spill] sm:$0xff] %v6437_v3 }
 0x137   : > { %895 = vrot.lane.b32.xlu0 %v6417_v9, %s5547_s16  ;;  %v6441_v9 = vld [vmem:[#allocation2 + $0xaa] sm:$0xff] }
 0x138   : > { %8252 = vst [vmem:[#allocation37_spill] sm:$0xff] %v6441_v9 }
 0x139   : > { %893 = vrot.lane.b32.xlu1 %v6421_v12, %s5547_s16  ;;  %v6445_v12 = vld [vmem:[#allocation2 + $0x9a] sm:$0xff] }
 0x13a   : > { %8253 = vst [vmem:[#allocation38_spill] sm:$0xff] %v6445_v12 }
 0x13b   : > { %899 = vrot.lane.b32.xlu0 %v6425_v13, %s5547_s16  ;;  %v6449_v13 = vld [vmem:[#allocation2 + $0xc2] sm:$0xff] }
 0x13c   : > { %8254 = vst [vmem:[#allocation39_spill] sm:$0xff] %v6449_v13 }
 0x13d   : > { %897 = vrot.lane.b32.xlu1 %v6429_v1, %s5547_s16  ;;  %v6453_v1 = vld [vmem:[#allocation2 + $0xb2] sm:$0xff] }
 0x13e   : > { %8255 = vst [vmem:[#allocation40_spill] sm:$0xff] %v6453_v1 }
 0x13f   : > { %903 = vrot.lane.b32.xlu0 %v6433_v4, %s5547_s16  ;;  %v6457_v4 = vld [vmem:[#allocation2 + $0xda] sm:$0xff] }
 0x140   : > { %8256 = vst [vmem:[#allocation41_spill] sm:$0xff] %v6457_v4 }
 0x141   : > { %901 = vrot.lane.b32.xlu1 %v6437_v3, %s5547_s16  ;;  %v6461_v3 = vld [vmem:[#allocation2 + $0xca] sm:$0xff] }
 0x142   : > { %8257 = vst [vmem:[#allocation42_spill] sm:$0xff] %v6461_v3 }
 0x143   : > { %907 = vrot.lane.b32.xlu0 %v6441_v9, %s5547_s16  ;;  %v6465_v9 = vld [vmem:[#allocation2 + $0xf2] sm:$0xff] }
 0x144   : > { %8258 = vst [vmem:[#allocation43_spill] sm:$0xff] %v6465_v9 }
 0x145   : > { %905 = vrot.lane.b32.xlu1 %v6445_v12, %s5547_s16  ;;  %v6469_v12 = vld [vmem:[#allocation2 + $0xe2] sm:$0xff] }
 0x146   : > { %8259 = vst [vmem:[#allocation44_spill] sm:$0xff] %v6469_v12 }
 0x147   : > { %911 = vrot.lane.b32.xlu0 %v6449_v13, %s5547_s16  ;;  %v6473_v13 = vld [vmem:[#allocation2 + $0x10a] sm:$0xff] }
 0x148   : > { %8260 = vst [vmem:[#allocation45_spill] sm:$0xff] %v6473_v13 }
 0x149   : > { %909 = vrot.lane.b32.xlu1 %v6453_v1, %s5547_s16  ;;  %v6477_v1 = vld [vmem:[#allocation2 + $0xfa] sm:$0xff] }
 0x14a   : > { %8261 = vst [vmem:[#allocation46_spill] sm:$0xff] %v6477_v1 }
 0x14b   : > { %915 = vrot.lane.b32.xlu0 %v6457_v4, %s5547_s16  ;;  %v687_v4 = vpop.permute.xlu0 %686 }
 0x14c   : > { %783 = vst.msk [vmem:[#allocation3] sm:$0xff] %vm782_vm3, %v687_v4  ;;  %v6499_v4 = vld [vmem:[#allocation2 + $0x152] sm:$0xff] }
 0x14d   : > { %913 = vrot.lane.b32.xlu1 %v6461_v3, %s5547_s16  ;;  %8266 = vst [vmem:[#allocation51_spill] sm:$0xff] %v6499_v4 }
 0x14f   : > { %919 = vrot.lane.b32.xlu0 %v6465_v9, %s5547_s16  ;;  %v6486_v9 = vld [vmem:[#allocation2 + $0x112] sm:$0xff] }
 0x150   : > { %8263 = vst [vmem:[#allocation48_spill] sm:$0xff] %v6486_v9 }
 0x151   : > { %917 = vrot.lane.b32.xlu1 %v6469_v12, %s5547_s16  ;;  %v6490_v12 = vld [vmem:[#allocation2 + $0x13a] sm:$0xff] }
 0x152   : > { %8264 = vst [vmem:[#allocation49_spill] sm:$0xff] %v6490_v12 }
 0x153   : > { %923 = vrot.lane.b32.xlu0 %v6473_v13, %s5547_s16  ;;  %v6495_v13 = vld [vmem:[#allocation2 + $0x12a] sm:$0xff] }
 0x154   : > { %8265 = vst [vmem:[#allocation50_spill] sm:$0xff] %v6495_v13 }
 0x155   : > { %921 = vrot.lane.b32.xlu1 %v6477_v1, %s5547_s16  ;;  %v6503_v1 = vld [vmem:[#allocation2 + $0x142] sm:$0xff] }
 0x156   : > { %8267 = vst [vmem:[#allocation52_spill] sm:$0xff] %v6503_v1 }
 0x157   : > { %927 = vrot.lane.b32.xlu0 %v6481_v8, %s5547_s16 }
 0x159   : > { %925 = vrot.lane.b32.xlu1 %v6486_v9, %s5547_s16 }
 0x15b   : > { %v689_v3 = vpop.permute.xlu0 %688  ;;  %931 = vrot.lane.b32.xlu0 %v6490_v12, %s5547_s16  ;;  %v6513_v12 = vld [vmem:[#allocation2 + $0x15a] sm:$0xff] }
 0x15c   : > { %784 = vst.msk [vmem:[#allocation3 + $0x8] sm:$0xff] %vm782_vm3, %v689_v3  ;;  %v6507_v3 = vld [vmem:[#allocation2 + $0x16a] sm:$0xff] }
 0x15d   : > { %929 = vrot.lane.b32.xlu1 %v6495_v13, %s5547_s16 }
 0x15f   : > { %935 = vrot.lane.b32.xlu0 %v6499_v4, %s5547_s16  ;;  %v691_v8 = vpop.permute.xlu1 %690 }
 0x160   : > { %785 = vst.msk [vmem:[#allocation3 + $0x10] sm:$0xff] %vm782_vm3, %v691_v8  ;;  %v6521_v8 = vld [vmem:[#allocation2 + $0x172] sm:$0xff] }
 0x161   : > { %v695_v9 = vpop.permute.xlu0 %694  ;;  %933 = vrot.lane.b32.xlu1 %v6503_v1, %s5547_s16 }
 0x162   : > { %787 = vst.msk [vmem:[#allocation3 + $0x20] sm:$0xff] %vm782_vm3, %v695_v9 }
 0x163   : > { %939 = vrot.lane.b32.xlu0 %v6507_v3, %s5547_s16  ;;  %v693_v13 = vpop.permute.xlu1 %692 }
 0x164   : > { %786 = vst.msk [vmem:[#allocation3 + $0x18] sm:$0xff] %vm782_vm3, %v693_v13 }
 0x165   : > { %v699_v4 = vpop.permute.xlu0 %698  ;;  %937 = vrot.lane.b32.xlu1 %v6513_v12, %s5547_s16 }
 0x166   : > { %789 = vst.msk [vmem:[#allocation3 + $0x30] sm:$0xff] %vm782_vm3, %v699_v4 }
 0x167   : > { %1072 = vrot.lane.b32.xlu0 %v6101_v20, %s5548_s17  ;;  %v697_v9 = vpop.permute.xlu1 %696 }
 0x168   : > { %788 = vst.msk [vmem:[#allocation3 + $0x28] sm:$0xff] %vm782_vm3, %v697_v9 }
 0x169   : > { %v703_v1 = vpop.permute.xlu0 %702  ;;  %941 = vrot.lane.b32.xlu1 %v6521_v8, %s5547_s16 }
 0x16a   : > { %791 = vst.msk [vmem:[#allocation3 + $0x40] sm:$0xff] %vm782_vm3, %v703_v1 }
 0x16b   : > { %1076 = vrot.lane.b32.xlu0 %v6153_v56, %s5548_s17  ;;  %v701_v13 = vpop.permute.xlu1 %700 }
 0x16c   : > { %790 = vst.msk [vmem:[#allocation3 + $0x38] sm:$0xff] %vm782_vm3, %v701_v13 }
 0x16d   : > { %v707_v4 = vpop.permute.xlu0 %706  ;;  %1074 = vrot.lane.b32.xlu1 %v6151_v55, %s5548_s17 }
 0x16e   : > { %793 = vst.msk [vmem:[#allocation3 + $0x50] sm:$0xff] %vm782_vm3, %v707_v4 }
 0x16f   : > { %1080 = vrot.lane.b32.xlu0 %v6188_v16, %s5548_s17  ;;  %v705_v20 = vpop.permute.xlu1 %704 }
 0x170   : > { %792 = vst.msk [vmem:[#allocation3 + $0x48] sm:$0xff] %vm782_vm3, %v705_v20 }
 0x171   : > { %v711_v9 = vpop.permute.xlu0 %710  ;;  %1078 = vrot.lane.b32.xlu1 %v6186_v15, %s5548_s17 }
 0x172   : > { %795 = vst.msk [vmem:[#allocation3 + $0x60] sm:$0xff] %vm782_vm3, %v711_v9 }
 0x173   : > { %1084 = vrot.lane.b32.xlu0 %v6213_v23, %s5548_s17  ;;  %v709_v1 = vpop.permute.xlu1 %708 }
 0x174   : > { %794 = vst.msk [vmem:[#allocation3 + $0x58] sm:$0xff] %vm782_vm3, %v709_v1 }
 0x175   : > { %v715_v55 = vpop.permute.xlu0 %714  ;;  %1082 = vrot.lane.b32.xlu1 %v6211_v22, %s5548_s17 }
 0x176   : > { %797 = vst.msk [vmem:[#allocation3 + $0x70] sm:$0xff] %vm782_vm3, %v715_v55 }
 0x177   : > { %1088 = vrot.lane.b32.xlu0 %v6233_v29, %s5548_s17  ;;  %v713_v13 = vpop.permute.xlu1 %712 }
 0x178   : > { %796 = vst.msk [vmem:[#allocation3 + $0x68] sm:$0xff] %vm782_vm3, %v713_v13 }
 0x179   : > { %v719_v4 = vpop.permute.xlu0 %718  ;;  %1086 = vrot.lane.b32.xlu1 %v6229_v28, %s5548_s17 }
 0x17a   : > { %799 = vst.msk [vmem:[#allocation3 + $0x80] sm:$0xff] %vm782_vm3, %v719_v4 }
 0x17b   : > { %1092 = vrot.lane.b32.xlu0 %v6237_v31, %s5548_s17  ;;  %v717_v20 = vpop.permute.xlu1 %716 }
 0x17c   : > { %798 = vst.msk [vmem:[#allocation3 + $0x78] sm:$0xff] %vm782_vm3, %v717_v20 }
 0x17d   : > { %v723_v9 = vpop.permute.xlu0 %722  ;;  %1090 = vrot.lane.b32.xlu1 %v6235_v30, %s5548_s17 }
 0x17e   : > { %801 = vst.msk [vmem:[#allocation3 + $0x90] sm:$0xff] %vm782_vm3, %v723_v9 }
 0x17f   : > { %1096 = vrot.lane.b32.xlu0 %v6249_v35, %s5548_s17  ;;  %v721_v1 = vpop.permute.xlu1 %720 }
 0x180   : > { %800 = vst.msk [vmem:[#allocation3 + $0x88] sm:$0xff] %vm782_vm3, %v721_v1 }
 0x181   : > { %v727_v55 = vpop.permute.xlu0 %726  ;;  %1094 = vrot.lane.b32.xlu1 %v6247_v34, %s5548_s17 }
 0x182   : > { %803 = vst.msk [vmem:[#allocation3 + $0xa0] sm:$0xff] %vm782_vm3, %v727_v55 }
 0x183   : > { %1100 = vrot.lane.b32.xlu0 %v6261_v37, %s5548_s17  ;;  %v725_v13 = vpop.permute.xlu1 %724 }
 0x184   : > { %802 = vst.msk [vmem:[#allocation3 + $0x98] sm:$0xff] %vm782_vm3, %v725_v13 }
 0x185   : > { %v731_v4 = vpop.permute.xlu0 %730  ;;  %1098 = vrot.lane.b32.xlu1 %v6251_v36, %s5548_s17 }
 0x186   : > { %805 = vst.msk [vmem:[#allocation3 + $0xb0] sm:$0xff] %vm782_vm3, %v731_v4 }
 0x187   : > { %1104 = vrot.lane.b32.xlu0 %v6265_v39, %s5548_s17  ;;  %v729_v20 = vpop.permute.xlu1 %728 }
 0x188   : > { %804 = vst.msk [vmem:[#allocation3 + $0xa8] sm:$0xff] %vm782_vm3, %v729_v20 }
 0x189   : > { %v735_v9 = vpop.permute.xlu0 %734  ;;  %1102 = vrot.lane.b32.xlu1 %v6263_v38, %s5548_s17 }
 0x18a   : > { %807 = vst.msk [vmem:[#allocation3 + $0xc0] sm:$0xff] %vm782_vm3, %v735_v9 }
 0x18b   : > { %1108 = vrot.lane.b32.xlu0 %v6277_v41, %s5548_s17  ;;  %v733_v1 = vpop.permute.xlu1 %732 }
 0x18c   : > { %806 = vst.msk [vmem:[#allocation3 + $0xb8] sm:$0xff] %vm782_vm3, %v733_v1 }
 0x18d   : > { %v739_v55 = vpop.permute.xlu0 %738  ;;  %1106 = vrot.lane.b32.xlu1 %v6275_v40, %s5548_s17 }
 0x18e   : > { %809 = vst.msk [vmem:[#allocation3 + $0xd0] sm:$0xff] %vm782_vm3, %v739_v55 }
 0x18f   : > { %1112 = vrot.lane.b32.xlu0 %v6289_v44, %s5548_s17  ;;  %v737_v13 = vpop.permute.xlu1 %736 }
 0x190   : > { %808 = vst.msk [vmem:[#allocation3 + $0xc8] sm:$0xff] %vm782_vm3, %v737_v13 }
 0x191   : > { %v743_v4 = vpop.permute.xlu0 %742  ;;  %1110 = vrot.lane.b32.xlu1 %v6279_v42, %s5548_s17 }
 0x192   : > { %811 = vst.msk [vmem:[#allocation3 + $0xe0] sm:$0xff] %vm782_vm3, %v743_v4 }
 0x193   : > { %1116 = vrot.lane.b32.xlu0 %v6305_v48, %s5548_s17  ;;  %v741_v20 = vpop.permute.xlu1 %740 }
 0x194   : > { %810 = vst.msk [vmem:[#allocation3 + $0xd8] sm:$0xff] %vm782_vm3, %v741_v20 }
 0x195   : > { %v747_v9 = vpop.permute.xlu0 %746  ;;  %1114 = vrot.lane.b32.xlu1 %v6295_v45, %s5548_s17 }
 0x196   : > { %813 = vst.msk [vmem:[#allocation3 + $0xf0] sm:$0xff] %vm782_vm3, %v747_v9  ;;  %v6609_v9 = vld [vmem:[#allocation2 + $0x180] sm:$0xff] }
 0x197   : > { %1120 = vrot.lane.b32.xlu0 %v6321_v53, %s5548_s17  ;;  %v745_v1 = vpop.permute.xlu1 %744 }
 0x198   : > { %812 = vst.msk [vmem:[#allocation3 + $0xe8] sm:$0xff] %vm782_vm3, %v745_v1 }
 0x199   : > { %v880_v55 = vpop.permute.xlu0 %879  ;;  %1118 = vrot.lane.b32.xlu1 %v6311_v49, %s5548_s17 }
 0x19a   : > { %976 = vst.msk [vmem:[#allocation3] sm:$0xff] %vm975_vm4, %v880_v55 }
 0x19b   : > { %1124 = vrot.lane.b32.xlu0 %v6337_v60, %s5548_s17  ;;  %v749_v13 = vpop.permute.xlu1 %748 }
 0x19c   : > { %814 = vst.msk [vmem:[#allocation3 + $0xf8] sm:$0xff] %vm782_vm3, %v749_v13 }
 0x19d   : > { %v884_v4 = vpop.permute.xlu0 %883  ;;  %1122 = vrot.lane.b32.xlu1 %v6327_v54, %s5548_s17 }
 0x19e   : > { %978 = vst.msk [vmem:[#allocation3 + $0x10] sm:$0xff] %vm975_vm4, %v884_v4  ;;  %v6621_v4 = vld [vmem:[#allocation2 + $0x188] sm:$0xff] }
 0x19f   : > { %1128 = vrot.lane.b32.xlu0 %v6353_v0, %s5548_s17  ;;  %v882_v20 = vpop.permute.xlu1 %881 }
 0x1a0   : > { %977 = vst.msk [vmem:[#allocation3 + $0x8] sm:$0xff] %vm975_vm4, %v882_v20 }
 0x1a1   : > { %v888_v1 = vpop.permute.xlu0 %887  ;;  %1126 = vrot.lane.b32.xlu1 %v6343_v61, %s5548_s17 }
 0x1a2   : > { %980 = vst.msk [vmem:[#allocation3 + $0x20] sm:$0xff] %vm975_vm4, %v888_v1 }
 0x1a3   : > { %1132 = vrot.lane.b32.xlu0 %v6609_v9, %s5548_s17  ;;  %v886_v55 = vpop.permute.xlu1 %885 }
 0x1a4   : > { %979 = vst.msk [vmem:[#allocation3 + $0x18] sm:$0xff] %vm975_vm4, %v886_v55 }
 0x1a5   : > { %v892_v13 = vpop.permute.xlu0 %891  ;;  %1130 = vrot.lane.b32.xlu1 %v6361_v5, %s5548_s17 }
 0x1a6   : > { %982 = vst.msk [vmem:[#allocation3 + $0x30] sm:$0xff] %vm975_vm4, %v892_v13 }
 0x1a7   : > { %1265 = vrot.lane.b32.xlu0 %v6094_v14, %s5549_s20  ;;  %v890_v20 = vpop.permute.xlu1 %889 }
 0x1a8   : > { %981 = vst.msk [vmem:[#allocation3 + $0x28] sm:$0xff] %vm975_vm4, %v890_v20 }
 0x1a9   : > { %v896_v1 = vpop.permute.xlu0 %895  ;;  %1134 = vrot.lane.b32.xlu1 %v6621_v4, %s5548_s17 }
 0x1aa   : > { %984 = vst.msk [vmem:[#allocation3 + $0x40] sm:$0xff] %vm975_vm4, %v896_v1  ;;  %v8268_v1 = vld [vmem:[#allocation23_spill] sm:$0xff] }
 0x1ab   : > { %1269 = vrot.lane.b32.xlu0 %v6105_v21, %s5549_s20  ;;  %v894_v55 = vpop.permute.xlu1 %893 }
 0x1ac   : > { %983 = vst.msk [vmem:[#allocation3 + $0x38] sm:$0xff] %vm975_vm4, %v894_v55 }
 0x1ad   : > { %v900_v13 = vpop.permute.xlu0 %899  ;;  %1267 = vrot.lane.b32.xlu1 %v6114_v26, %s5549_s20 }
 0x1ae   : > { %986 = vst.msk [vmem:[#allocation3 + $0x50] sm:$0xff] %vm975_vm4, %v900_v13 }
 0x1af   : > { %1273 = vrot.lane.b32.xlu0 %v6125_v32, %s5549_s20  ;;  %v898_v14 = vpop.permute.xlu1 %897 }
 0x1b0   : > { %985 = vst.msk [vmem:[#allocation3 + $0x48] sm:$0xff] %vm975_vm4, %v898_v14 }
 0x1b1   : > { %v904_v20 = vpop.permute.xlu0 %903  ;;  %1271 = vrot.lane.b32.xlu1 %v6143_v50, %s5549_s20 }
 0x1b2   : > { %988 = vst.msk [vmem:[#allocation3 + $0x60] sm:$0xff] %vm975_vm4, %v904_v20  ;;  %v6709_v20 = vld [vmem:[#allocation2 + $0x181] sm:$0xff] }
 0x1b3   : > { %1277 = vrot.lane.b32.xlu0 %v6155_v57, %s5549_s20  ;;  %v902_v21 = vpop.permute.xlu1 %901 }
 0x1b4   : > { %987 = vst.msk [vmem:[#allocation3 + $0x58] sm:$0xff] %vm975_vm4, %v902_v21  ;;  %v6721_v21 = vld [vmem:[#allocation2 + $0x189] sm:$0xff] }
 0x1b5   : > { %v908_v26 = vpop.permute.xlu0 %907  ;;  %1275 = vrot.lane.b32.xlu1 %v6176_v6, %s5549_s20 }
 0x1b6   : > { %990 = vst.msk [vmem:[#allocation3 + $0x70] sm:$0xff] %vm975_vm4, %v908_v26  ;;  %v8271_v26 = vld [vmem:[#allocation26_spill] sm:$0xff] }
 0x1b7   : > { %1281 = vrot.lane.b32.xlu0 %v6181_v10, %s5549_s20  ;;  %v906_v32 = vpop.permute.xlu1 %905 }
 0x1b8   : > { %989 = vst.msk [vmem:[#allocation3 + $0x68] sm:$0xff] %vm975_vm4, %v906_v32 }
 0x1b9   : > { %v912_v50 = vpop.permute.xlu0 %911  ;;  %1279 = vrot.lane.b32.xlu1 %v6198_v17, %s5549_s20 }
 0x1ba   : > { %992 = vst.msk [vmem:[#allocation3 + $0x80] sm:$0xff] %vm975_vm4, %v912_v50  ;;  %v8272_v50 = vld [vmem:[#allocation27_spill] sm:$0xff] }
 0x1bb   : > { %1285 = vrot.lane.b32.xlu0 %v6203_v18, %s5549_s20  ;;  %v910_v57 = vpop.permute.xlu1 %909 }
 0x1bc   : > { %991 = vst.msk [vmem:[#allocation3 + $0x78] sm:$0xff] %vm975_vm4, %v910_v57 }
 0x1bd   : > { %v916_v6 = vpop.permute.xlu0 %915  ;;  %1283 = vrot.lane.b32.xlu1 %v6207_v19, %s5549_s20 }
 0x1be   : > { %994 = vst.msk [vmem:[#allocation3 + $0x90] sm:$0xff] %vm975_vm4, %v916_v6 }
 0x1bf   : > { %1289 = vrot.lane.b32.xlu0 %v6215_v24, %s5549_s20  ;;  %v914_v10 = vpop.permute.xlu1 %913 }
 0x1c0   : > { %993 = vst.msk [vmem:[#allocation3 + $0x88] sm:$0xff] %vm975_vm4, %v914_v10  ;;  %v8273_v10 = vld [vmem:[#allocation28_spill] sm:$0xff] }
 0x1c1   : > { %v920_v17 = vpop.permute.xlu0 %919  ;;  %1287 = vrot.lane.b32.xlu1 %v6223_v25, %s5549_s20 }
 0x1c2   : > { %996 = vst.msk [vmem:[#allocation3 + $0xa0] sm:$0xff] %vm975_vm4, %v920_v17  ;;  %v8274_v17 = vld [vmem:[#allocation29_spill] sm:$0xff] }
 0x1c3   : > { %1293 = vrot.lane.b32.xlu0 %v6227_v27, %s5549_s20  ;;  %v918_v18 = vpop.permute.xlu1 %917 }
 0x1c4   : > { %995 = vst.msk [vmem:[#allocation3 + $0x98] sm:$0xff] %vm975_vm4, %v918_v18 }
 0x1c5   : > { %v924_v19 = vpop.permute.xlu0 %923  ;;  %1291 = vrot.lane.b32.xlu1 %v6239_v33, %s5549_s20 }
 0x1c6   : > { %998 = vst.msk [vmem:[#allocation3 + $0xb0] sm:$0xff] %vm975_vm4, %v924_v19 }
 0x1c7   : > { %1297 = vrot.lane.b32.xlu0 %v6281_v43, %s5549_s20  ;;  %v922_v24 = vpop.permute.xlu1 %921 }
 0x1c8   : > { %997 = vst.msk [vmem:[#allocation3 + $0xa8] sm:$0xff] %vm975_vm4, %v922_v24  ;;  %v8275_v24 = vld [vmem:[#allocation30_spill] sm:$0xff] }
 0x1c9   : > { %v928_v25 = vpop.permute.xlu0 %927  ;;  %1295 = vrot.lane.b32.xlu1 %v6297_v46, %s5549_s20 }
 0x1ca   : > { %1000 = vst.msk [vmem:[#allocation3 + $0xc0] sm:$0xff] %vm975_vm4, %v928_v25  ;;  %v8276_v25 = vld [vmem:[#allocation31_spill] sm:$0xff] }
 0x1cb   : > { %1301 = vrot.lane.b32.xlu0 %v6303_v47, %s5549_s20  ;;  %v926_v27 = vpop.permute.xlu1 %925 }
 0x1cc   : > { %999 = vst.msk [vmem:[#allocation3 + $0xb8] sm:$0xff] %vm975_vm4, %v926_v27 }
 0x1cd   : > { %v932_v33 = vpop.permute.xlu0 %931  ;;  %1299 = vrot.lane.b32.xlu1 %v6313_v51, %s5549_s20 }
 0x1ce   : > { %1002 = vst.msk [vmem:[#allocation3 + $0xd0] sm:$0xff] %vm975_vm4, %v932_v33 }
 0x1cf   : > { %1305 = vrot.lane.b32.xlu0 %v6319_v52, %s5549_s20  ;;  %v930_v43 = vpop.permute.xlu1 %929  ;;  %v8269_v52 = vld [vmem:[#allocation24_spill] sm:$0xff] }
 0x1d0   : > { %1001 = vst.msk [vmem:[#allocation3 + $0xc8] sm:$0xff] %vm975_vm4, %v930_v43  ;;  %v8277_v43 = vld [vmem:[#allocation32_spill] sm:$0xff] }
 0x1d1   : > { %v936_v46 = vpop.permute.xlu0 %935  ;;  %1303 = vrot.lane.b32.xlu1 %v6329_v58, %s5549_s20 }
 0x1d2   : > { %1004 = vst.msk [vmem:[#allocation3 + $0xe0] sm:$0xff] %vm975_vm4, %v936_v46  ;;  %v8278_v46 = vld [vmem:[#allocation33_spill] sm:$0xff] }
 0x1d3   : > { %1309 = vrot.lane.b32.xlu0 %v6335_v59, %s5549_s20  ;;  %v934_v47 = vpop.permute.xlu1 %933 }
 0x1d4   : > { %1003 = vst.msk [vmem:[#allocation3 + $0xd8] sm:$0xff] %vm975_vm4, %v934_v47 }
 0x1d5   : > { %v940_v51 = vpop.permute.xlu0 %939  ;;  %1307 = vrot.lane.b32.xlu1 %v8268_v1, %s5549_s20  ;;  %v8279_v1 = vld [vmem:[#allocation34_spill] sm:$0xff] }
 0x1d6   : > { %1006 = vst.msk [vmem:[#allocation3 + $0xf0] sm:$0xff] %vm975_vm4, %v940_v51 }
 0x1d7   : > { %1313 = vrot.lane.b32.xlu0 %v8269_v52, %s5549_s20  ;;  %v938_v55 = vpop.permute.xlu1 %937  ;;  %v8280_v52 = vld [vmem:[#allocation35_spill] sm:$0xff] }
 0x1d8   : > { %1005 = vst.msk [vmem:[#allocation3 + $0xe8] sm:$0xff] %vm975_vm4, %v938_v55 }
 0x1d9   : > { %v1073_v58 = vpop.permute.xlu0 %1072  ;;  %1311 = vrot.lane.b32.xlu1 %v6363_v7, %s5549_s20 }
 0x1da   : > { %1169 = vst.msk [vmem:[#allocation3] sm:$0xff] %vm1168_vm5, %v1073_v58 }
 0x1db   : > { %1317 = vrot.lane.b32.xlu0 %v6371_v11, %s5549_s20  ;;  %v942_v59 = vpop.permute.xlu1 %941 }
 0x1dc   : > { %1007 = vst.msk [vmem:[#allocation3 + $0xf8] sm:$0xff] %vm975_vm4, %v942_v59  ;;  %v8281_v59 = vld [vmem:[#allocation36_spill] sm:$0xff] }
 0x1dd   : > { %v1077_v13 = vpop.permute.xlu0 %1076  ;;  %1315 = vrot.lane.b32.xlu1 %v6377_v62, %s5549_s20 }
 0x1de   : > { %1171 = vst.msk [vmem:[#allocation3 + $0x10] sm:$0xff] %vm1168_vm5, %v1077_v13  ;;  %v8282_v13 = vld [vmem:[#allocation37_spill] sm:$0xff] }
 0x1df   : > { %1321 = vrot.lane.b32.xlu0 %v6382_v63, %s5549_s20  ;;  %v1075_v14 = vpop.permute.xlu1 %1074  ;;  %v8270_v63 = vld [vmem:[#allocation25_spill] sm:$0xff] }
 0x1e0   : > { %1170 = vst.msk [vmem:[#allocation3 + $0x8] sm:$0xff] %vm1168_vm5, %v1075_v14 }
 0x1e1   : > { %v1081_v7 = vpop.permute.xlu0 %1080  ;;  %1319 = vrot.lane.b32.xlu1 %v6387_v2, %s5549_s20 }
 0x1e2   : > { %1173 = vst.msk [vmem:[#allocation3 + $0x20] sm:$0xff] %vm1168_vm5, %v1081_v7 }
 0x1e3   : > { %1325 = vrot.lane.b32.xlu0 %v6709_v20, %s5549_s20  ;;  %v1079_v62 = vpop.permute.xlu1 %1078 }
 0x1e4   : > { %1172 = vst.msk [vmem:[#allocation3 + $0x18] sm:$0xff] %vm1168_vm5, %v1079_v62  ;;  %v8283_v62 = vld [vmem:[#allocation38_spill] sm:$0xff] }
 0x1e5   : > { %v1085_v11 = vpop.permute.xlu0 %1084  ;;  %1323 = vrot.lane.b32.xlu1 %v8270_v63, %s5549_s20 }
 0x1e6   : > { %1175 = vst.msk [vmem:[#allocation3 + $0x30] sm:$0xff] %vm1168_vm5, %v1085_v11  ;;  %v8284_v11 = vld [vmem:[#allocation39_spill] sm:$0xff] }
 0x1e7   : > { %1458 = vrot.lane.b32.xlu0 %v8271_v26, %s5550_s13  ;;  %v1083_v2 = vpop.permute.xlu1 %1082 }
 0x1e8   : > { %1174 = vst.msk [vmem:[#allocation3 + $0x28] sm:$0xff] %vm1168_vm5, %v1083_v2  ;;  %v8285_v2 = vld [vmem:[#allocation40_spill] sm:$0xff] }
 0x1e9   : > { %v1089_v32 = vpop.permute.xlu0 %1088  ;;  %1327 = vrot.lane.b32.xlu1 %v6721_v21, %s5549_s20 }
 0x1ea   : > { %1177 = vst.msk [vmem:[#allocation3 + $0x40] sm:$0xff] %vm1168_vm5, %v1089_v32  ;;  %v8286_v32 = vld [vmem:[#allocation41_spill] sm:$0xff] }
 0x1eb   : > { %1462 = vrot.lane.b32.xlu0 %v8272_v50, %s5550_s13  ;;  %v1087_v57 = vpop.permute.xlu1 %1086 }
 0x1ec   : > { %1176 = vst.msk [vmem:[#allocation3 + $0x38] sm:$0xff] %vm1168_vm5, %v1087_v57 }
 0x1ed   : > { %v1093_v6 = vpop.permute.xlu0 %1092  ;;  %1460 = vrot.lane.b32.xlu1 %v8273_v10, %s5550_s13  ;;  %v8288_v10 = vld [vmem:[#allocation43_spill] sm:$0xff] }
 0x1ee   : > { %1179 = vst.msk [vmem:[#allocation3 + $0x50] sm:$0xff] %vm1168_vm5, %v1093_v6  ;;  %v8287_v6 = vld [vmem:[#allocation42_spill] sm:$0xff] }
 0x1ef   : > { %1466 = vrot.lane.b32.xlu0 %v8274_v17, %s5550_s13  ;;  %v1091_v18 = vpop.permute.xlu1 %1090 }
 0x1f0   : > { %1178 = vst.msk [vmem:[#allocation3 + $0x48] sm:$0xff] %vm1168_vm5, %v1091_v18 }
 0x1f1   : > { %v1097_v19 = vpop.permute.xlu0 %1096  ;;  %1464 = vrot.lane.b32.xlu1 %v8275_v24, %s5550_s13  ;;  %v8290_v24 = vld [vmem:[#allocation45_spill] sm:$0xff] }
 0x1f2   : > { %1181 = vst.msk [vmem:[#allocation3 + $0x60] sm:$0xff] %vm1168_vm5, %v1097_v19  ;;  %v8289_v19 = vld [vmem:[#allocation44_spill] sm:$0xff] }
 0x1f3   : > { %1470 = vrot.lane.b32.xlu0 %v8276_v25, %s5550_s13  ;;  %v1095_v27 = vpop.permute.xlu1 %1094 }
 0x1f4   : > { %1180 = vst.msk [vmem:[#allocation3 + $0x58] sm:$0xff] %vm1168_vm5, %v1095_v27 }
 0x1f5   : > { %v1101_v33 = vpop.permute.xlu0 %1100  ;;  %1468 = vrot.lane.b32.xlu1 %v8277_v43, %s5550_s13  ;;  %v8292_v43 = vld [vmem:[#allocation47_spill] sm:$0xff] }
 0x1f6   : > { %1183 = vst.msk [vmem:[#allocation3 + $0x70] sm:$0xff] %vm1168_vm5, %v1101_v33  ;;  %v8291_v33 = vld [vmem:[#allocation46_spill] sm:$0xff] }
 0x1f7   : > { %1474 = vrot.lane.b32.xlu0 %v8278_v46, %s5550_s13  ;;  %v1099_v47 = vpop.permute.xlu1 %1098 }
 0x1f8   : > { %1182 = vst.msk [vmem:[#allocation3 + $0x68] sm:$0xff] %vm1168_vm5, %v1099_v47 }
 0x1f9   : > { %v1105_v51 = vpop.permute.xlu0 %1104  ;;  %1472 = vrot.lane.b32.xlu1 %v8279_v1, %s5550_s13  ;;  %v8294_v1 = vld [vmem:[#allocation49_spill] sm:$0xff] }
 0x1fa   : > { %1185 = vst.msk [vmem:[#allocation3 + $0x80] sm:$0xff] %vm1168_vm5, %v1105_v51  ;;  %v8293_v51 = vld [vmem:[#allocation48_spill] sm:$0xff] }
 0x1fb   : > { %1478 = vrot.lane.b32.xlu0 %v8280_v52, %s5550_s13  ;;  %v1103_v55 = vpop.permute.xlu1 %1102 }
 0x1fc   : > { %1184 = vst.msk [vmem:[#allocation3 + $0x78] sm:$0xff] %vm1168_vm5, %v1103_v55 }
 0x1fd   : > { %v1109_v58 = vpop.permute.xlu0 %1108  ;;  %1476 = vrot.lane.b32.xlu1 %v8281_v59, %s5550_s13  ;;  %v8296_v59 = vld [vmem:[#allocation51_spill] sm:$0xff] }
 0x1fe   : > { %1187 = vst.msk [vmem:[#allocation3 + $0x90] sm:$0xff] %vm1168_vm5, %v1109_v58  ;;  %v8295_v58 = vld [vmem:[#allocation50_spill] sm:$0xff] }
 0x1ff   : > { %1482 = vrot.lane.b32.xlu0 %v8282_v13, %s5550_s13  ;;  %v1107_v14 = vpop.permute.xlu1 %1106 }
 0x200   : > { %1186 = vst.msk [vmem:[#allocation3 + $0x88] sm:$0xff] %vm1168_vm5, %v1107_v14 }
 0x201   : > { %v1113_v7 = vpop.permute.xlu0 %1112  ;;  %1480 = vrot.lane.b32.xlu1 %v8283_v62, %s5550_s13 }
 0x202   : > { %1189 = vst.msk [vmem:[#allocation3 + $0xa0] sm:$0xff] %vm1168_vm5, %v1113_v7  ;;  %v8297_v7 = vld [vmem:[#allocation52_spill] sm:$0xff] }
 0x203   : > { %1486 = vrot.lane.b32.xlu0 %v8284_v11, %s5550_s13  ;;  %v1111_v63 = vpop.permute.xlu1 %1110  ;;  %v6809_v11 = vld [vmem:[#allocation2 + $0x182] sm:$0xff] }
 0x204   : > { %1188 = vst.msk [vmem:[#allocation3 + $0x98] sm:$0xff] %vm1168_vm5, %v1111_v63 }
 0x205   : > { %v1117_v26 = vpop.permute.xlu0 %1116  ;;  %1484 = vrot.lane.b32.xlu1 %v8285_v2, %s5550_s13 }
 0x206   : > { %1191 = vst.msk [vmem:[#allocation3 + $0xb0] sm:$0xff] %vm1168_vm5, %v1117_v26 }
 0x207   : > { %1490 = vrot.lane.b32.xlu0 %v8286_v32, %s5550_s13  ;;  %v1115_v50 = vpop.permute.xlu1 %1114 }
 0x208   : > { %1190 = vst.msk [vmem:[#allocation3 + $0xa8] sm:$0xff] %vm1168_vm5, %v1115_v50 }
 0x209   : > { %v1121_v57 = vpop.permute.xlu0 %1120  ;;  %1488 = vrot.lane.b32.xlu1 %v8287_v6, %s5550_s13  ;;  %v2199_v6 = vld [vmem:[#allocation12] sm:$0xff] }
 0x20a   : > { %1193 = vst.msk [vmem:[#allocation3 + $0xc0] sm:$0xff] %vm1168_vm5, %v1121_v57 }
 0x20b   : > { %1494 = vrot.lane.b32.xlu0 %v8288_v10, %s5550_s13  ;;  %v1119_v17 = vpop.permute.xlu1 %1118  ;;  %v2200_v10 = vld [vmem:[#allocation12 + $0x8] sm:$0xff] }
 0x20c   : > { %1192 = vst.msk [vmem:[#allocation3 + $0xb8] sm:$0xff] %vm1168_vm5, %v1119_v17  ;;  %v2201_v17 = vld [vmem:[#allocation12 + $0x10] sm:$0xff] }
 0x20d   : > { %v1125_v18 = vpop.permute.xlu0 %1124  ;;  %1492 = vrot.lane.b32.xlu1 %v8289_v19, %s5550_s13 }
 0x20e   : > { %1195 = vst.msk [vmem:[#allocation3 + $0xd0] sm:$0xff] %vm1168_vm5, %v1125_v18  ;;  %v2202_v18 = vld [vmem:[#allocation12 + $0x18] sm:$0xff] }
 0x20f   : > { %1498 = vrot.lane.b32.xlu0 %v8290_v24, %s5550_s13  ;;  %v1123_v25 = vpop.permute.xlu1 %1122  ;;  %v2203_v24 = vld [vmem:[#allocation12 + $0x20] sm:$0xff] }
 0x210   : > { %1194 = vst.msk [vmem:[#allocation3 + $0xc8] sm:$0xff] %vm1168_vm5, %v1123_v25  ;;  %v2204_v25 = vld [vmem:[#allocation12 + $0x28] sm:$0xff] }
 0x211   : > { %v1129_v27 = vpop.permute.xlu0 %1128  ;;  %1496 = vrot.lane.b32.xlu1 %v8291_v33, %s5550_s13  ;;  %v1618_v33 = vld [vmem:[#allocation2 + $0x198] sm:$0xff] }
 0x212   : > { %1197 = vst.msk [vmem:[#allocation3 + $0xe0] sm:$0xff] %vm1168_vm5, %v1129_v27 }
 0x213   : > { %1502 = vrot.lane.b32.xlu0 %v8292_v43, %s5550_s13  ;;  %v1127_v46 = vpop.permute.xlu1 %1126  ;;  %v2205_v43 = vld [vmem:[#allocation12 + $0x30] sm:$0xff] }
 0x214   : > { %1196 = vst.msk [vmem:[#allocation3 + $0xd8] sm:$0xff] %vm1168_vm5, %v1127_v46  ;;  %v2206_v46 = vld [vmem:[#allocation12 + $0x38] sm:$0xff] }
 0x215   : > { %v1133_v47 = vpop.permute.xlu0 %1132  ;;  %1500 = vrot.lane.b32.xlu1 %v8293_v51, %s5550_s13  ;;  %v1782_v51 = vld [vmem:[#allocation2 + $0x39] sm:$0xff] }
 0x216   : > { %1199 = vst.msk [vmem:[#allocation3 + $0xf0] sm:$0xff] %vm1168_vm5, %v1133_v47 }
 0x217   : > { %1506 = vrot.lane.b32.xlu0 %v8294_v1, %s5550_s13  ;;  %v1131_v52 = vpop.permute.xlu1 %1130  ;;  %v2207_v1 = vld [vmem:[#allocation12 + $0x40] sm:$0xff] }
 0x218   : > { %1198 = vst.msk [vmem:[#allocation3 + $0xe8] sm:$0xff] %vm1168_vm5, %v1131_v52 }
 0x219   : > { %v1266_v55 = vpop.permute.xlu0 %1265  ;;  %1504 = vrot.lane.b32.xlu1 %v8295_v58, %s5550_s13 }
 0x21a   : > { %1362 = vst.msk [vmem:[#allocation3] sm:$0xff] %vm1361_vm6, %v1266_v55  ;;  %v1975_v55 = vld [vmem:[#allocation2 + $0x3a] sm:$0xff] }
 0x21b   : > { %1510 = vrot.lane.b32.xlu0 %v8296_v59, %s5550_s13  ;;  %v1135_v13 = vpop.permute.xlu1 %1134  ;;  %v1974_v59 = vld [vmem:[#allocation2 + $0x32] sm:$0xff] }
 0x21c   : > { %1200 = vst.msk [vmem:[#allocation3 + $0xf8] sm:$0xff] %vm1168_vm5, %v1135_v13  ;;  %v1784_v13 = vld [vmem:[#allocation2 + $0x51] sm:$0xff] }
 0x21d   : > { %v1270_v14 = vpop.permute.xlu0 %1269  ;;  %1508 = vrot.lane.b32.xlu1 %v8297_v7, %s5550_s13  ;;  %v1783_v7 = vld [vmem:[#allocation2 + $0x49] sm:$0xff] }
 0x21e   : > { %1364 = vst.msk [vmem:[#allocation3 + $0x10] sm:$0xff] %vm1361_vm6, %v1270_v14 }
 0x21f   : > { %1514 = vrot.lane.b32.xlu0 %v6507_v3, %s5550_s13  ;;  %v1268_v62 = vpop.permute.xlu1 %1267  ;;  %v6821_v3 = vld [vmem:[#allocation2 + $0x18a] sm:$0xff] }
 0x220   : > { %1363 = vst.msk [vmem:[#allocation3 + $0x8] sm:$0xff] %vm1361_vm6, %v1268_v62 }
 0x221   : > { %v1274_v63 = vpop.permute.xlu0 %1273  ;;  %1512 = vrot.lane.b32.xlu1 %v6513_v12, %s5550_s13 }
 0x222   : > { %1366 = vst.msk [vmem:[#allocation3 + $0x20] sm:$0xff] %vm1361_vm6, %v1274_v63  ;;  %v1977_v63 = vld [vmem:[#allocation2 + $0x52] sm:$0xff] }
 0x223   : > { %1518 = vrot.lane.b32.xlu0 %v6809_v11, %s5550_s13  ;;  %v1272_v26 = vpop.permute.xlu1 %1271 }
 0x224   : > { %1365 = vst.msk [vmem:[#allocation3 + $0x18] sm:$0xff] %vm1361_vm6, %v1272_v26 }
 0x225   : > { %v1278_v2 = vpop.permute.xlu0 %1277  ;;  %1516 = vrot.lane.b32.xlu1 %v6521_v8, %s5550_s13 }
 0x226   : > { %1368 = vst.msk [vmem:[#allocation3 + $0x30] sm:$0xff] %vm1361_vm6, %v1278_v2  ;;  %v1976_v2 = vld [vmem:[#allocation2 + $0x4a] sm:$0xff] }
 0x227   : > { %1652 = vrot.lane.b32.xlu0 %v6153_v56, %s5551_s9  ;;  %v1276_v12 = vpop.permute.xlu1 %1275 }
 0x228   : > { %1367 = vst.msk [vmem:[#allocation3 + $0x28] sm:$0xff] %vm1361_vm6, %v1276_v12 }
 0x229   : > { %v1282_v32 = vpop.permute.xlu0 %1281  ;;  %1520 = vrot.lane.b32.xlu1 %v6821_v3, %s5550_s13 }
 0x22a   : > { %1370 = vst.msk [vmem:[#allocation3 + $0x40] sm:$0xff] %vm1361_vm6, %v1282_v32  ;;  %v1786_v32 = vld [vmem:[#allocation2 + $0x69] sm:$0xff] }
 0x22b   : > { %1656 = vrot.lane.b32.xlu0 %v6188_v16, %s5551_s9  ;;  %v1280_v8 = vpop.permute.xlu1 %1279 }
 0x22c   : > { %1369 = vst.msk [vmem:[#allocation3 + $0x38] sm:$0xff] %vm1361_vm6, %v1280_v8 }
 0x22d   : > { %v1286_v50 = vpop.permute.xlu0 %1285  ;;  %1654 = vrot.lane.b32.xlu1 %v6186_v15, %s5551_s9 }
 0x22e   : > { %1372 = vst.msk [vmem:[#allocation3 + $0x50] sm:$0xff] %vm1361_vm6, %v1286_v50  ;;  %v1785_v50 = vld [vmem:[#allocation2 + $0x61] sm:$0xff] }
 0x22f   : > { %1660 = vrot.lane.b32.xlu0 %v6213_v23, %s5551_s9  ;;  %v1284_v56 = vpop.permute.xlu1 %1283 }
 0x230   : > { %1371 = vst.msk [vmem:[#allocation3 + $0x48] sm:$0xff] %vm1361_vm6, %v1284_v56 }
 0x231   : > { %v1290_v57 = vpop.permute.xlu0 %1289  ;;  %1658 = vrot.lane.b32.xlu1 %v6211_v22, %s5551_s9 }
 0x232   : > { %1374 = vst.msk [vmem:[#allocation3 + $0x60] sm:$0xff] %vm1361_vm6, %v1290_v57  ;;  %v1979_v57 = vld [vmem:[#allocation2 + $0x6a] sm:$0xff] }
 0x233   : > { %1664 = vrot.lane.b32.xlu0 %v6233_v29, %s5551_s9  ;;  %v1288_v16 = vpop.permute.xlu1 %1287 }
 0x234   : > { %1373 = vst.msk [vmem:[#allocation3 + $0x58] sm:$0xff] %vm1361_vm6, %v1288_v16 }
 0x235   : > { %v1294_v15 = vpop.permute.xlu0 %1293  ;;  %1662 = vrot.lane.b32.xlu1 %v6229_v28, %s5551_s9 }
 0x236   : > { %1376 = vst.msk [vmem:[#allocation3 + $0x70] sm:$0xff] %vm1361_vm6, %v1294_v15  ;;  %v1978_v15 = vld [vmem:[#allocation2 + $0x62] sm:$0xff] }
 0x237   : > { %1668 = vrot.lane.b32.xlu0 %v6237_v31, %s5551_s9  ;;  %v1292_v23 = vpop.permute.xlu1 %1291 }
 0x238   : > { %1375 = vst.msk [vmem:[#allocation3 + $0x68] sm:$0xff] %vm1361_vm6, %v1292_v23 }
 0x239   : > { %v1298_v22 = vpop.permute.xlu0 %1297  ;;  %1666 = vrot.lane.b32.xlu1 %v6235_v30, %s5551_s9 }
 0x23a   : > { %1378 = vst.msk [vmem:[#allocation3 + $0x80] sm:$0xff] %vm1361_vm6, %v1298_v22  ;;  %v1788_v22 = vld [vmem:[#allocation2 + $0x81] sm:$0xff] }
 0x23b   : > { %1672 = vrot.lane.b32.xlu0 %v6249_v35, %s5551_s9  ;;  %v1296_v29 = vpop.permute.xlu1 %1295 }
 0x23c   : > { %1377 = vst.msk [vmem:[#allocation3 + $0x78] sm:$0xff] %vm1361_vm6, %v1296_v29 }
 0x23d   : > { %v1302_v28 = vpop.permute.xlu0 %1301  ;;  %1670 = vrot.lane.b32.xlu1 %v6247_v34, %s5551_s9 }
 0x23e   : > { %1380 = vst.msk [vmem:[#allocation3 + $0x90] sm:$0xff] %vm1361_vm6, %v1302_v28  ;;  %v1787_v28 = vld [vmem:[#allocation2 + $0x79] sm:$0xff] }
 0x23f   : > { %1676 = vrot.lane.b32.xlu0 %v6261_v37, %s5551_s9  ;;  %v1300_v31 = vpop.permute.xlu1 %1299 }
 0x240   : > { %1379 = vst.msk [vmem:[#allocation3 + $0x88] sm:$0xff] %vm1361_vm6, %v1300_v31 }
 0x241   : > { %v1306_v30 = vpop.permute.xlu0 %1305  ;;  %1674 = vrot.lane.b32.xlu1 %v6251_v36, %s5551_s9 }
 0x242   : > { %1382 = vst.msk [vmem:[#allocation3 + $0xa0] sm:$0xff] %vm1361_vm6, %v1306_v30  ;;  %v1981_v30 = vld [vmem:[#allocation2 + $0x82] sm:$0xff] }
 0x243   : > { %1680 = vrot.lane.b32.xlu0 %v6265_v39, %s5551_s9  ;;  %v1304_v35 = vpop.permute.xlu1 %1303 }
 0x244   : > { %1381 = vst.msk [vmem:[#allocation3 + $0x98] sm:$0xff] %vm1361_vm6, %v1304_v35 }
 0x245   : > { %v1310_v34 = vpop.permute.xlu0 %1309  ;;  %1678 = vrot.lane.b32.xlu1 %v6263_v38, %s5551_s9 }
 0x246   : > { %1384 = vst.msk [vmem:[#allocation3 + $0xb0] sm:$0xff] %vm1361_vm6, %v1310_v34  ;;  %v1980_v34 = vld [vmem:[#allocation2 + $0x7a] sm:$0xff] }
 0x247   : > { %1684 = vrot.lane.b32.xlu0 %v6277_v41, %s5551_s9  ;;  %v1308_v37 = vpop.permute.xlu1 %1307 }
 0x248   : > { %1383 = vst.msk [vmem:[#allocation3 + $0xa8] sm:$0xff] %vm1361_vm6, %v1308_v37 }
 0x249   : > { %v1314_v36 = vpop.permute.xlu0 %1313  ;;  %1682 = vrot.lane.b32.xlu1 %v6275_v40, %s5551_s9 }
 0x24a   : > { %1386 = vst.msk [vmem:[#allocation3 + $0xc0] sm:$0xff] %vm1361_vm6, %v1314_v36  ;;  %v1790_v36 = vld [vmem:[#allocation2 + $0x99] sm:$0xff] }
 0x24b   : > { %1688 = vrot.lane.b32.xlu0 %v6289_v44, %s5551_s9  ;;  %v1312_v39 = vpop.permute.xlu1 %1311 }
 0x24c   : > { %1385 = vst.msk [vmem:[#allocation3 + $0xb8] sm:$0xff] %vm1361_vm6, %v1312_v39 }
 0x24d   : > { %v1318_v38 = vpop.permute.xlu0 %1317  ;;  %1686 = vrot.lane.b32.xlu1 %v6279_v42, %s5551_s9 }
 0x24e   : > { %1388 = vst.msk [vmem:[#allocation3 + $0xd0] sm:$0xff] %vm1361_vm6, %v1318_v38  ;;  %v1789_v38 = vld [vmem:[#allocation2 + $0x91] sm:$0xff] }
 0x24f   : > { %1692 = vrot.lane.b32.xlu0 %v6305_v48, %s5551_s9  ;;  %v1316_v41 = vpop.permute.xlu1 %1315  ;;  %v5146_v48 = vpack.c.bf16 %v2200_v10, %v2199_v6  ;;  %v1792_v10 = vld [vmem:[#allocation2 + $0xb1] sm:$0xff] }
 0x250   : > { %1387 = vst.msk [vmem:[#allocation3 + $0xc8] sm:$0xff] %vm1361_vm6, %v1316_v41 }
 0x251   : > { %v1322_v40 = vpop.permute.xlu0 %1321  ;;  %1690 = vrot.lane.b32.xlu1 %v6295_v45, %s5551_s9  ;;  %5147 = vmatprep.subr.bf16.mxu0 %v5146_v48 }
 0x252   : > { %1390 = vst.msk [vmem:[#allocation3 + $0xe0] sm:$0xff] %vm1361_vm6, %v1322_v40  ;;  %5149 = vmatpush3.bf16.msra.mxu0 %v5146_v48  ;;  %v1983_v40 = vld [vmem:[#allocation2 + $0x9a] sm:$0xff] }
 0x253   : > { %1696 = vrot.lane.b32.xlu0 %v6321_v53, %s5551_s9  ;;  %v1320_v44 = vpop.permute.xlu1 %1319 }
 0x254   : > { %1389 = vst.msk [vmem:[#allocation3 + $0xd8] sm:$0xff] %vm1361_vm6, %v1320_v44 }
 0x255   : > { %v1326_v42 = vpop.permute.xlu0 %1325  ;;  %1694 = vrot.lane.b32.xlu1 %v6311_v49, %s5551_s9  ;;  %v5150_v49 = vpack.c.bf16 %v2202_v18, %v2201_v17  ;;  %v1985_v17 = vld [vmem:[#allocation2 + $0xb2] sm:$0xff] }
 0x256   : > { %1392 = vst.msk [vmem:[#allocation3 + $0xf0] sm:$0xff] %vm1361_vm6, %v1326_v42  ;;  %v1982_v42 = vld [vmem:[#allocation2 + $0x92] sm:$0xff] }
 0x257   : > { %1700 = vrot.lane.b32.xlu0 %v6337_v60, %s5551_s9  ;;  %v1324_v45 = vpop.permute.xlu1 %1323  ;;  %5151 = vmatprep.subr.bf16.mxu0 %v5150_v49 }
 0x258   : > { %1391 = vst.msk [vmem:[#allocation3 + $0xe8] sm:$0xff] %vm1361_vm6, %v1324_v45  ;;  %5153 = vmatpush3.bf16.msra.mxu0 %v5150_v49  ;;  %v1791_v45 = vld [vmem:[#allocation2 + $0xa9] sm:$0xff] }
 0x259   : > { %v1459_v53 = vpop.permute.xlu0 %1458  ;;  %1698 = vrot.lane.b32.xlu1 %v6327_v54, %s5551_s9  ;;  %v5154_v54 = vpack.c.bf16 %v2204_v25, %v2203_v24  ;;  %v1984_v49 = vld [vmem:[#allocation2 + $0xaa] sm:$0xff]  ;;  %v1793_v25 = vld [vmem:[#allocation2 + $0xc1] sm:$0xff] }
 0x25a   : > { %1555 = vst.msk [vmem:[#allocation3] sm:$0xff] %vm1554_vm7, %v1459_v53 }
 0x25b   : > { %1704 = vrot.lane.b32.xlu0 %v6353_v0, %s5551_s9  ;;  %v1328_v19 = vpop.permute.xlu1 %1327  ;;  %5155 = vmatprep.subr.bf16.mxu0 %v5154_v54 }
 0x25c   : > { %1393 = vst.msk [vmem:[#allocation3 + $0xf8] sm:$0xff] %vm1361_vm6, %v1328_v19  ;;  %5157 = vmatpush3.bf16.msra.mxu0 %v5154_v54 }
 0x25d   : > { %v1463_v60 = vpop.permute.xlu0 %1462  ;;  %1702 = vrot.lane.b32.xlu1 %v6343_v61, %s5551_s9  ;;  %v5158_v61 = vpack.c.bf16 %v2206_v46, %v2205_v43  ;;  %v1796_v46 = vld [vmem:[#allocation2 + $0xe1] sm:$0xff] }
 0x25e   : > { %1557 = vst.msk [vmem:[#allocation3 + $0x10] sm:$0xff] %vm1554_vm7, %v1463_v60  ;;  %v1794_v60 = vld [vmem:[#allocation2 + $0xc9] sm:$0xff] }
 0x25f   : > { %1708 = vrot.lane.b32.xlu0 %v6609_v9, %s5551_s9  ;;  %v1461_v27 = vpop.permute.xlu1 %1460  ;;  %5159 = vmatprep.subr.bf16.mxu0 %v5158_v61 }
 0x260   : > { %1556 = vst.msk [vmem:[#allocation3 + $0x8] sm:$0xff] %vm1554_vm7, %v1461_v27  ;;  %5161 = vmatpush3.bf16.msra.mxu0 %v5158_v61  ;;  %v1987_v27 = vld [vmem:[#allocation2 + $0xca] sm:$0xff] }
 0x261   : > { %v1467_v0 = vpop.permute.xlu0 %1466  ;;  %1706 = vrot.lane.b32.xlu1 %v6361_v5, %s5551_s9  ;;  %5030 = vmatprep.subr.mxu0 %v2207_v1  ;;  %v1781_v5 = vld [vmem:[#allocation2 + $0x31] sm:$0xff] }
 0x262   : > { %1559 = vst.msk [vmem:[#allocation3 + $0x20] sm:$0xff] %vm1554_vm7, %v1467_v0  ;;  %v1986_v0 = vld [vmem:[#allocation2 + $0xc2] sm:$0xff] }
 0x263   : > { %1712 = vrot.lane.b32.xlu0 %v1618_v33, %s5551_s9  ;;  %v1465_v47 = vpop.permute.xlu1 %1464 }
 0x264   : > { %1558 = vst.msk [vmem:[#allocation3 + $0x18] sm:$0xff] %vm1554_vm7, %v1465_v47  ;;  %5031 = vmatpush3.msra.mxu0 %v2207_v1  ;;  %v1795_v47 = vld [vmem:[#allocation2 + $0xd9] sm:$0xff] }
 0x265   : > { %v1471_v9 = vpop.permute.xlu0 %1470  ;;  %1710 = vrot.lane.b32.xlu1 %v6621_v4, %s5551_s9 }
 0x266   : > { %1561 = vst.msk [vmem:[#allocation3 + $0x30] sm:$0xff] %vm1554_vm7, %v1471_v9  ;;  %v1989_v9 = vld [vmem:[#allocation2 + $0xe2] sm:$0xff] }
 0x267   : > { %1847 = vrot.lane.b32.xlu0 %v1782_v51, %s5552_s14  ;;  %v1469_v52 = vpop.permute.xlu1 %1468 }
 0x268   : > { %1560 = vst.msk [vmem:[#allocation3 + $0x28] sm:$0xff] %vm1554_vm7, %v1469_v52 }
 0x269   : > { %v1475_v58 = vpop.permute.xlu0 %1474  ;;  %1845 = vrot.lane.b32.xlu1 %v1781_v5, %s5552_s14  ;;  %v1988_v5 = vld [vmem:[#allocation2 + $0xda] sm:$0xff] }
 0x26a   : > { %1563 = vst.msk [vmem:[#allocation3 + $0x40] sm:$0xff] %vm1554_vm7, %v1475_v58 }
 0x26b   : > { %2040 = vrot.lane.b32.xlu0 %v1975_v55, %s5553_s29  ;;  %v1473_v4 = vpop.permute.xlu1 %1472  ;;  %v1798_v55 = vld [vmem:[#allocation2 + $0xf9] sm:$0xff] }
 0x26c   : > { %1562 = vst.msk [vmem:[#allocation3 + $0x38] sm:$0xff] %vm1554_vm7, %v1473_v4 }
 0x26d   : > { %v1479_v14 = vpop.permute.xlu0 %1478  ;;  %2038 = vrot.lane.b32.xlu1 %v1974_v59, %s5553_s29  ;;  %v1797_v59 = vld [vmem:[#allocation2 + $0xf1] sm:$0xff] }
 0x26e   : > { %1565 = vst.msk [vmem:[#allocation3 + $0x50] sm:$0xff] %vm1554_vm7, %v1479_v14 }
 0x26f   : > { %1851 = vrot.lane.b32.xlu0 %v1784_v13, %s5552_s14  ;;  %v1477_v62 = vpop.permute.xlu1 %1476  ;;  %v1991_v13 = vld [vmem:[#allocation2 + $0xfa] sm:$0xff] }
 0x270   : > { %1564 = vst.msk [vmem:[#allocation3 + $0x48] sm:$0xff] %vm1554_vm7, %v1477_v62 }
 0x271   : > { %v1483_v26 = vpop.permute.xlu0 %1482  ;;  %1849 = vrot.lane.b32.xlu1 %v1783_v7, %s5552_s14  ;;  %v1990_v7 = vld [vmem:[#allocation2 + $0xf2] sm:$0xff] }
 0x272   : > { %1567 = vst.msk [vmem:[#allocation3 + $0x60] sm:$0xff] %vm1554_vm7, %v1483_v26 }
 0x273   : > { %2044 = vrot.lane.b32.xlu0 %v1977_v63, %s5553_s29  ;;  %v1481_v12 = vpop.permute.xlu1 %1480  ;;  %v1800_v63 = vld [vmem:[#allocation2 + $0x111] sm:$0xff] }
 0x274   : > { %1566 = vst.msk [vmem:[#allocation3 + $0x58] sm:$0xff] %vm1554_vm7, %v1481_v12 }
 0x275   : > { %v1487_v8 = vpop.permute.xlu0 %1486  ;;  %2042 = vrot.lane.b32.xlu1 %v1976_v2, %s5553_s29  ;;  %v1799_v2 = vld [vmem:[#allocation2 + $0x109] sm:$0xff] }
 0x276   : > { %1569 = vst.msk [vmem:[#allocation3 + $0x70] sm:$0xff] %vm1554_vm7, %v1487_v8 }
 0x277   : > { %1855 = vrot.lane.b32.xlu0 %v1786_v32, %s5552_s14  ;;  %v1485_v56 = vpop.permute.xlu1 %1484  ;;  %v1993_v32 = vld [vmem:[#allocation2 + $0x112] sm:$0xff] }
 0x278   : > { %1568 = vst.msk [vmem:[#allocation3 + $0x68] sm:$0xff] %vm1554_vm7, %v1485_v56 }
 0x279   : > { %v1491_v16 = vpop.permute.xlu0 %1490  ;;  %1853 = vrot.lane.b32.xlu1 %v1785_v50, %s5552_s14  ;;  %v1992_v50 = vld [vmem:[#allocation2 + $0x10a] sm:$0xff] }
 0x27a   : > { %1571 = vst.msk [vmem:[#allocation3 + $0x80] sm:$0xff] %vm1554_vm7, %v1491_v16 }
 0x27b   : > { %2048 = vrot.lane.b32.xlu0 %v1979_v57, %s5553_s29  ;;  %v1489_v23 = vpop.permute.xlu1 %1488  ;;  %v1802_v57 = vld [vmem:[#allocation2 + $0x129] sm:$0xff] }
 0x27c   : > { %1570 = vst.msk [vmem:[#allocation3 + $0x78] sm:$0xff] %vm1554_vm7, %v1489_v23 }
 0x27d   : > { %v1495_v29 = vpop.permute.xlu0 %1494  ;;  %2046 = vrot.lane.b32.xlu1 %v1978_v15, %s5553_s29  ;;  %v1801_v15 = vld [vmem:[#allocation2 + $0x121] sm:$0xff] }
 0x27e   : > { %1573 = vst.msk [vmem:[#allocation3 + $0x90] sm:$0xff] %vm1554_vm7, %v1495_v29 }
 0x27f   : > { %1859 = vrot.lane.b32.xlu0 %v1788_v22, %s5552_s14  ;;  %v1493_v31 = vpop.permute.xlu1 %1492  ;;  %v1995_v22 = vld [vmem:[#allocation2 + $0x12a] sm:$0xff] }
 0x280   : > { %1572 = vst.msk [vmem:[#allocation3 + $0x88] sm:$0xff] %vm1554_vm7, %v1493_v31 }
 0x281   : > { %v1499_v35 = vpop.permute.xlu0 %1498  ;;  %1857 = vrot.lane.b32.xlu1 %v1787_v28, %s5552_s14  ;;  %v1994_v28 = vld [vmem:[#allocation2 + $0x122] sm:$0xff] }
 0x282   : > { %1575 = vst.msk [vmem:[#allocation3 + $0xa0] sm:$0xff] %vm1554_vm7, %v1499_v35 }
 0x283   : > { %2052 = vrot.lane.b32.xlu0 %v1981_v30, %s5553_s29  ;;  %v1497_v37 = vpop.permute.xlu1 %1496  ;;  %v1804_v30 = vld [vmem:[#allocation2 + $0x141] sm:$0xff] }
 0x284   : > { %1574 = vst.msk [vmem:[#allocation3 + $0x98] sm:$0xff] %vm1554_vm7, %v1497_v37 }
 0x285   : > { %v1503_v39 = vpop.permute.xlu0 %1502  ;;  %2050 = vrot.lane.b32.xlu1 %v1980_v34, %s5553_s29  ;;  %v1803_v34 = vld [vmem:[#allocation2 + $0x139] sm:$0xff] }
 0x286   : > { %1577 = vst.msk [vmem:[#allocation3 + $0xb0] sm:$0xff] %vm1554_vm7, %v1503_v39 }
 0x287   : > { %1863 = vrot.lane.b32.xlu0 %v1790_v36, %s5552_s14  ;;  %v1501_v41 = vpop.permute.xlu1 %1500  ;;  %v1997_v36 = vld [vmem:[#allocation2 + $0x142] sm:$0xff] }
 0x288   : > { %1576 = vst.msk [vmem:[#allocation3 + $0xa8] sm:$0xff] %vm1554_vm7, %v1501_v41 }
 0x289   : > { %v1507_v44 = vpop.permute.xlu0 %1506  ;;  %1861 = vrot.lane.b32.xlu1 %v1789_v38, %s5552_s14  ;;  %v1996_v38 = vld [vmem:[#allocation2 + $0x13a] sm:$0xff] }
 0x28a   : > { %1579 = vst.msk [vmem:[#allocation3 + $0xc0] sm:$0xff] %vm1554_vm7, %v1507_v44 }
 0x28b   : > { %2056 = vrot.lane.b32.xlu0 %v1983_v40, %s5553_s29  ;;  %v1505_v6 = vpop.permute.xlu1 %1504  ;;  %v1806_v40 = vld [vmem:[#allocation2 + $0x159] sm:$0xff] }
 0x28c   : > { %1578 = vst.msk [vmem:[#allocation3 + $0xb8] sm:$0xff] %vm1554_vm7, %v1505_v6 }
 0x28d   : > { %v1511_v48 = vpop.permute.xlu0 %1510  ;;  %2054 = vrot.lane.b32.xlu1 %v1982_v42, %s5553_s29  ;;  %v1805_v42 = vld [vmem:[#allocation2 + $0x151] sm:$0xff] }
 0x28e   : > { %1581 = vst.msk [vmem:[#allocation3 + $0xd0] sm:$0xff] %vm1554_vm7, %v1511_v48 }
 0x28f   : > { %1867 = vrot.lane.b32.xlu0 %v1792_v10, %s5552_s14  ;;  %v1509_v53 = vpop.permute.xlu1 %1508  ;;  %v1999_v10 = vld [vmem:[#allocation2 + $0x15a] sm:$0xff] }
 0x290   : > { %1580 = vst.msk [vmem:[#allocation3 + $0xc8] sm:$0xff] %vm1554_vm7, %v1509_v53 }
 0x291   : > { %v1515_v18 = vpop.permute.xlu0 %1514  ;;  %1865 = vrot.lane.b32.xlu1 %v1791_v45, %s5552_s14  ;;  %v1998_v45 = vld [vmem:[#allocation2 + $0x152] sm:$0xff] }
 0x292   : > { %1583 = vst.msk [vmem:[#allocation3 + $0xe0] sm:$0xff] %vm1554_vm7, %v1515_v18 }
 0x293   : > { %2060 = vrot.lane.b32.xlu0 %v1985_v17, %s5553_s29  ;;  %v1513_v19 = vpop.permute.xlu1 %1512  ;;  %v1808_v17 = vld [vmem:[#allocation2 + $0x171] sm:$0xff] }
 0x294   : > { %1582 = vst.msk [vmem:[#allocation3 + $0xd8] sm:$0xff] %vm1554_vm7, %v1513_v19 }
 0x295   : > { %v1519_v24 = vpop.permute.xlu0 %1518  ;;  %2058 = vrot.lane.b32.xlu1 %v1984_v49, %s5553_s29  ;;  %v1807_v49 = vld [vmem:[#allocation2 + $0x169] sm:$0xff] }
 0x296   : > { %1585 = vst.msk [vmem:[#allocation3 + $0xf0] sm:$0xff] %vm1554_vm7, %v1519_v24 }
 0x297   : > { %1871 = vrot.lane.b32.xlu0 %v1794_v60, %s5552_s14  ;;  %v1517_v54 = vpop.permute.xlu1 %1516  ;;  %v2001_v60 = vld [vmem:[#allocation2 + $0x172] sm:$0xff] }
 0x298   : > { %1584 = vst.msk [vmem:[#allocation3 + $0xe8] sm:$0xff] %vm1554_vm7, %v1517_v54 }
 0x299   : > { %v1653_v33 = vpop.permute.xlu0 %1652  ;;  %1869 = vrot.lane.b32.xlu1 %v1793_v25, %s5552_s14  ;;  %v2000_v25 = vld [vmem:[#allocation2 + $0x16a] sm:$0xff] }
 0x29a   : > { %1749 = vst.msk [vmem:[#allocation3] sm:$0xff] %vm1748_vm8, %v1653_v33 }
 0x29b   : > { %2064 = vrot.lane.b32.xlu0 %v1987_v27, %s5553_s29  ;;  %v1521_v43 = vpop.permute.xlu1 %1520 }
 0x29c   : > { %1586 = vst.msk [vmem:[#allocation3 + $0xf8] sm:$0xff] %vm1554_vm7, %v1521_v43 }
 0x29d   : > { %v1657_v61 = vpop.permute.xlu0 %1656  ;;  %2062 = vrot.lane.b32.xlu1 %v1986_v0, %s5553_s29 }
 0x29e   : > { %1751 = vst.msk [vmem:[#allocation3 + $0x10] sm:$0xff] %vm1748_vm8, %v1657_v61 }
 0x29f   : > { %1875 = vrot.lane.b32.xlu0 %v1796_v46, %s5552_s14  ;;  %v1655_v51 = vpop.permute.xlu1 %1654 }
 0x2a0   : > { %1750 = vst.msk [vmem:[#allocation3 + $0x8] sm:$0xff] %vm1748_vm8, %v1655_v51 }
 0x2a1   : > { %v1661_v1 = vpop.permute.xlu0 %1660  ;;  %1873 = vrot.lane.b32.xlu1 %v1795_v47, %s5552_s14 }
 0x2a2   : > { %1753 = vst.msk [vmem:[#allocation3 + $0x20] sm:$0xff] %vm1748_vm8, %v1661_v1 }
 0x2a3   : > { %2068 = vrot.lane.b32.xlu0 %v1989_v9, %s5553_s29  ;;  %v1659_v52 = vpop.permute.xlu1 %1658 }
 0x2a4   : > { %1752 = vst.msk [vmem:[#allocation3 + $0x18] sm:$0xff] %vm1748_vm8, %v1659_v52 }
 0x2a5   : > { %v1665_v58 = vpop.permute.xlu0 %1664  ;;  %2066 = vrot.lane.b32.xlu1 %v1988_v5, %s5553_s29 }
 0x2a6   : > { %1755 = vst.msk [vmem:[#allocation3 + $0x30] sm:$0xff] %vm1748_vm8, %v1665_v58 }
 0x2a7   : > { %1879 = vrot.lane.b32.xlu0 %v1798_v55, %s5552_s14  ;;  %v1663_v4 = vpop.permute.xlu1 %1662 }
 0x2a8   : > { %1754 = vst.msk [vmem:[#allocation3 + $0x28] sm:$0xff] %vm1748_vm8, %v1663_v4 }
 0x2a9   : > { %v1669_v14 = vpop.permute.xlu0 %1668  ;;  %1877 = vrot.lane.b32.xlu1 %v1797_v59, %s5552_s14 }
 0x2aa   : > { %1757 = vst.msk [vmem:[#allocation3 + $0x40] sm:$0xff] %vm1748_vm8, %v1669_v14 }
 0x2ab   : > { %2072 = vrot.lane.b32.xlu0 %v1991_v13, %s5553_s29  ;;  %v1667_v62 = vpop.permute.xlu1 %1666 }
 0x2ac   : > { %1756 = vst.msk [vmem:[#allocation3 + $0x38] sm:$0xff] %vm1748_vm8, %v1667_v62 }
 0x2ad   : > { %v1673_v26 = vpop.permute.xlu0 %1672  ;;  %2070 = vrot.lane.b32.xlu1 %v1990_v7, %s5553_s29 }
 0x2ae   : > { %1759 = vst.msk [vmem:[#allocation3 + $0x50] sm:$0xff] %vm1748_vm8, %v1673_v26 }
 0x2af   : > { %1883 = vrot.lane.b32.xlu0 %v1800_v63, %s5552_s14  ;;  %v1671_v12 = vpop.permute.xlu1 %1670 }
 0x2b0   : > { %1758 = vst.msk [vmem:[#allocation3 + $0x48] sm:$0xff] %vm1748_vm8, %v1671_v12 }
 0x2b1   : > { %v1677_v8 = vpop.permute.xlu0 %1676  ;;  %1881 = vrot.lane.b32.xlu1 %v1799_v2, %s5552_s14 }
 0x2b2   : > { %1761 = vst.msk [vmem:[#allocation3 + $0x60] sm:$0xff] %vm1748_vm8, %v1677_v8 }
 0x2b3   : > { %2076 = vrot.lane.b32.xlu0 %v1993_v32, %s5553_s29  ;;  %v1675_v56 = vpop.permute.xlu1 %1674 }
 0x2b4   : > { %1760 = vst.msk [vmem:[#allocation3 + $0x58] sm:$0xff] %vm1748_vm8, %v1675_v56 }
 0x2b5   : > { %v1681_v16 = vpop.permute.xlu0 %1680  ;;  %2074 = vrot.lane.b32.xlu1 %v1992_v50, %s5553_s29 }
 0x2b6   : > { %1763 = vst.msk [vmem:[#allocation3 + $0x70] sm:$0xff] %vm1748_vm8, %v1681_v16 }
 0x2b7   : > { %1887 = vrot.lane.b32.xlu0 %v1802_v57, %s5552_s14  ;;  %v1679_v23 = vpop.permute.xlu1 %1678 }
 0x2b8   : > { %1762 = vst.msk [vmem:[#allocation3 + $0x68] sm:$0xff] %vm1748_vm8, %v1679_v23 }
 0x2b9   : > { %v1685_v29 = vpop.permute.xlu0 %1684  ;;  %1885 = vrot.lane.b32.xlu1 %v1801_v15, %s5552_s14 }
 0x2ba   : > { %1765 = vst.msk [vmem:[#allocation3 + $0x80] sm:$0xff] %vm1748_vm8, %v1685_v29 }
 0x2bb   : > { %2080 = vrot.lane.b32.xlu0 %v1995_v22, %s5553_s29  ;;  %v1683_v31 = vpop.permute.xlu1 %1682 }
 0x2bc   : > { %1764 = vst.msk [vmem:[#allocation3 + $0x78] sm:$0xff] %vm1748_vm8, %v1683_v31 }
 0x2bd   : > { %v1689_v35 = vpop.permute.xlu0 %1688  ;;  %2078 = vrot.lane.b32.xlu1 %v1994_v28, %s5553_s29 }
 0x2be   : > { %1767 = vst.msk [vmem:[#allocation3 + $0x90] sm:$0xff] %vm1748_vm8, %v1689_v35 }
 0x2bf   : > { %1891 = vrot.lane.b32.xlu0 %v1804_v30, %s5552_s14  ;;  %v1687_v37 = vpop.permute.xlu1 %1686 }
 0x2c0   : > { %1766 = vst.msk [vmem:[#allocation3 + $0x88] sm:$0xff] %vm1748_vm8, %v1687_v37 }
 0x2c1   : > { %v1693_v39 = vpop.permute.xlu0 %1692  ;;  %1889 = vrot.lane.b32.xlu1 %v1803_v34, %s5552_s14 }
 0x2c2   : > { %1769 = vst.msk [vmem:[#allocation3 + $0xa0] sm:$0xff] %vm1748_vm8, %v1693_v39 }
 0x2c3   : > { %2084 = vrot.lane.b32.xlu0 %v1997_v36, %s5553_s29  ;;  %v1691_v41 = vpop.permute.xlu1 %1690 }
 0x2c4   : > { %1768 = vst.msk [vmem:[#allocation3 + $0x98] sm:$0xff] %vm1748_vm8, %v1691_v41 }
 0x2c5   : > { %v1697_v44 = vpop.permute.xlu0 %1696  ;;  %2082 = vrot.lane.b32.xlu1 %v1996_v38, %s5553_s29 }
 0x2c6   : > { %1771 = vst.msk [vmem:[#allocation3 + $0xb0] sm:$0xff] %vm1748_vm8, %v1697_v44 }
 0x2c7   : > { %1895 = vrot.lane.b32.xlu0 %v1806_v40, %s5552_s14  ;;  %v1695_v6 = vpop.permute.xlu1 %1694 }
 0x2c8   : > { %1770 = vst.msk [vmem:[#allocation3 + $0xa8] sm:$0xff] %vm1748_vm8, %v1695_v6 }
 0x2c9   : > { %v1701_v48 = vpop.permute.xlu0 %1700  ;;  %1893 = vrot.lane.b32.xlu1 %v1805_v42, %s5552_s14 }
 0x2ca   : > { %1773 = vst.msk [vmem:[#allocation3 + $0xc0] sm:$0xff] %vm1748_vm8, %v1701_v48 }
 0x2cb   : > { %2088 = vrot.lane.b32.xlu0 %v1999_v10, %s5553_s29  ;;  %v1699_v53 = vpop.permute.xlu1 %1698 }
 0x2cc   : > { %1772 = vst.msk [vmem:[#allocation3 + $0xb8] sm:$0xff] %vm1748_vm8, %v1699_v53 }
 0x2cd   : > { %v1705_v18 = vpop.permute.xlu0 %1704  ;;  %2086 = vrot.lane.b32.xlu1 %v1998_v45, %s5553_s29 }
 0x2ce   : > { %1775 = vst.msk [vmem:[#allocation3 + $0xd0] sm:$0xff] %vm1748_vm8, %v1705_v18 }
 0x2cf   : > { %1899 = vrot.lane.b32.xlu0 %v1808_v17, %s5552_s14  ;;  %v1703_v19 = vpop.permute.xlu1 %1702 }
 0x2d0   : > { %1774 = vst.msk [vmem:[#allocation3 + $0xc8] sm:$0xff] %vm1748_vm8, %v1703_v19 }
 0x2d1   : > { %v1709_v24 = vpop.permute.xlu0 %1708  ;;  %1897 = vrot.lane.b32.xlu1 %v1807_v49, %s5552_s14 }
 0x2d2   : > { %1777 = vst.msk [vmem:[#allocation3 + $0xe0] sm:$0xff] %vm1748_vm8, %v1709_v24 }
 0x2d3   : > { %2092 = vrot.lane.b32.xlu0 %v2001_v60, %s5553_s29  ;;  %v1707_v54 = vpop.permute.xlu1 %1706 }
 0x2d4   : > { %1776 = vst.msk [vmem:[#allocation3 + $0xd8] sm:$0xff] %vm1748_vm8, %v1707_v54 }
 0x2d5   : > { %v1713_v27 = vpop.permute.xlu0 %1712  ;;  %2090 = vrot.lane.b32.xlu1 %v2000_v25, %s5553_s29 }
 0x2d6   : > { %1779 = vst.msk [vmem:[#allocation3 + $0xf0] sm:$0xff] %vm1748_vm8, %v1713_v27 }
 0x2d7   : > { %1903 = vrot.lane.b32.xlu0 %v6721_v21, %s5552_s14  ;;  %v1711_v33 = vpop.permute.xlu1 %1710  ;;  %v1619_v21 = vld [vmem:[#allocation2 + $0x1a0] sm:$0xff] }
 0x2d8   : > { %1778 = vst.msk [vmem:[#allocation3 + $0xe8] sm:$0xff] %vm1748_vm8, %v1711_v33 }
 0x2d9   : > { %v1848_v0 = vpop.permute.xlu0 %1847  ;;  %1901 = vrot.lane.b32.xlu1 %v6709_v20, %s5552_s14 }
 0x2da   : > { %1943 = vst.msk [vmem:[#allocation3 + $0x8] sm:$0xff] %vm1941_vm9, %v1848_v0 }
 0x2db   : > { %2096 = vrot.lane.b32.xlu0 %v6821_v3, %s5553_s29  ;;  %v1846_v43 = vpop.permute.xlu1 %1845 }
 0x2dc   : > { %1942 = vst.msk [vmem:[#allocation3] sm:$0xff] %vm1941_vm9, %v1846_v43 }
 0x2dd   : > { %v2041_v46 = vpop.permute.xlu0 %2040  ;;  %2094 = vrot.lane.b32.xlu1 %v6809_v11, %s5553_s29 }
 0x2de   : > { %2136 = vst.msk [vmem:[#allocation3 + $0x8] sm:$0xff] %vm2134_vm10, %v2041_v46 }
 0x2df   : > { %v2039_v61 = vpop.permute.xlu1 %2038 }
 0x2e0   : > { %2135 = vst.msk [vmem:[#allocation3] sm:$0xff] %vm2134_vm10, %v2039_v61 }
 0x2e1   : > { %v1852_v20 = vpop.permute.xlu0 %1851  ;;  %1714 = vrot.lane.b32.xlu1 %v1619_v21, %s5551_s9 }
 0x2e2   : > { %1945 = vst.msk [vmem:[#allocation3 + $0x18] sm:$0xff] %vm1941_vm9, %v1852_v20 }
 0x2e3   : > { %v1850_v3 = vpop.permute.xlu1 %1849 }
 0x2e4   : > { %1944 = vst.msk [vmem:[#allocation3 + $0x10] sm:$0xff] %vm1941_vm9, %v1850_v3 }
 0x2e5   : > { %v2045_v47 = vpop.permute.xlu0 %2044  ;;  %v2168_v51 = vld [vmem:[#allocation3 + $0x8] sm:$0xff] }
 0x2e6   : > { %2138 = vst.msk [vmem:[#allocation3 + $0x18] sm:$0xff] %vm2134_vm10, %v2045_v47 }
 0x2e7   : > { %v2043_v11 = vpop.permute.xlu1 %2042  ;;  %v2167_v9 = vld [vmem:[#allocation3] sm:$0xff] }
 0x2e8   : > { %2137 = vst.msk [vmem:[#allocation3 + $0x10] sm:$0xff] %vm2134_vm10, %v2043_v11  ;;  %5032 = vmatprep.mubr.msk.f32.mxu0 %vm2215_vm11, %v2167_v9  ;;  %v1812_v9 = vld [vmem:[#allocation2 + $0x1a1] sm:$0xff] }
 0x2e9   : > { %v1856_v1 = vpop.permute.xlu0 %1855  ;;  %5033 = vmatmul.mubr.msk.f32.vlgmr.msra.gmra.mrb[0].mxu0 %vm2215_vm11, %v2168_v51  ;;  %1907 = vrot.lane.b32.xlu1 %v1812_v9, %s5552_s14 }
 0x2ea   : > { %1947 = vst.msk [vmem:[#allocation3 + $0x28] sm:$0xff] %vm1941_vm9, %v1856_v1  ;;  %v1811_v1 = vld [vmem:[#allocation2 + $0x199] sm:$0xff] }
 0x2eb   : > { %v1854_v5 = vpop.permute.xlu1 %1853  ;;  %1905 = vrot.lane.b32.xlu0 %v1811_v1, %s5552_s14 }
 0x2ec   : > { %1946 = vst.msk [vmem:[#allocation3 + $0x20] sm:$0xff] %vm1941_vm9, %v1854_v5 }
 0x2ed   : > { %v2049_v52 = vpop.permute.xlu0 %2048  ;;  %v2170_v55 = vld [vmem:[#allocation3 + $0x18] sm:$0xff] }
 0x2ee   : > { %2140 = vst.msk [vmem:[#allocation3 + $0x28] sm:$0xff] %vm2134_vm10, %v2049_v52 }
 0x2ef   : > { %v2047_v58 = vpop.permute.xlu1 %2046  ;;  %v2169_v59 = vld [vmem:[#allocation3 + $0x10] sm:$0xff] }
 0x2f0   : > { %2139 = vst.msk [vmem:[#allocation3 + $0x20] sm:$0xff] %vm2134_vm10, %v2047_v58  ;;  %5035 = vmatprep.mubr.msk.f32.mxu0 %vm2215_vm11, %v2169_v59  ;;  %v2005_v59 = vld [vmem:[#allocation2 + $0x1a2] sm:$0xff] }
 0x2f1   : > { %v1860_v4 = vpop.permute.xlu0 %1859  ;;  %5036 = vmatmul.mubr.msk.f32.gmra.mrb[2].mxu0 %vm2215_vm11, %v2170_v55  ;;  %2100 = vrot.lane.b32.xlu1 %v2005_v59, %s5553_s29 }
 0x2f2   : > { %1949 = vst.msk [vmem:[#allocation3 + $0x38] sm:$0xff] %vm1941_vm9, %v1860_v4  ;;  %v2004_v4 = vld [vmem:[#allocation2 + $0x19a] sm:$0xff] }
 0x2f3   : > { %v1858_v13 = vpop.permute.xlu1 %1857  ;;  %2098 = vrot.lane.b32.xlu0 %v2004_v4, %s5553_s29 }
 0x2f4   : > { %1948 = vst.msk [vmem:[#allocation3 + $0x30] sm:$0xff] %vm1941_vm9, %v1858_v13 }
 0x2f5   : > { %v2053_v14 = vpop.permute.xlu0 %2052  ;;  %v2172_v7 = vld [vmem:[#allocation3 + $0x28] sm:$0xff] }
 0x2f6   : > { %2142 = vst.msk [vmem:[#allocation3 + $0x38] sm:$0xff] %vm2134_vm10, %v2053_v14 }
 0x2f7   : > { %v2051_v62 = vpop.permute.xlu1 %2050  ;;  %v2171_v63 = vld [vmem:[#allocation3 + $0x20] sm:$0xff] }
 0x2f8   : > { %2141 = vst.msk [vmem:[#allocation3 + $0x30] sm:$0xff] %vm2134_vm10, %v2051_v62  ;;  %5038 = vmatprep.mubr.msk.f32.mxu0 %vm2215_vm11, %v2171_v63  ;;  %v2709_v62 = vld [vmem:[#allocation4 + $0x1] sm:$0xff] }
 0x2f9   : > { %v1864_v26 = vpop.permute.xlu0 %1863  ;;  %5039 = vmatmul.mubr.msk.f32.gmra.mrb[4].mxu0 %vm2215_vm11, %v2172_v7  ;;  %v2710_v7 = vld [vmem:[#allocation4 + $0x9] sm:$0xff]  ;;  %2773 = vrot.lane.b32.xlu0 %v2709_v62, %s5546_s28 }
 0x2fa   : > { %1951 = vst.msk [vmem:[#allocation3 + $0x48] sm:$0xff] %vm1941_vm9, %v1864_v26  ;;  %2775 = vrot.lane.b32.xlu1 %v2710_v7, %s5546_s28 }
 0x2fb   : > { %v1862_v2 = vpop.permute.xlu1 %1861 }
 0x2fc   : > { %1950 = vst.msk [vmem:[#allocation3 + $0x40] sm:$0xff] %vm1941_vm9, %v1862_v2 }
 0x2fd   : > { %v2057_v12 = vpop.permute.xlu0 %2056  ;;  %v2174_v32 = vld [vmem:[#allocation3 + $0x38] sm:$0xff] }
 0x2fe   : > { %2144 = vst.msk [vmem:[#allocation3 + $0x48] sm:$0xff] %vm2134_vm10, %v2057_v12 }
 0x2ff   : > { %v2055_v8 = vpop.permute.xlu1 %2054  ;;  %v2173_v50 = vld [vmem:[#allocation3 + $0x30] sm:$0xff] }
 0x300   : > { %2143 = vst.msk [vmem:[#allocation3 + $0x40] sm:$0xff] %vm2134_vm10, %v2055_v8  ;;  %5041 = vmatprep.mubr.msk.f32.mxu0 %vm2215_vm11, %v2173_v50 }
 0x301   : > { %v1868_v56 = vpop.permute.xlu0 %1867  ;;  %5042 = vmatmul.mubr.msk.f32.gmra.mrb[6].mxu0 %vm2215_vm11, %v2174_v32 }
 0x302   : > { %1953 = vst.msk [vmem:[#allocation3 + $0x58] sm:$0xff] %vm1941_vm9, %v1868_v56 }
 0x303   : > { %v1866_v57 = vpop.permute.xlu1 %1865 }
 0x304   : > { %1952 = vst.msk [vmem:[#allocation3 + $0x50] sm:$0xff] %vm1941_vm9, %v1866_v57 }
 0x305   : > { %v2061_v16 = vpop.permute.xlu0 %2060  ;;  %v2176_v15 = vld [vmem:[#allocation3 + $0x48] sm:$0xff] }
 0x306   : > { %2146 = vst.msk [vmem:[#allocation3 + $0x58] sm:$0xff] %vm2134_vm10, %v2061_v16 }
 0x307   : > { %v2059_v23 = vpop.permute.xlu1 %2058  ;;  %v2175_v22 = vld [vmem:[#allocation3 + $0x40] sm:$0xff] }
 0x308   : > { %2145 = vst.msk [vmem:[#allocation3 + $0x50] sm:$0xff] %vm2134_vm10, %v2059_v23  ;;  %5044 = vmatprep.mubr.msk.f32.mxu0 %vm2215_vm11, %v2175_v22 }
 0x309   : > { %v1872_v29 = vpop.permute.xlu0 %1871  ;;  %5045 = vmatmul.mubr.msk.f32.gmra.mrb[8].mxu0 %vm2215_vm11, %v2176_v15 }
 0x30a   : > { %1955 = vst.msk [vmem:[#allocation3 + $0x68] sm:$0xff] %vm1941_vm9, %v1872_v29 }
 0x30b   : > { %v1870_v28 = vpop.permute.xlu1 %1869 }
 0x30c   : > { %1954 = vst.msk [vmem:[#allocation3 + $0x60] sm:$0xff] %vm1941_vm9, %v1870_v28  ;;  %v2646_v28 = vld [vmem:[#allocation4 + $0x8] sm:$0xff] }
 0x30d   : > { %v2065_v31 = vpop.permute.xlu0 %2064  ;;  %v2178_v30 = vld [vmem:[#allocation3 + $0x58] sm:$0xff]  ;;  %2678 = vst.msk [vmem:[#allocation5 + $0x8] sm:$0xff] %vm337_vm0, %v2646_v28 }
 0x30e   : > { %2148 = vst.msk [vmem:[#allocation3 + $0x68] sm:$0xff] %vm2134_vm10, %v2065_v31  ;;  %v2645_v31 = vld [vmem:[#allocation4] sm:$0xff] }
 0x30f   : > { %v2063_v35 = vpop.permute.xlu1 %2062  ;;  %v2177_v34 = vld [vmem:[#allocation3 + $0x50] sm:$0xff]  ;;  %2677 = vst.msk [vmem:[#allocation5] sm:$0xff] %vm337_vm0, %v2645_v31 }
 0x310   : > { %2147 = vst.msk [vmem:[#allocation3 + $0x60] sm:$0xff] %vm2134_vm10, %v2063_v35  ;;  %5047 = vmatprep.mubr.msk.f32.mxu0 %vm2215_vm11, %v2177_v34 }
 0x311   : > { %v1876_v37 = vpop.permute.xlu0 %1875  ;;  %5048 = vmatmul.mubr.msk.f32.gmra.mrb[10].mxu0 %vm2215_vm11, %v2178_v30 }
 0x312   : > { %1957 = vst.msk [vmem:[#allocation3 + $0x78] sm:$0xff] %vm1941_vm9, %v1876_v37 }
 0x313   : > { %v1874_v36 = vpop.permute.xlu1 %1873 }
 0x314   : > { %1956 = vst.msk [vmem:[#allocation3 + $0x70] sm:$0xff] %vm1941_vm9, %v1874_v36  ;;  %v7145_v36 = vld [vmem:[#allocation14] ss:$0 sm:$0xff] }
 0x315   : > { %v2069_v39 = vpop.permute.xlu0 %2068  ;;  %v2180_v38 = vld [vmem:[#allocation3 + $0x68] sm:$0xff] }
 0x316   : > { %2150 = vst.msk [vmem:[#allocation3 + $0x78] sm:$0xff] %vm2134_vm10, %v2069_v39 }
 0x317   : > { %v2067_v41 = vpop.permute.xlu1 %2066  ;;  %v2179_v40 = vld [vmem:[#allocation3 + $0x60] sm:$0xff] }
 0x318   : > { %2149 = vst.msk [vmem:[#allocation3 + $0x70] sm:$0xff] %vm2134_vm10, %v2067_v41  ;;  %5050 = vmatprep.mubr.msk.f32.mxu0 %vm2215_vm11, %v2179_v40 }
 0x319   : > { %v1880_v44 = vpop.permute.xlu0 %1879  ;;  %5051 = vmatmul.mubr.msk.f32.gmra.mrb[12].mxu0 %vm2215_vm11, %v2180_v38 }
 0x31a   : > { %1959 = vst.msk [vmem:[#allocation3 + $0x88] sm:$0xff] %vm1941_vm9, %v1880_v44 }
 0x31b   : > { %v1878_v42 = vpop.permute.xlu1 %1877 }
 0x31c   : > { %1958 = vst.msk [vmem:[#allocation3 + $0x80] sm:$0xff] %vm1941_vm9, %v1878_v42 }
 0x31d   : > { %v2073_v6 = vpop.permute.xlu0 %2072  ;;  %v2182_v10 = vld [vmem:[#allocation3 + $0x78] sm:$0xff] }
 0x31e   : > { %2152 = vst.msk [vmem:[#allocation3 + $0x88] sm:$0xff] %vm2134_vm10, %v2073_v6 }
 0x31f   : > { %v2071_v48 = vpop.permute.xlu1 %2070  ;;  %v2181_v45 = vld [vmem:[#allocation3 + $0x70] sm:$0xff] }
 0x320   : > { %2151 = vst.msk [vmem:[#allocation3 + $0x80] sm:$0xff] %vm2134_vm10, %v2071_v48  ;;  %5053 = vmatprep.mubr.msk.f32.mxu0 %vm2215_vm11, %v2181_v45 }
 0x321   : > { %v1884_v53 = vpop.permute.xlu0 %1883  ;;  %5054 = vmatmul.mubr.msk.f32.gmra.mrb[14].mxu0 %vm2215_vm11, %v2182_v10 }
 0x322   : > { %1961 = vst.msk [vmem:[#allocation3 + $0x98] sm:$0xff] %vm1941_vm9, %v1884_v53 }
 0x323   : > { %v1882_v17 = vpop.permute.xlu1 %1881 }
 0x324   : > { %1960 = vst.msk [vmem:[#allocation3 + $0x90] sm:$0xff] %vm1941_vm9, %v1882_v17 }
 0x325   : > { %v2077_v18 = vpop.permute.xlu0 %2076  ;;  %v2184_v49 = vld [vmem:[#allocation3 + $0x88] sm:$0xff] }
 0x326   : > { %2154 = vst.msk [vmem:[#allocation3 + $0x98] sm:$0xff] %vm2134_vm10, %v2077_v18 }
 0x327   : > { %v2075_v19 = vpop.permute.xlu1 %2074  ;;  %v2183_v60 = vld [vmem:[#allocation3 + $0x80] sm:$0xff] }
 0x328   : > { %2153 = vst.msk [vmem:[#allocation3 + $0x90] sm:$0xff] %vm2134_vm10, %v2075_v19  ;;  %5056 = vmatprep.mubr.msk.f32.mxu0 %vm2215_vm11, %v2183_v60 }
 0x329   : > { %v1888_v24 = vpop.permute.xlu0 %1887  ;;  %5057 = vmatmul.mubr.msk.f32.gmra.mrb[16].mxu0 %vm2215_vm11, %v2184_v49 }
 0x32a   : > { %1963 = vst.msk [vmem:[#allocation3 + $0xa8] sm:$0xff] %vm1941_vm9, %v1888_v24 }
 0x32b   : > { %v1886_v25 = vpop.permute.xlu1 %1885 }
 0x32c   : > { %1962 = vst.msk [vmem:[#allocation3 + $0xa0] sm:$0xff] %vm1941_vm9, %v1886_v25 }
 0x32d   : > { %v2081_v54 = vpop.permute.xlu0 %2080  ;;  %v2186_v27 = vld [vmem:[#allocation3 + $0x98] sm:$0xff] }
 0x32e   : > { %2156 = vst.msk [vmem:[#allocation3 + $0xa8] sm:$0xff] %vm2134_vm10, %v2081_v54 }
 0x32f   : > { %v2079_v33 = vpop.permute.xlu1 %2078  ;;  %v2185_v0 = vld [vmem:[#allocation3 + $0x90] sm:$0xff] }
 0x330   : > { %2155 = vst.msk [vmem:[#allocation3 + $0xa0] sm:$0xff] %vm2134_vm10, %v2079_v33  ;;  %5059 = vmatprep.mubr.msk.f32.mxu0 %vm2215_vm11, %v2185_v0 }
 0x331   : > { %v1892_v43 = vpop.permute.xlu0 %1891  ;;  %5060 = vmatmul.mubr.msk.f32.gmra.mrb[18].mxu0 %vm2215_vm11, %v2186_v27 }
 0x332   : > { %1965 = vst.msk [vmem:[#allocation3 + $0xb8] sm:$0xff] %vm1941_vm9, %v1892_v43 }
 0x333   : > { %v1890_v46 = vpop.permute.xlu1 %1889 }
 0x334   : > { %1964 = vst.msk [vmem:[#allocation3 + $0xb0] sm:$0xff] %vm1941_vm9, %v1890_v46 }
 0x335   : > { %v2085_v21 = vpop.permute.xlu0 %2084  ;;  %v2188_v61 = vld [vmem:[#allocation3 + $0xa8] sm:$0xff] }
 0x336   : > { %2158 = vst.msk [vmem:[#allocation3 + $0xb8] sm:$0xff] %vm2134_vm10, %v2085_v21 }
 0x337   : > { %v2083_v20 = vpop.permute.xlu1 %2082  ;;  %v2187_v3 = vld [vmem:[#allocation3 + $0xa0] sm:$0xff] }
 0x338   : > { %2157 = vst.msk [vmem:[#allocation3 + $0xb0] sm:$0xff] %vm2134_vm10, %v2083_v20  ;;  %5062 = vmatprep.mubr.msk.f32.mxu0 %vm2215_vm11, %v2187_v3 }
 0x339   : > { %v1896_v47 = vpop.permute.xlu0 %1895  ;;  %5063 = vmatmul.mubr.msk.f32.gmra.mrb[20].mxu0 %vm2215_vm11, %v2188_v61 }
 0x33a   : > { %1967 = vst.msk [vmem:[#allocation3 + $0xc8] sm:$0xff] %vm1941_vm9, %v1896_v47 }
 0x33b   : > { %v1894_v51 = vpop.permute.xlu1 %1893 }
 0x33c   : > { %1966 = vst.msk [vmem:[#allocation3 + $0xc0] sm:$0xff] %vm1941_vm9, %v1894_v51 }
 0x33d   : > { %v2089_v11 = vpop.permute.xlu0 %2088  ;;  %v2190_v5 = vld [vmem:[#allocation3 + $0xb8] sm:$0xff] }
 0x33e   : > { %2160 = vst.msk [vmem:[#allocation3 + $0xc8] sm:$0xff] %vm2134_vm10, %v2089_v11 }
 0x33f   : > { %v2087_v52 = vpop.permute.xlu1 %2086  ;;  %v2189_v55 = vld [vmem:[#allocation3 + $0xb0] sm:$0xff] }
 0x340   : > { %2159 = vst.msk [vmem:[#allocation3 + $0xc0] sm:$0xff] %vm2134_vm10, %v2087_v52  ;;  %5065 = vmatprep.mubr.msk.f32.mxu0 %vm2215_vm11, %v2189_v55 }
 0x341   : > { %v1900_v58 = vpop.permute.xlu0 %1899  ;;  %5066 = vmatmul.mubr.msk.f32.gmra.mrb[22].mxu0 %vm2215_vm11, %v2190_v5 }
 0x342   : > { %1969 = vst.msk [vmem:[#allocation3 + $0xd8] sm:$0xff] %vm1941_vm9, %v1900_v58 }
 0x343   : > { %v1898_v13 = vpop.permute.xlu1 %1897 }
 0x344   : > { %1968 = vst.msk [vmem:[#allocation3 + $0xd0] sm:$0xff] %vm1941_vm9, %v1898_v13 }
 0x345   : > { %v2093_v14 = vpop.permute.xlu0 %2092  ;;  %v2192_v63 = vld [vmem:[#allocation3 + $0xc8] sm:$0xff] }
 0x346   : > { %2162 = vst.msk [vmem:[#allocation3 + $0xd8] sm:$0xff] %vm2134_vm10, %v2093_v14 }
 0x347   : > { %v2091_v26 = vpop.permute.xlu1 %2090  ;;  %v2191_v2 = vld [vmem:[#allocation3 + $0xc0] sm:$0xff] }
 0x348   : > { %2161 = vst.msk [vmem:[#allocation3 + $0xd0] sm:$0xff] %vm2134_vm10, %v2091_v26  ;;  %5068 = vmatprep.mubr.msk.f32.mxu0 %vm2215_vm11, %v2191_v2 }
 0x349   : > { %v1904_v12 = vpop.permute.xlu0 %1903  ;;  %5069 = vmatmul.mubr.msk.f32.gmra.mrb[24].mxu0 %vm2215_vm11, %v2192_v63 }
 0x34a   : > { %1971 = vst.msk [vmem:[#allocation3 + $0xe8] sm:$0xff] %vm1941_vm9, %v1904_v12 }
 0x34b   : > { %v1902_v32 = vpop.permute.xlu1 %1901 }
 0x34c   : > { %1970 = vst.msk [vmem:[#allocation3 + $0xe0] sm:$0xff] %vm1941_vm9, %v1902_v32 }
 0x34d   : > { %v2097_v8 = vpop.permute.xlu0 %2096  ;;  %v2194_v50 = vld [vmem:[#allocation3 + $0xd8] sm:$0xff] }
 0x34e   : > { %2164 = vst.msk [vmem:[#allocation3 + $0xe8] sm:$0xff] %vm2134_vm10, %v2097_v8 }
 0x34f   : > { %v2095_v56 = vpop.permute.xlu1 %2094  ;;  %v2193_v57 = vld [vmem:[#allocation3 + $0xd0] sm:$0xff] }
 0x350   : > { %2163 = vst.msk [vmem:[#allocation3 + $0xe0] sm:$0xff] %vm2134_vm10, %v2095_v56  ;;  %5071 = vmatprep.mubr.msk.f32.mxu0 %vm2215_vm11, %v2193_v57 }
 0x351   : > { %5072 = vmatmul.mubr.msk.f32.gmra.mrb[26].mxu0 %vm2215_vm11, %v2194_v50 }
 0x353   : > { %v1715_v23 = vpop.permute.xlu1 %1714 }
 0x354   : > { %1780 = vst.msk [vmem:[#allocation3 + $0xf8] sm:$0xff] %vm1748_vm8, %v1715_v23 }
 0x355   : > { %v2196_v16 = vld [vmem:[#allocation3 + $0xe8] sm:$0xff] }
 0x357   : > { %v2195_v15 = vld [vmem:[#allocation3 + $0xe0] sm:$0xff] }
 0x358   : > { %5074 = vmatprep.mubr.msk.f32.mxu0 %vm2215_vm11, %v2195_v15 }
 0x359   : > { %5075 = vmatmul.mubr.msk.f32.gmra.mrb[28].mxu0 %vm2215_vm11, %v2196_v16 }
 0x35b   : > { %v1908_v22 = vpop.permute.xlu1 %1907 }
 0x35c   : > { %1973 = vst.msk [vmem:[#allocation3 + $0xf8] sm:$0xff] %vm1941_vm9, %v1908_v22 }
 0x35d   : > { %v1906_v29 = vpop.permute.xlu0 %1905 }
 0x35e   : > { %1972 = vst.msk [vmem:[#allocation3 + $0xf0] sm:$0xff] %vm1941_vm9, %v1906_v29 }
 0x363   : > { %v2101_v30 = vpop.permute.xlu1 %2100 }
 0x364   : > { %2166 = vst.msk [vmem:[#allocation3 + $0xf8] sm:$0xff] %vm2134_vm10, %v2101_v30 }
 0x365   : > { %v2099_v35 = vpop.permute.xlu0 %2098 }
 0x366   : > { %2165 = vst.msk [vmem:[#allocation3 + $0xf0] sm:$0xff] %vm2134_vm10, %v2099_v35 }
 0x36b   : > { %v2774_v37 = vpop.permute.xlu0 %2773 }
 0x36c   : > { %v2776_v34 = vpop.permute.xlu1 %2775  ;;  %2869 = vst.msk [vmem:[#allocation5] sm:$0xff] %vm782_vm3, %v2774_v37 }
 0x36d   : > { %2870 = vst.msk [vmem:[#allocation5 + $0x8] sm:$0xff] %vm782_vm3, %v2776_v34 }
 0x3bc   : > { %v5034_v39 = vpop.f32.mrb[0].mxu0 }
 0x3bd   : > { %v2384_v38 = vadd.f32 %v5034_v39, %v7145_v36  ;;  %v2378_v41 = vpop.f32.mrb[1].mxu0 }
 0x3be   : > { %v2379_v40 = vadd.f32 %v7145_v36, %v2378_v41 }
 0x3bf   : > { %v2538_v44 = vmax.f32 %v2384_v38, 0.0 }
 0x3c0   : > { %v2537_v42 = vmax.f32 %v2379_v40, 0.0 }
 0x3c1   : > { %2614 = vst.msk [vmem:[#allocation4 + $0x21] sm:$0xff] %vm337_vm0, %v2538_v44  ;;  %v2197_v44 = vld [vmem:[#allocation3 + $0xf0] sm:$0xff] }
 0x3c2   : > { %2613 = vst.msk [vmem:[#allocation4 + $0x19] sm:$0xff] %vm337_vm0, %v2537_v42  ;;  %5077 = vmatprep.mubr.msk.f32.mxu0 %vm2215_vm11, %v2197_v44 }
 0x3c4   : > { %v5037_v6 = vpop.f32.mrb[2].mxu0 }
 0x3c5   : > { %v2394_v10 = vadd.f32 %v5037_v6, %v7145_v36  ;;  %v2388_v48 = vpop.f32.mrb[3].mxu0 }
 0x3c6   : > { %v2389_v45 = vadd.f32 %v7145_v36, %v2388_v48 }
 0x3c7   : > { %v2540_v53 = vmax.f32 %v2394_v10, 0.0  ;;  %v2198_v10 = vld [vmem:[#allocation3 + $0xf8] sm:$0xff] }
 0x3c8   : > { %v2539_v17 = vmax.f32 %v2389_v45, 0.0  ;;  %v7153_v18 = vld [vmem:[#allocation4 + $0x21] sm:$0xff]  ;;  %5078 = vmatmul.mubr.msk.f32.gmra.mrb[30].mxu0 %vm2215_vm11, %v2198_v10 }
 0x3c9   : > { %2616 = vst.msk [vmem:[#allocation4 + $0x39] sm:$0xff] %vm337_vm0, %v2540_v53  ;;  %2779 = vrot.lane.b32.xlu1 %v7153_v18, %s5546_s28  ;;  %v7158_v49 = vld [vmem:[#allocation4 + $0x19] sm:$0xff] }
 0x3ca   : > { %v7160_v19 = vld [vmem:[#allocation4 + $0x20] sm:$0xff]  ;;  %v7162_v60 = vld [vmem:[#allocation4 + $0x18] sm:$0xff]  ;;  %2615 = vst.msk [vmem:[#allocation4 + $0x31] sm:$0xff] %vm337_vm0, %v2539_v17  ;;  %2777 = vrot.lane.b32.xlu0 %v7158_v49, %s5546_s28 }
 0x3cb   : > { %2680 = vst.msk [vmem:[#allocation5 + $0x18] sm:$0xff] %vm337_vm0, %v7160_v19  ;;  %2679 = vst.msk [vmem:[#allocation5 + $0x10] sm:$0xff] %vm337_vm0, %v7162_v60 }
 0x3cc   : > { %v5040_v24 = vpop.f32.mrb[4].mxu0 }
 0x3cd   : > { %v2404_v25 = vadd.f32 %v5040_v24, %v7145_v36  ;;  %v2398_v54 = vpop.f32.mrb[5].mxu0 }
 0x3ce   : > { %v2399_v27 = vadd.f32 %v7145_v36, %v2398_v54 }
 0x3cf   : > { %v2542_v33 = vmax.f32 %v2404_v25, 0.0 }
 0x3d0   : > { %v2541_v0 = vmax.f32 %v2399_v27, 0.0  ;;  %v7173_v43 = vld [vmem:[#allocation4 + $0x39] sm:$0xff] }
 0x3d1   : > { %2618 = vst.msk [vmem:[#allocation4 + $0x51] sm:$0xff] %vm337_vm0, %v2542_v33  ;;  %2783 = vrot.lane.b32.xlu1 %v7173_v43, %s5546_s28  ;;  %v7178_v46 = vld [vmem:[#allocation4 + $0x31] sm:$0xff] }
 0x3d2   : > { %v7180_v21 = vld [vmem:[#allocation4 + $0x38] sm:$0xff]  ;;  %v7182_v61 = vld [vmem:[#allocation4 + $0x30] sm:$0xff]  ;;  %2617 = vst.msk [vmem:[#allocation4 + $0x49] sm:$0xff] %vm337_vm0, %v2541_v0  ;;  %2781 = vrot.lane.b32.xlu0 %v7178_v46, %s5546_s28 }
 0x3d3   : > { %2682 = vst.msk [vmem:[#allocation5 + $0x28] sm:$0xff] %vm337_vm0, %v7180_v21  ;;  %2681 = vst.msk [vmem:[#allocation5 + $0x20] sm:$0xff] %vm337_vm0, %v7182_v61 }
 0x3d4   : > { %v5043_v20 = vpop.f32.mrb[6].mxu0 }
 0x3d5   : > { %v2414_v3 = vadd.f32 %v5043_v20, %v7145_v36  ;;  %v2408_v47 = vpop.f32.mrb[7].mxu0 }
 0x3d6   : > { %v2409_v51 = vadd.f32 %v7145_v36, %v2408_v47 }
 0x3d7   : > { %v2544_v11 = vmax.f32 %v2414_v3, 0.0 }
 0x3d8   : > { %v2543_v9 = vmax.f32 %v2409_v51, 0.0  ;;  %v7193_v1 = vld [vmem:[#allocation4 + $0x51] sm:$0xff] }
 0x3d9   : > { %2620 = vst.msk [vmem:[#allocation4 + $0x69] sm:$0xff] %vm337_vm0, %v2544_v11  ;;  %2787 = vrot.lane.b32.xlu1 %v7193_v1, %s5546_s28  ;;  %v7198_v5 = vld [vmem:[#allocation4 + $0x49] sm:$0xff] }
 0x3da   : > { %v7200_v52 = vld [vmem:[#allocation4 + $0x50] sm:$0xff]  ;;  %2619 = vst.msk [vmem:[#allocation4 + $0x61] sm:$0xff] %vm337_vm0, %v2543_v9  ;;  %2785 = vrot.lane.b32.xlu0 %v7198_v5, %s5546_s28  ;;  %v7207_v55 = vld [vmem:[#allocation4 + $0x48] sm:$0xff] }
 0x3db   : > { %2684 = vst.msk [vmem:[#allocation5 + $0x38] sm:$0xff] %vm337_vm0, %v7200_v52  ;;  %2683 = vst.msk [vmem:[#allocation5 + $0x30] sm:$0xff] %vm337_vm0, %v7207_v55 }
 0x3dc   : > { %v5046_v58 = vpop.f32.mrb[8].mxu0 }
 0x3dd   : > { %v2424_v59 = vadd.f32 %v5046_v58, %v7145_v36  ;;  %v2418_v4 = vpop.f32.mrb[9].mxu0 }
 0x3de   : > { %v2419_v13 = vadd.f32 %v7145_v36, %v2418_v4 }
 0x3df   : > { %v2546_v14 = vmax.f32 %v2424_v59, 0.0 }
 0x3e0   : > { %v2545_v7 = vmax.f32 %v2419_v13, 0.0  ;;  %v7213_v62 = vld [vmem:[#allocation4 + $0x69] sm:$0xff] }
 0x3e1   : > { %2622 = vst.msk [vmem:[#allocation4 + $0x81] sm:$0xff] %vm337_vm0, %v2546_v14  ;;  %2791 = vrot.lane.b32.xlu1 %v7213_v62, %s5546_s28  ;;  %v7218_v63 = vld [vmem:[#allocation4 + $0x61] sm:$0xff] }
 0x3e2   : > { %v7220_v26 = vld [vmem:[#allocation4 + $0x68] sm:$0xff]  ;;  %2621 = vst.msk [vmem:[#allocation4 + $0x79] sm:$0xff] %vm337_vm0, %v2545_v7  ;;  %2789 = vrot.lane.b32.xlu0 %v7218_v63, %s5546_s28  ;;  %v7227_v2 = vld [vmem:[#allocation4 + $0x60] sm:$0xff] }
 0x3e3   : > { %2686 = vst.msk [vmem:[#allocation5 + $0x48] sm:$0xff] %vm337_vm0, %v7220_v26  ;;  %2685 = vst.msk [vmem:[#allocation5 + $0x40] sm:$0xff] %vm337_vm0, %v7227_v2 }
 0x3e4   : > { %v5049_v12 = vpop.f32.mrb[10].mxu0 }
 0x3e5   : > { %v2434_v32 = vadd.f32 %v5049_v12, %v7145_v36  ;;  %v2428_v8 = vpop.f32.mrb[11].mxu0 }
 0x3e6   : > { %v2429_v50 = vadd.f32 %v7145_v36, %v2428_v8 }
 0x3e7   : > { %v2548_v56 = vmax.f32 %v2434_v32, 0.0 }
 0x3e8   : > { %v2547_v57 = vmax.f32 %v2429_v50, 0.0  ;;  %v7233_v16 = vld [vmem:[#allocation4 + $0x81] sm:$0xff] }
 0x3e9   : > { %2624 = vst.msk [vmem:[#allocation4 + $0x99] sm:$0xff] %vm337_vm0, %v2548_v56  ;;  %2795 = vrot.lane.b32.xlu1 %v7233_v16, %s5546_s28  ;;  %v7238_v15 = vld [vmem:[#allocation4 + $0x79] sm:$0xff] }
 0x3ea   : > { %v7240_v23 = vld [vmem:[#allocation4 + $0x80] sm:$0xff]  ;;  %2623 = vst.msk [vmem:[#allocation4 + $0x91] sm:$0xff] %vm337_vm0, %v2547_v57  ;;  %2793 = vrot.lane.b32.xlu0 %v7238_v15, %s5546_s28  ;;  %v7247_v22 = vld [vmem:[#allocation4 + $0x78] sm:$0xff] }
 0x3eb   : > { %2688 = vst.msk [vmem:[#allocation5 + $0x58] sm:$0xff] %vm337_vm0, %v7240_v23  ;;  %2687 = vst.msk [vmem:[#allocation5 + $0x50] sm:$0xff] %vm337_vm0, %v7247_v22 }
 0x3ec   : > { %v5052_v29 = vpop.f32.mrb[12].mxu0 }
 0x3ed   : > { %v2444_v28 = vadd.f32 %v5052_v29, %v7145_v36  ;;  %v2438_v31 = vpop.f32.mrb[13].mxu0 }
 0x3ee   : > { %v2439_v30 = vadd.f32 %v7145_v36, %v2438_v31 }
 0x3ef   : > { %v2550_v35 = vmax.f32 %v2444_v28, 0.0 }
 0x3f0   : > { %v2549_v34 = vmax.f32 %v2439_v30, 0.0  ;;  %v2722_v37 = vld [vmem:[#allocation4 + $0x99] sm:$0xff] }
 0x3f1   : > { %2626 = vst.msk [vmem:[#allocation4 + $0xb1] sm:$0xff] %vm337_vm0, %v2550_v35  ;;  %2799 = vrot.lane.b32.xlu1 %v2722_v37, %s5546_s28  ;;  %v2721_v39 = vld [vmem:[#allocation4 + $0x91] sm:$0xff] }
 0x3f2   : > { %v7255_v38 = vld [vmem:[#allocation4 + $0x98] sm:$0xff]  ;;  %2625 = vst.msk [vmem:[#allocation4 + $0xa9] sm:$0xff] %vm337_vm0, %v2549_v34  ;;  %2797 = vrot.lane.b32.xlu0 %v2721_v39, %s5546_s28  ;;  %v7261_v41 = vld [vmem:[#allocation4 + $0x90] sm:$0xff] }
 0x3f3   : > { %2690 = vst.msk [vmem:[#allocation5 + $0x68] sm:$0xff] %vm337_vm0, %v7255_v38  ;;  %2689 = vst.msk [vmem:[#allocation5 + $0x60] sm:$0xff] %vm337_vm0, %v7261_v41 }
 0x3f4   : > { %v5055_v40 = vpop.f32.mrb[14].mxu0 }
 0x3f5   : > { %v2454_v42 = vadd.f32 %v5055_v40, %v7145_v36  ;;  %v2448_v6 = vpop.f32.mrb[15].mxu0 }
 0x3f6   : > { %v2449_v48 = vadd.f32 %v7145_v36, %v2448_v6 }
 0x3f7   : > { %v2552_v45 = vmax.f32 %v2454_v42, 0.0 }
 0x3f8   : > { %v2551_v53 = vmax.f32 %v2449_v48, 0.0  ;;  %v2724_v17 = vld [vmem:[#allocation4 + $0xb1] sm:$0xff] }
 0x3f9   : > { %2628 = vst.msk [vmem:[#allocation4 + $0xc9] sm:$0xff] %vm337_vm0, %v2552_v45  ;;  %2803 = vrot.lane.b32.xlu1 %v2724_v17, %s5546_s28  ;;  %v2723_v24 = vld [vmem:[#allocation4 + $0xa9] sm:$0xff] }
 0x3fa   : > { %v7271_v25 = vld [vmem:[#allocation4 + $0xb0] sm:$0xff]  ;;  %2627 = vst.msk [vmem:[#allocation4 + $0xc1] sm:$0xff] %vm337_vm0, %v2551_v53  ;;  %2801 = vrot.lane.b32.xlu0 %v2723_v24, %s5546_s28  ;;  %v7277_v54 = vld [vmem:[#allocation4 + $0xa8] sm:$0xff] }
 0x3fb   : > { %2692 = vst.msk [vmem:[#allocation5 + $0x78] sm:$0xff] %vm337_vm0, %v7271_v25  ;;  %2691 = vst.msk [vmem:[#allocation5 + $0x70] sm:$0xff] %vm337_vm0, %v7277_v54 }
 0x3fc   : > { %v5058_v27 = vpop.f32.mrb[16].mxu0 }
 0x3fd   : > { %v2464_v33 = vadd.f32 %v5058_v27, %v7145_v36  ;;  %v2458_v0 = vpop.f32.mrb[17].mxu0 }
 0x3fe   : > { %v2459_v20 = vadd.f32 %v7145_v36, %v2458_v0 }
 0x3ff   : > { %v2554_v3 = vmax.f32 %v2464_v33, 0.0 }
 0x400   : > { %v2553_v47 = vmax.f32 %v2459_v20, 0.0  ;;  %v2726_v51 = vld [vmem:[#allocation4 + $0xc9] sm:$0xff] }
 0x401   : > { %2630 = vst.msk [vmem:[#allocation4 + $0xe1] sm:$0xff] %vm337_vm0, %v2554_v3  ;;  %2807 = vrot.lane.b32.xlu1 %v2726_v51, %s5546_s28  ;;  %v2725_v11 = vld [vmem:[#allocation4 + $0xc1] sm:$0xff] }
 0x402   : > { %v7285_v9 = vld [vmem:[#allocation4 + $0xc8] sm:$0xff]  ;;  %2629 = vst.msk [vmem:[#allocation4 + $0xd9] sm:$0xff] %vm337_vm0, %v2553_v47  ;;  %2805 = vrot.lane.b32.xlu0 %v2725_v11, %s5546_s28  ;;  %v7291_v58 = vld [vmem:[#allocation4 + $0xc0] sm:$0xff] }
 0x403   : > { %2694 = vst.msk [vmem:[#allocation5 + $0x88] sm:$0xff] %vm337_vm0, %v7285_v9  ;;  %2693 = vst.msk [vmem:[#allocation5 + $0x80] sm:$0xff] %vm337_vm0, %v7291_v58 }
 0x404   : > { %v5061_v59 = vpop.f32.mrb[18].mxu0 }
 0x405   : > { %v2474_v4 = vadd.f32 %v5061_v59, %v7145_v36  ;;  %v2468_v13 = vpop.f32.mrb[19].mxu0 }
 0x406   : > { %v2469_v14 = vadd.f32 %v7145_v36, %v2468_v13 }
 0x407   : > { %v2556_v7 = vmax.f32 %v2474_v4, 0.0 }
 0x408   : > { %v2555_v12 = vmax.f32 %v2469_v14, 0.0  ;;  %v2728_v32 = vld [vmem:[#allocation4 + $0xe1] sm:$0xff] }
 0x409   : > { %2632 = vst.msk [vmem:[#allocation4 + $0xf9] sm:$0xff] %vm337_vm0, %v2556_v7  ;;  %2811 = vrot.lane.b32.xlu1 %v2728_v32, %s5546_s28  ;;  %v2727_v8 = vld [vmem:[#allocation4 + $0xd9] sm:$0xff] }
 0x40a   : > { %v7299_v50 = vld [vmem:[#allocation4 + $0xe0] sm:$0xff]  ;;  %2631 = vst.msk [vmem:[#allocation4 + $0xf1] sm:$0xff] %vm337_vm0, %v2555_v12  ;;  %2809 = vrot.lane.b32.xlu0 %v2727_v8, %s5546_s28  ;;  %v7305_v56 = vld [vmem:[#allocation4 + $0xd8] sm:$0xff] }
 0x40b   : > { %2696 = vst.msk [vmem:[#allocation5 + $0x98] sm:$0xff] %vm337_vm0, %v7299_v50  ;;  %2695 = vst.msk [vmem:[#allocation5 + $0x90] sm:$0xff] %vm337_vm0, %v7305_v56 }
 0x40c   : > { %v5064_v57 = vpop.f32.mrb[20].mxu0 }
 0x40d   : > { %v2484_v29 = vadd.f32 %v5064_v57, %v7145_v36  ;;  %v2478_v28 = vpop.f32.mrb[21].mxu0 }
 0x40e   : > { %v2479_v31 = vadd.f32 %v7145_v36, %v2478_v28 }
 0x40f   : > { %v2558_v30 = vmax.f32 %v2484_v29, 0.0 }
 0x410   : > { %v2557_v35 = vmax.f32 %v2479_v31, 0.0  ;;  %v2730_v34 = vld [vmem:[#allocation4 + $0xf9] sm:$0xff] }
 0x411   : > { %2634 = vst.msk [vmem:[#allocation4 + $0x111] sm:$0xff] %vm337_vm0, %v2558_v30  ;;  %2815 = vrot.lane.b32.xlu1 %v2730_v34, %s5546_s28  ;;  %v2729_v37 = vld [vmem:[#allocation4 + $0xf1] sm:$0xff] }
 0x412   : > { %v7313_v39 = vld [vmem:[#allocation4 + $0xf8] sm:$0xff]  ;;  %2633 = vst.msk [vmem:[#allocation4 + $0x109] sm:$0xff] %vm337_vm0, %v2557_v35  ;;  %2813 = vrot.lane.b32.xlu0 %v2729_v37, %s5546_s28  ;;  %v7319_v40 = vld [vmem:[#allocation4 + $0xf0] sm:$0xff] }
 0x413   : > { %2698 = vst.msk [vmem:[#allocation5 + $0xa8] sm:$0xff] %vm337_vm0, %v7313_v39  ;;  %2697 = vst.msk [vmem:[#allocation5 + $0xa0] sm:$0xff] %vm337_vm0, %v7319_v40 }
 0x414   : > { %v5067_v44 = vpop.f32.mrb[22].mxu0 }
 0x415   : > { %v2494_v42 = vadd.f32 %v5067_v44, %v7145_v36  ;;  %v2488_v6 = vpop.f32.mrb[23].mxu0 }
 0x416   : > { %v2489_v10 = vadd.f32 %v7145_v36, %v2488_v6 }
 0x417   : > { %v2560_v48 = vmax.f32 %v2494_v42, 0.0 }
 0x418   : > { %v2559_v45 = vmax.f32 %v2489_v10, 0.0  ;;  %v2732_v53 = vld [vmem:[#allocation4 + $0x111] sm:$0xff] }
 0x419   : > { %2636 = vst.msk [vmem:[#allocation4 + $0x129] sm:$0xff] %vm337_vm0, %v2560_v48  ;;  %2819 = vrot.lane.b32.xlu1 %v2732_v53, %s5546_s28  ;;  %v2731_v17 = vld [vmem:[#allocation4 + $0x109] sm:$0xff] }
 0x41a   : > { %v7327_v24 = vld [vmem:[#allocation4 + $0x110] sm:$0xff]  ;;  %2635 = vst.msk [vmem:[#allocation4 + $0x121] sm:$0xff] %vm337_vm0, %v2559_v45  ;;  %2817 = vrot.lane.b32.xlu0 %v2731_v17, %s5546_s28  ;;  %v7333_v27 = vld [vmem:[#allocation4 + $0x108] sm:$0xff] }
 0x41b   : > { %2700 = vst.msk [vmem:[#allocation5 + $0xb8] sm:$0xff] %vm337_vm0, %v7327_v24  ;;  %2699 = vst.msk [vmem:[#allocation5 + $0xb0] sm:$0xff] %vm337_vm0, %v7333_v27 }
 0x41c   : > { %v5070_v33 = vpop.f32.mrb[24].mxu0 }
 0x41d   : > { %v2504_v0 = vadd.f32 %v5070_v33, %v7145_v36  ;;  %v2498_v20 = vpop.f32.mrb[25].mxu0 }
 0x41e   : > { %v2499_v3 = vadd.f32 %v7145_v36, %v2498_v20  ;;  %v2902_v20 = vld [vmem:[#allocation4 + $0xa] sm:$0xff] }
 0x41f   : > { %v2562_v47 = vmax.f32 %v2504_v0, 0.0 }
 0x420   : > { %v2561_v51 = vmax.f32 %v2499_v3, 0.0  ;;  %v2734_v11 = vld [vmem:[#allocation4 + $0x129] sm:$0xff] }
 0x421   : > { %2638 = vst.msk [vmem:[#allocation4 + $0x141] sm:$0xff] %vm337_vm0, %v2562_v47  ;;  %2823 = vrot.lane.b32.xlu1 %v2734_v11, %s5546_s28  ;;  %v2733_v59 = vld [vmem:[#allocation4 + $0x121] sm:$0xff] }
 0x422   : > { %v2670_v4 = vld [vmem:[#allocation4 + $0x128] sm:$0xff]  ;;  %2637 = vst.msk [vmem:[#allocation4 + $0x139] sm:$0xff] %vm337_vm0, %v2561_v51  ;;  %2821 = vrot.lane.b32.xlu0 %v2733_v59, %s5546_s28  ;;  %v7344_v13 = vld [vmem:[#allocation4 + $0x120] sm:$0xff] }
 0x423   : > { %2702 = vst.msk [vmem:[#allocation5 + $0xc8] sm:$0xff] %vm337_vm0, %v2670_v4  ;;  %2701 = vst.msk [vmem:[#allocation5 + $0xc0] sm:$0xff] %vm337_vm0, %v7344_v13  ;;  %v2901_v51 = vld [vmem:[#allocation4 + $0x2] sm:$0xff]  ;;  %v7376_v4 = vld [vmem:[#allocation4 + $0x1a] sm:$0xff] }
 0x424   : > { %v5073_v14 = vpop.f32.mrb[26].mxu0  ;;  %v7372_v59 = vld [vmem:[#allocation4 + $0x22] sm:$0xff] }
 0x425   : > { %v2514_v7 = vadd.f32 %v5073_v14, %v7145_v36  ;;  %v2508_v12 = vpop.f32.mrb[27].mxu0 }
 0x426   : > { %v2509_v32 = vadd.f32 %v7145_v36, %v2508_v12  ;;  %v7381_v12 = vld [vmem:[#allocation4 + $0x3a] sm:$0xff] }
 0x427   : > { %v2564_v8 = vmax.f32 %v2514_v7, 0.0 }
 0x428   : > { %v2563_v57 = vmax.f32 %v2509_v32, 0.0  ;;  %v2736_v29 = vld [vmem:[#allocation4 + $0x141] sm:$0xff]  ;;  %v7386_v32 = vld [vmem:[#allocation4 + $0x32] sm:$0xff] }
 0x429   : > { %2640 = vst.msk [vmem:[#allocation4 + $0x159] sm:$0xff] %vm337_vm0, %v2564_v8  ;;  %2827 = vrot.lane.b32.xlu1 %v2736_v29, %s5546_s28  ;;  %v2735_v28 = vld [vmem:[#allocation4 + $0x139] sm:$0xff] }
 0x42a   : > { %v2672_v31 = vld [vmem:[#allocation4 + $0x140] sm:$0xff]  ;;  %2639 = vst.msk [vmem:[#allocation4 + $0x151] sm:$0xff] %vm337_vm0, %v2563_v57  ;;  %2825 = vrot.lane.b32.xlu0 %v2735_v28, %s5546_s28  ;;  %v2671_v30 = vld [vmem:[#allocation4 + $0x138] sm:$0xff]  ;;  %v7394_v57 = vld [vmem:[#allocation4 + $0x4a] sm:$0xff] }
 0x42b   : > { %2704 = vst.msk [vmem:[#allocation5 + $0xd8] sm:$0xff] %vm337_vm0, %v2672_v31  ;;  %2703 = vst.msk [vmem:[#allocation5 + $0xd0] sm:$0xff] %vm337_vm0, %v2671_v30  ;;  %v7390_v8 = vld [vmem:[#allocation4 + $0x52] sm:$0xff]  ;;  %v7399_v31 = vld [vmem:[#allocation4 + $0x6a] sm:$0xff] }
 0x42c   : > { %v5076_v35 = vpop.f32.mrb[28].mxu0  ;;  %v7404_v30 = vld [vmem:[#allocation4 + $0x62] sm:$0xff] }
 0x42d   : > { %v2524_v34 = vadd.f32 %v5076_v35, %v7145_v36  ;;  %v2518_v37 = vpop.f32.mrb[29].mxu0  ;;  %v7408_v35 = vld [vmem:[#allocation4 + $0x82] sm:$0xff] }
 0x42e   : > { %v2519_v44 = vadd.f32 %v7145_v36, %v2518_v37 }
 0x42f   : > { %v2566_v42 = vmax.f32 %v2524_v34, 0.0  ;;  %v7412_v34 = vld [vmem:[#allocation4 + $0x7a] sm:$0xff] }
 0x430   : > { %v2565_v6 = vmax.f32 %v2519_v44, 0.0  ;;  %v2738_v10 = vld [vmem:[#allocation4 + $0x159] sm:$0xff] }
 0x431   : > { %2642 = vst.msk [vmem:[#allocation4 + $0x171] sm:$0xff] %vm337_vm0, %v2566_v42  ;;  %2831 = vrot.lane.b32.xlu1 %v2738_v10, %s5546_s28  ;;  %v2737_v48 = vld [vmem:[#allocation4 + $0x151] sm:$0xff]  ;;  %v7417_v42 = vld [vmem:[#allocation4 + $0x9a] sm:$0xff] }
 0x432   : > { %v2674_v45 = vld [vmem:[#allocation4 + $0x158] sm:$0xff]  ;;  %2641 = vst.msk [vmem:[#allocation4 + $0x169] sm:$0xff] %vm337_vm0, %v2565_v6  ;;  %2829 = vrot.lane.b32.xlu0 %v2737_v48, %s5546_s28  ;;  %v2673_v53 = vld [vmem:[#allocation4 + $0x150] sm:$0xff] }
 0x433   : > { %2706 = vst.msk [vmem:[#allocation5 + $0xe8] sm:$0xff] %vm337_vm0, %v2674_v45  ;;  %2705 = vst.msk [vmem:[#allocation5 + $0xe0] sm:$0xff] %vm337_vm0, %v2673_v53  ;;  %v7422_v6 = vld [vmem:[#allocation4 + $0x92] sm:$0xff]  ;;  %v7430_v48 = vld [vmem:[#allocation4 + $0xaa] sm:$0xff] }
 0x434   : > { %v7426_v10 = vld [vmem:[#allocation4 + $0xb2] sm:$0xff] }
 0x438   : > { %v2740_v17 = vld [vmem:[#allocation4 + $0x171] sm:$0xff] }
 0x439   : > { %2835 = vrot.lane.b32.xlu1 %v2740_v17, %s5546_s28  ;;  %v2739_v33 = vld [vmem:[#allocation4 + $0x169] sm:$0xff] }
 0x43a   : > { %v2676_v0 = vld [vmem:[#allocation4 + $0x170] sm:$0xff]  ;;  %2833 = vrot.lane.b32.xlu0 %v2739_v33, %s5546_s28  ;;  %v2675_v3 = vld [vmem:[#allocation4 + $0x168] sm:$0xff] }
 0x43b   : > { %2708 = vst.msk [vmem:[#allocation5 + $0xf8] sm:$0xff] %vm337_vm0, %v2676_v0  ;;  %v2780_v47 = vpop.permute.xlu1 %2779  ;;  %2707 = vst.msk [vmem:[#allocation5 + $0xf0] sm:$0xff] %vm337_vm0, %v2675_v3  ;;  %v7435_v17 = vld [vmem:[#allocation4 + $0xca] sm:$0xff]  ;;  %v7440_v33 = vld [vmem:[#allocation4 + $0xc2] sm:$0xff] }
 0x43c   : > { %2872 = vst.msk [vmem:[#allocation5 + $0x18] sm:$0xff] %vm782_vm3, %v2780_v47  ;;  %v2778_v11 = vpop.permute.xlu0 %2777  ;;  %v7444_v0 = vld [vmem:[#allocation4 + $0xe2] sm:$0xff] }
 0x43d   : > { %2871 = vst.msk [vmem:[#allocation5 + $0x10] sm:$0xff] %vm782_vm3, %v2778_v11  ;;  %2967 = vrot.lane.b32.xlu1 %v2902_v20, %s5547_s16  ;;  %v7448_v20 = vld [vmem:[#allocation4 + $0xda] sm:$0xff]  ;;  %v2921_v11 = vld [vmem:[#allocation4 + $0xf2] sm:$0xff] }
 0x43e   : > { %2965 = vrot.lane.b32.xlu0 %v2901_v51, %s5547_s16  ;;  %v2922_v51 = vld [vmem:[#allocation4 + $0xfa] sm:$0xff] }
 0x441   : > { %2971 = vrot.lane.b32.xlu1 %v7372_v59, %s5547_s16 }
 0x442   : > { %2969 = vrot.lane.b32.xlu0 %v7376_v4, %s5547_s16 }
 0x443   : > { %v2784_v14 = vpop.permute.xlu1 %2783 }
 0x444   : > { %2874 = vst.msk [vmem:[#allocation5 + $0x28] sm:$0xff] %vm782_vm3, %v2784_v14  ;;  %v2782_v7 = vpop.permute.xlu0 %2781  ;;  %v2924_v14 = vld [vmem:[#allocation4 + $0x112] sm:$0xff] }
 0x445   : > { %2873 = vst.msk [vmem:[#allocation5 + $0x20] sm:$0xff] %vm782_vm3, %v2782_v7  ;;  %2975 = vrot.lane.b32.xlu1 %v7381_v12, %s5547_s16  ;;  %v2923_v7 = vld [vmem:[#allocation4 + $0x10a] sm:$0xff] }
 0x446   : > { %2973 = vrot.lane.b32.xlu0 %v7386_v32, %s5547_s16 }
 0x449   : > { %2979 = vrot.lane.b32.xlu1 %v7390_v8, %s5547_s16 }
 0x44a   : > { %2977 = vrot.lane.b32.xlu0 %v7394_v57, %s5547_s16 }
 0x44b   : > { %v2788_v29 = vpop.permute.xlu1 %2787 }
 0x44c   : > { %2876 = vst.msk [vmem:[#allocation5 + $0x38] sm:$0xff] %vm782_vm3, %v2788_v29  ;;  %v2786_v28 = vpop.permute.xlu0 %2785 }
 0x44d   : > { %2875 = vst.msk [vmem:[#allocation5 + $0x30] sm:$0xff] %vm782_vm3, %v2786_v28  ;;  %2983 = vrot.lane.b32.xlu1 %v7399_v31, %s5547_s16 }
 0x44e   : > { %2981 = vrot.lane.b32.xlu0 %v7404_v30, %s5547_s16 }
 0x451   : > { %2987 = vrot.lane.b32.xlu1 %v7408_v35, %s5547_s16 }
 0x452   : > { %2985 = vrot.lane.b32.xlu0 %v7412_v34, %s5547_s16 }
 0x453   : > { %v2792_v37 = vpop.permute.xlu1 %2791 }
 0x454   : > { %2878 = vst.msk [vmem:[#allocation5 + $0x48] sm:$0xff] %vm782_vm3, %v2792_v37  ;;  %v2790_v44 = vpop.permute.xlu0 %2789  ;;  %v2926_v37 = vld [vmem:[#allocation4 + $0x12a] sm:$0xff] }
 0x455   : > { %2877 = vst.msk [vmem:[#allocation5 + $0x40] sm:$0xff] %vm782_vm3, %v2790_v44  ;;  %2991 = vrot.lane.b32.xlu1 %v7417_v42, %s5547_s16  ;;  %v2925_v44 = vld [vmem:[#allocation4 + $0x122] sm:$0xff] }
 0x456   : > { %2989 = vrot.lane.b32.xlu0 %v7422_v6, %s5547_s16 }
 0x459   : > { %2995 = vrot.lane.b32.xlu1 %v7426_v10, %s5547_s16 }
 0x45a   : > { %2993 = vrot.lane.b32.xlu0 %v7430_v48, %s5547_s16 }
 0x45b   : > { %v2796_v45 = vpop.permute.xlu1 %2795 }
 0x45c   : > { %2880 = vst.msk [vmem:[#allocation5 + $0x58] sm:$0xff] %vm782_vm3, %v2796_v45  ;;  %v2794_v53 = vpop.permute.xlu0 %2793  ;;  %v2928_v45 = vld [vmem:[#allocation4 + $0x142] sm:$0xff] }
 0x45d   : > { %2879 = vst.msk [vmem:[#allocation5 + $0x50] sm:$0xff] %vm782_vm3, %v2794_v53  ;;  %2999 = vrot.lane.b32.xlu1 %v7435_v17, %s5547_s16  ;;  %v2927_v53 = vld [vmem:[#allocation4 + $0x13a] sm:$0xff] }
 0x45e   : > { %2997 = vrot.lane.b32.xlu0 %v7440_v33, %s5547_s16 }
 0x461   : > { %3003 = vrot.lane.b32.xlu1 %v7444_v0, %s5547_s16 }
 0x462   : > { %3001 = vrot.lane.b32.xlu0 %v7448_v20, %s5547_s16 }
 0x463   : > { %v2800_v3 = vpop.permute.xlu1 %2799 }
 0x464   : > { %2882 = vst.msk [vmem:[#allocation5 + $0x68] sm:$0xff] %vm782_vm3, %v2800_v3  ;;  %v2798_v47 = vpop.permute.xlu0 %2797 }
 0x465   : > { %2881 = vst.msk [vmem:[#allocation5 + $0x60] sm:$0xff] %vm782_vm3, %v2798_v47  ;;  %3007 = vrot.lane.b32.xlu1 %v2922_v51, %s5547_s16  ;;  %v2930_v51 = vld [vmem:[#allocation4 + $0x15a] sm:$0xff] }
 0x466   : > { %3005 = vrot.lane.b32.xlu0 %v2921_v11, %s5547_s16  ;;  %v2929_v11 = vld [vmem:[#allocation4 + $0x152] sm:$0xff] }
 0x469   : > { %3011 = vrot.lane.b32.xlu1 %v2924_v14, %s5547_s16  ;;  %v2932_v14 = vld [vmem:[#allocation4 + $0x172] sm:$0xff] }
 0x46a   : > { %3009 = vrot.lane.b32.xlu0 %v2923_v7, %s5547_s16  ;;  %v2931_v7 = vld [vmem:[#allocation4 + $0x16a] sm:$0xff] }
 0x46b   : > { %v2804_v29 = vpop.permute.xlu1 %2803 }
 0x46c   : > { %2884 = vst.msk [vmem:[#allocation5 + $0x78] sm:$0xff] %vm782_vm3, %v2804_v29  ;;  %v2802_v28 = vpop.permute.xlu0 %2801 }
 0x46d   : > { %2883 = vst.msk [vmem:[#allocation5 + $0x70] sm:$0xff] %vm782_vm3, %v2802_v28  ;;  %3015 = vrot.lane.b32.xlu1 %v2926_v37, %s5547_s16 }
 0x46e   : > { %3013 = vrot.lane.b32.xlu0 %v2925_v44, %s5547_s16 }
 0x471   : > { %3019 = vrot.lane.b32.xlu1 %v2928_v45, %s5547_s16 }
 0x472   : > { %3017 = vrot.lane.b32.xlu0 %v2927_v53, %s5547_s16 }
 0x473   : > { %v2808_v3 = vpop.permute.xlu1 %2807 }
 0x474   : > { %2886 = vst.msk [vmem:[#allocation5 + $0x88] sm:$0xff] %vm782_vm3, %v2808_v3  ;;  %v2806_v47 = vpop.permute.xlu0 %2805 }
 0x475   : > { %2885 = vst.msk [vmem:[#allocation5 + $0x80] sm:$0xff] %vm782_vm3, %v2806_v47  ;;  %3023 = vrot.lane.b32.xlu1 %v2930_v51, %s5547_s16  ;;  %v4278_v51 = vld [vmem:[#allocation15] sm:$0xff] }
 0x476   : > { %3021 = vrot.lane.b32.xlu0 %v2929_v11, %s5547_s16  ;;  %v4279_v11 = vld [vmem:[#allocation15 + $0x8] sm:$0xff] }
 0x479   : > { %3027 = vrot.lane.b32.xlu1 %v2932_v14, %s5547_s16  ;;  %v5162_v14 = vpack.c.bf16 %v4279_v11, %v4278_v51 }
 0x47a   : > { %3025 = vrot.lane.b32.xlu0 %v2931_v7, %s5547_s16  ;;  %s8132_s16 = scalar_lea.hbm %s8189_s6, %s4931_s11 }
 0x47b   : > { %v2812_v29 = vpop.permute.xlu1 %2811  ;;  %5163 = vmatprep.subr.bf16.mxu1 %v5162_v14 }
 0x47c   : > { %2888 = vst.msk [vmem:[#allocation5 + $0x98] sm:$0xff] %vm782_vm3, %v2812_v29  ;;  %v2810_v28 = vpop.permute.xlu0 %2809  ;;  %5165 = vmatpush3.bf16.msra.mxu1 %v5162_v14 }
 0x47d   : > { %2887 = vst.msk [vmem:[#allocation5 + $0x90] sm:$0xff] %vm782_vm3, %v2810_v28  ;;  %3159 = vrot.lane.b32.xlu1 %v7160_v19, %s5548_s17  ;;  %v4280_v28 = vld [vmem:[#allocation15 + $0x10] sm:$0xff] }
 0x47e   : > { %3157 = vrot.lane.b32.xlu0 %v7162_v60, %s5548_s17 }
 0x481   : > { %3163 = vrot.lane.b32.xlu1 %v7180_v21, %s5548_s17 }
 0x482   : > { %3161 = vrot.lane.b32.xlu0 %v7182_v61, %s5548_s17 }
 0x483   : > { %v2816_v37 = vpop.permute.xlu1 %2815 }
 0x484   : > { %2890 = vst.msk [vmem:[#allocation5 + $0xa8] sm:$0xff] %vm782_vm3, %v2816_v37  ;;  %v2814_v44 = vpop.permute.xlu0 %2813  ;;  %v4281_v37 = vld [vmem:[#allocation15 + $0x18] sm:$0xff] }
 0x485   : > { %2889 = vst.msk [vmem:[#allocation5 + $0xa0] sm:$0xff] %vm782_vm3, %v2814_v44  ;;  %3167 = vrot.lane.b32.xlu1 %v7200_v52, %s5548_s17  ;;  %v5166_v44 = vpack.c.bf16 %v4281_v37, %v4280_v28 }
 0x486   : > { %3165 = vrot.lane.b32.xlu0 %v7207_v55, %s5548_s17 }
 0x487   : > { %5167 = vmatprep.subr.bf16.mxu1 %v5166_v44 }
 0x488   : > { %5169 = vmatpush3.bf16.msra.mxu1 %v5166_v44 }
 0x489   : > { %3171 = vrot.lane.b32.xlu1 %v7220_v26, %s5548_s17 }
 0x48a   : > { %3169 = vrot.lane.b32.xlu0 %v7227_v2, %s5548_s17 }
 0x48b   : > { %v2820_v19 = vpop.permute.xlu1 %2819 }
 0x48c   : > { %2892 = vst.msk [vmem:[#allocation5 + $0xb8] sm:$0xff] %vm782_vm3, %v2820_v19  ;;  %v2818_v60 = vpop.permute.xlu0 %2817  ;;  %v4283_v19 = vld [vmem:[#allocation15 + $0x28] sm:$0xff] }
 0x48d   : > { %2891 = vst.msk [vmem:[#allocation5 + $0xb0] sm:$0xff] %vm782_vm3, %v2818_v60  ;;  %3175 = vrot.lane.b32.xlu1 %v7240_v23, %s5548_s17 }
 0x48e   : > { %3173 = vrot.lane.b32.xlu0 %v7247_v22, %s5548_s17 }
 0x491   : > { %3179 = vrot.lane.b32.xlu1 %v7255_v38, %s5548_s17 }
 0x492   : > { %3177 = vrot.lane.b32.xlu0 %v7261_v41, %s5548_s17 }
 0x493   : > { %v2824_v45 = vpop.permute.xlu1 %2823 }
 0x494   : > { %2894 = vst.msk [vmem:[#allocation5 + $0xc8] sm:$0xff] %vm782_vm3, %v2824_v45  ;;  %v2822_v53 = vpop.permute.xlu0 %2821 }
 0x495   : > { %2893 = vst.msk [vmem:[#allocation5 + $0xc0] sm:$0xff] %vm782_vm3, %v2822_v53  ;;  %3183 = vrot.lane.b32.xlu1 %v7271_v25, %s5548_s17  ;;  %v4284_v53 = vld [vmem:[#allocation15 + $0x30] sm:$0xff] }
 0x496   : > { %3181 = vrot.lane.b32.xlu0 %v7277_v54, %s5548_s17 }
 0x499   : > { %3187 = vrot.lane.b32.xlu1 %v7285_v9, %s5548_s17 }
 0x49a   : > { %3185 = vrot.lane.b32.xlu0 %v7291_v58, %s5548_s17 }
 0x49b   : > { %v2828_v3 = vpop.permute.xlu1 %2827 }
 0x49c   : > { %2896 = vst.msk [vmem:[#allocation5 + $0xd8] sm:$0xff] %vm782_vm3, %v2828_v3  ;;  %v2826_v47 = vpop.permute.xlu0 %2825  ;;  %v4285_v3 = vld [vmem:[#allocation15 + $0x38] sm:$0xff] }
 0x49d   : > { %2895 = vst.msk [vmem:[#allocation5 + $0xd0] sm:$0xff] %vm782_vm3, %v2826_v47  ;;  %3191 = vrot.lane.b32.xlu1 %v7299_v50, %s5548_s17  ;;  %v4286_v47 = vld [vmem:[#allocation15 + $0x40] sm:$0xff] }
 0x49e   : > { %3189 = vrot.lane.b32.xlu0 %v7305_v56, %s5548_s17 }
 0x4a1   : > { %3349 = vrot.lane.b32.xlu1 %v7158_v49, %s5549_s20  ;;  %v4282_v49 = vld [vmem:[#allocation15 + $0x20] sm:$0xff] }
 0x4a2   : > { %3193 = vrot.lane.b32.xlu0 %v7319_v40, %s5548_s17  ;;  %v5170_v60 = vpack.c.bf16 %v4283_v19, %v4282_v49 }
 0x4a3   : > { %v2832_v7 = vpop.permute.xlu1 %2831 }
 0x4a4   : > { %2898 = vst.msk [vmem:[#allocation5 + $0xe8] sm:$0xff] %vm782_vm3, %v2832_v7  ;;  %v2830_v29 = vpop.permute.xlu0 %2829  ;;  %5171 = vmatprep.subr.bf16.mxu1 %v5170_v60 }
 0x4a5   : > { %2897 = vst.msk [vmem:[#allocation5 + $0xe0] sm:$0xff] %vm782_vm3, %v2830_v29  ;;  %3541 = vrot.lane.b32.xlu1 %v7376_v4, %s5550_s13  ;;  %5173 = vmatpush3.bf16.msra.mxu1 %v5170_v60 }
 0x4a6   : > { %3351 = vrot.lane.b32.xlu0 %v7153_v18, %s5549_s20  ;;  %v5174_v18 = vpack.c.bf16 %v4285_v3, %v4284_v53 }
 0x4a8   : > { %5175 = vmatprep.subr.bf16.mxu1 %v5174_v18 }
 0x4a9   : > { %3734 = vrot.lane.b32.xlu1 %v7182_v61, %s5551_s9  ;;  %5177 = vmatpush3.bf16.msra.mxu1 %v5174_v18 }
 0x4aa   : > { %3543 = vrot.lane.b32.xlu0 %v7372_v59, %s5550_s13  ;;  %5096 = vmatprep.subr.mxu1 %v4286_v47 }
 0x4ab   : > { %v2836_v45 = vpop.permute.xlu1 %2835 }
 0x4ac   : > { %2900 = vst.msk [vmem:[#allocation5 + $0xf8] sm:$0xff] %vm782_vm3, %v2836_v45  ;;  %v2834_v4 = vpop.permute.xlu0 %2833 }
 0x4ad   : > { %2899 = vst.msk [vmem:[#allocation5 + $0xf0] sm:$0xff] %vm782_vm3, %v2834_v4  ;;  %3926 = vrot.lane.b32.xlu1 %v7178_v46, %s5552_s14  ;;  %5097 = vmatpush3.msra.mxu1 %v4286_v47 }
 0x4ae   : > { %3736 = vrot.lane.b32.xlu0 %v7180_v21, %s5551_s9 }
 0x4af   : > { %v2968_v61 = vpop.permute.xlu1 %2967 }
 0x4b0   : > { %3062 = vst.msk [vmem:[#allocation5 + $0x8] sm:$0xff] %vm975_vm4, %v2968_v61  ;;  %v2966_v59 = vpop.permute.xlu0 %2965 }
 0x4b1   : > { %3061 = vst.msk [vmem:[#allocation5] sm:$0xff] %vm975_vm4, %v2966_v59  ;;  %3928 = vrot.lane.b32.xlu1 %v7173_v43, %s5552_s14 }
 0x4b2   : > { %3353 = vrot.lane.b32.xlu0 %v7178_v46, %s5549_s20 }
 0x4b3   : > { %v2972_v51 = vpop.permute.xlu1 %2971 }
 0x4b4   : > { %3064 = vst.msk [vmem:[#allocation5 + $0x18] sm:$0xff] %vm975_vm4, %v2972_v51  ;;  %v2970_v21 = vpop.permute.xlu0 %2969 }
 0x4b5   : > { %3063 = vst.msk [vmem:[#allocation5 + $0x10] sm:$0xff] %vm975_vm4, %v2970_v21  ;;  %3355 = vrot.lane.b32.xlu1 %v7173_v43, %s5549_s20 }
 0x4b6   : > { %4118 = vrot.lane.b32.xlu0 %v7386_v32, %s5553_s29 }
 0x4b7   : > { %v2976_v11 = vpop.permute.xlu1 %2975 }
 0x4b8   : > { %3066 = vst.msk [vmem:[#allocation5 + $0x28] sm:$0xff] %vm975_vm4, %v2976_v11  ;;  %v2974_v14 = vpop.permute.xlu0 %2973 }
 0x4b9   : > { %3065 = vst.msk [vmem:[#allocation5 + $0x20] sm:$0xff] %vm975_vm4, %v2974_v14  ;;  %4120 = vrot.lane.b32.xlu1 %v7381_v12, %s5553_s29  ;;  %v3870_v14 = vld [vmem:[#allocation4 + $0x91] sm:$0xff] }
 0x4ba   : > { %3545 = vrot.lane.b32.xlu0 %v7386_v32, %s5550_s13 }
 0x4bb   : > { %v2980_v46 = vpop.permute.xlu1 %2979 }
 0x4bc   : > { %3068 = vst.msk [vmem:[#allocation5 + $0x38] sm:$0xff] %vm975_vm4, %v2980_v46  ;;  %v2978_v7 = vpop.permute.xlu0 %2977 }
 0x4bd   : > { %3067 = vst.msk [vmem:[#allocation5 + $0x30] sm:$0xff] %vm975_vm4, %v2978_v7  ;;  %3738 = vrot.lane.b32.xlu1 %v7207_v55, %s5551_s9 }
 0x4be   : > { %3547 = vrot.lane.b32.xlu0 %v7381_v12, %s5550_s13 }
 0x4bf   : > { %v2984_v43 = vpop.permute.xlu1 %2983 }
 0x4c0   : > { %3070 = vst.msk [vmem:[#allocation5 + $0x48] sm:$0xff] %vm975_vm4, %v2984_v43  ;;  %v2982_v29 = vpop.permute.xlu0 %2981 }
 0x4c1   : > { %3069 = vst.msk [vmem:[#allocation5 + $0x40] sm:$0xff] %vm975_vm4, %v2982_v29  ;;  %3930 = vrot.lane.b32.xlu1 %v7198_v5, %s5552_s14 }
 0x4c2   : > { %3740 = vrot.lane.b32.xlu0 %v7200_v52, %s5551_s9  ;;  %v5079_v52 = vpop.f32.mrb[30].mxu0 }
 0x4c3   : > { %v2988_v32 = vpop.permute.xlu1 %2987  ;;  %v2534_v37 = vadd.f32 %v5079_v52, %v7145_v36  ;;  %v2528_v44 = vpop.f32.mrb[31].mxu0 }
 0x4c4   : > { %3072 = vst.msk [vmem:[#allocation5 + $0x58] sm:$0xff] %vm975_vm4, %v2988_v32  ;;  %v2986_v28 = vpop.permute.xlu0 %2985  ;;  %v2529_v19 = vadd.f32 %v7145_v36, %v2528_v44 }
 0x4c5   : > { %3071 = vst.msk [vmem:[#allocation5 + $0x50] sm:$0xff] %vm975_vm4, %v2986_v28  ;;  %3932 = vrot.lane.b32.xlu1 %v7193_v1, %s5552_s14  ;;  %v2568_v60 = vmax.f32 %v2534_v37, 0.0 }
 0x4c6   : > { %3357 = vrot.lane.b32.xlu0 %v7198_v5, %s5549_s20 }
 0x4c7   : > { %v2992_v55 = vpop.permute.xlu1 %2991  ;;  %2644 = vst.msk [vmem:[#allocation4 + $0x189] sm:$0xff] %vm337_vm0, %v2568_v60 }
 0x4c8   : > { %3074 = vst.msk [vmem:[#allocation5 + $0x68] sm:$0xff] %vm975_vm4, %v2992_v55  ;;  %v2990_v12 = vpop.permute.xlu0 %2989 }
 0x4c9   : > { %3073 = vst.msk [vmem:[#allocation5 + $0x60] sm:$0xff] %vm975_vm4, %v2990_v12  ;;  %3359 = vrot.lane.b32.xlu1 %v7193_v1, %s5549_s20  ;;  %v2567_v1 = vmax.f32 %v2529_v19, 0.0  ;;  %v3872_v12 = vld [vmem:[#allocation4 + $0xa9] sm:$0xff] }
 0x4ca   : > { %4122 = vrot.lane.b32.xlu0 %v7394_v57, %s5553_s29 }
 0x4cb   : > { %v2996_v49 = vpop.permute.xlu1 %2995  ;;  %2643 = vst.msk [vmem:[#allocation4 + $0x181] sm:$0xff] %vm337_vm0, %v2567_v1  ;;  %v3874_v1 = vld [vmem:[#allocation4 + $0xc1] sm:$0xff] }
 0x4cc   : > { %3076 = vst.msk [vmem:[#allocation5 + $0x78] sm:$0xff] %vm975_vm4, %v2996_v49  ;;  %v2994_v5 = vpop.permute.xlu0 %2993 }
 0x4cd   : > { %3075 = vst.msk [vmem:[#allocation5 + $0x70] sm:$0xff] %vm975_vm4, %v2994_v5  ;;  %4124 = vrot.lane.b32.xlu1 %v7390_v8, %s5553_s29 }
 0x4ce   : > { %3549 = vrot.lane.b32.xlu0 %v7394_v57, %s5550_s13 }
 0x4cf   : > { %v3000_v45 = vpop.permute.xlu1 %2999 }
 0x4d0   : > { %3078 = vst.msk [vmem:[#allocation5 + $0x88] sm:$0xff] %vm975_vm4, %v3000_v45  ;;  %v2998_v36 = vpop.permute.xlu0 %2997 }
 0x4d1   : > { %3077 = vst.msk [vmem:[#allocation5 + $0x80] sm:$0xff] %vm975_vm4, %v2998_v36  ;;  %3742 = vrot.lane.b32.xlu1 %v7227_v2, %s5551_s9 }
 0x4d2   : > { %3551 = vrot.lane.b32.xlu0 %v7390_v8, %s5550_s13 }
 0x4d3   : > { %v3004_v4 = vpop.permute.xlu1 %3003 }
 0x4d4   : > { %3080 = vst.msk [vmem:[#allocation5 + $0x98] sm:$0xff] %vm975_vm4, %v3004_v4  ;;  %v3002_v57 = vpop.permute.xlu0 %3001 }
 0x4d5   : > { %3079 = vst.msk [vmem:[#allocation5 + $0x90] sm:$0xff] %vm975_vm4, %v3002_v57  ;;  %3934 = vrot.lane.b32.xlu1 %v7218_v63, %s5552_s14 }
 0x4d6   : > { %3744 = vrot.lane.b32.xlu0 %v7220_v26, %s5551_s9 }
 0x4d7   : > { %v3008_v53 = vpop.permute.xlu1 %3007 }
 0x4d8   : > { %3082 = vst.msk [vmem:[#allocation5 + $0xa8] sm:$0xff] %vm975_vm4, %v3008_v53  ;;  %v3006_v3 = vpop.permute.xlu0 %3005 }
 0x4d9   : > { %3081 = vst.msk [vmem:[#allocation5 + $0xa0] sm:$0xff] %vm975_vm4, %v3006_v3  ;;  %3936 = vrot.lane.b32.xlu1 %v7213_v62, %s5552_s14 }
 0x4da   : > { %3361 = vrot.lane.b32.xlu0 %v7218_v63, %s5549_s20 }
 0x4db   : > { %v3012_v2 = vpop.permute.xlu1 %3011 }
 0x4dc   : > { %3084 = vst.msk [vmem:[#allocation5 + $0xb8] sm:$0xff] %vm975_vm4, %v3012_v2  ;;  %v3010_v8 = vpop.permute.xlu0 %3009 }
 0x4dd   : > { %3083 = vst.msk [vmem:[#allocation5 + $0xb0] sm:$0xff] %vm975_vm4, %v3010_v8  ;;  %3363 = vrot.lane.b32.xlu1 %v7213_v62, %s5549_s20 }
 0x4de   : > { %4126 = vrot.lane.b32.xlu0 %v7404_v30, %s5553_s29 }
 0x4df   : > { %v3016_v26 = vpop.permute.xlu1 %3015 }
 0x4e0   : > { %3086 = vst.msk [vmem:[#allocation5 + $0xc8] sm:$0xff] %vm975_vm4, %v3016_v26  ;;  %v3014_v18 = vpop.permute.xlu0 %3013 }
 0x4e1   : > { %3085 = vst.msk [vmem:[#allocation5 + $0xc0] sm:$0xff] %vm975_vm4, %v3014_v18  ;;  %4128 = vrot.lane.b32.xlu1 %v7399_v31, %s5553_s29 }
 0x4e2   : > { %3553 = vrot.lane.b32.xlu0 %v7404_v30, %s5550_s13 }
 0x4e3   : > { %v3020_v63 = vpop.permute.xlu1 %3019 }
 0x4e4   : > { %3088 = vst.msk [vmem:[#allocation5 + $0xd8] sm:$0xff] %vm975_vm4, %v3020_v63  ;;  %v3018_v61 = vpop.permute.xlu0 %3017 }
 0x4e5   : > { %3087 = vst.msk [vmem:[#allocation5 + $0xd0] sm:$0xff] %vm975_vm4, %v3018_v61  ;;  %3746 = vrot.lane.b32.xlu1 %v7247_v22, %s5551_s9 }
 0x4e6   : > { %3555 = vrot.lane.b32.xlu0 %v7399_v31, %s5550_s13 }
 0x4e7   : > { %v3024_v62 = vpop.permute.xlu1 %3023 }
 0x4e8   : > { %3090 = vst.msk [vmem:[#allocation5 + $0xe8] sm:$0xff] %vm975_vm4, %v3024_v62  ;;  %v3022_v59 = vpop.permute.xlu0 %3021 }
 0x4e9   : > { %3089 = vst.msk [vmem:[#allocation5 + $0xe0] sm:$0xff] %vm975_vm4, %v3022_v59  ;;  %3938 = vrot.lane.b32.xlu1 %v7238_v15, %s5552_s14 }
 0x4ea   : > { %3748 = vrot.lane.b32.xlu0 %v7240_v23, %s5551_s9 }
 0x4eb   : > { %v3028_v30 = vpop.permute.xlu1 %3027 }
 0x4ec   : > { %3092 = vst.msk [vmem:[#allocation5 + $0xf8] sm:$0xff] %vm975_vm4, %v3028_v30  ;;  %v3026_v47 = vpop.permute.xlu0 %3025 }
 0x4ed   : > { %3091 = vst.msk [vmem:[#allocation5 + $0xf0] sm:$0xff] %vm975_vm4, %v3026_v47  ;;  %3940 = vrot.lane.b32.xlu1 %v7233_v16, %s5552_s14 }
 0x4ee   : > { %3365 = vrot.lane.b32.xlu0 %v7238_v15, %s5549_s20 }
 0x4ef   : > { %v3160_v22 = vpop.permute.xlu1 %3159 }
 0x4f0   : > { %3254 = vst.msk [vmem:[#allocation5 + $0x8] sm:$0xff] %vm1168_vm5, %v3160_v22  ;;  %v3158_v31 = vpop.permute.xlu0 %3157 }
 0x4f1   : > { %3253 = vst.msk [vmem:[#allocation5] sm:$0xff] %vm1168_vm5, %v3158_v31  ;;  %3367 = vrot.lane.b32.xlu1 %v7233_v16, %s5549_s20  ;;  %v3494_v31 = vld [vmem:[#allocation4 + $0xe2] sm:$0xff] }
 0x4f2   : > { %4130 = vrot.lane.b32.xlu0 %v7412_v34, %s5553_s29 }
 0x4f3   : > { %v3164_v23 = vpop.permute.xlu1 %3163 }
 0x4f4   : > { %3256 = vst.msk [vmem:[#allocation5 + $0x18] sm:$0xff] %vm1168_vm5, %v3164_v23  ;;  %v3162_v51 = vpop.permute.xlu0 %3161 }
 0x4f5   : > { %3255 = vst.msk [vmem:[#allocation5 + $0x10] sm:$0xff] %vm1168_vm5, %v3162_v51  ;;  %4132 = vrot.lane.b32.xlu1 %v7408_v35, %s5553_s29 }
 0x4f6   : > { %3557 = vrot.lane.b32.xlu0 %v7412_v34, %s5550_s13 }
 0x4f7   : > { %v3168_v15 = vpop.permute.xlu1 %3167 }
 0x4f8   : > { %3258 = vst.msk [vmem:[#allocation5 + $0x28] sm:$0xff] %vm1168_vm5, %v3168_v15  ;;  %v3166_v21 = vpop.permute.xlu0 %3165 }
 0x4f9   : > { %3257 = vst.msk [vmem:[#allocation5 + $0x20] sm:$0xff] %vm1168_vm5, %v3166_v21  ;;  %3750 = vrot.lane.b32.xlu1 %v7261_v41, %s5551_s9  ;;  %v3871_v41 = vld [vmem:[#allocation4 + $0x99] sm:$0xff] }
 0x4fa   : > { %3559 = vrot.lane.b32.xlu0 %v7408_v35, %s5550_s13 }
 0x4fb   : > { %v3172_v16 = vpop.permute.xlu1 %3171 }
 0x4fc   : > { %3260 = vst.msk [vmem:[#allocation5 + $0x38] sm:$0xff] %vm1168_vm5, %v3172_v16  ;;  %v3170_v11 = vpop.permute.xlu0 %3169  ;;  %v4070_v16 = vld [vmem:[#allocation4 + $0xf2] sm:$0xff] }
 0x4fd   : > { %3259 = vst.msk [vmem:[#allocation5 + $0x30] sm:$0xff] %vm1168_vm5, %v3170_v11  ;;  %3942 = vrot.lane.b32.xlu1 %v3870_v14, %s5552_s14  ;;  %v3879_v11 = vld [vmem:[#allocation4 + $0xf9] sm:$0xff] }
 0x4fe   : > { %3752 = vrot.lane.b32.xlu0 %v7255_v38, %s5551_s9 }
 0x4ff   : > { %v3176_v34 = vpop.permute.xlu1 %3175 }
 0x500   : > { %3262 = vst.msk [vmem:[#allocation5 + $0x48] sm:$0xff] %vm1168_vm5, %v3176_v34  ;;  %v3174_v46 = vpop.permute.xlu0 %3173 }
 0x501   : > { %3261 = vst.msk [vmem:[#allocation5 + $0x40] sm:$0xff] %vm1168_vm5, %v3174_v46  ;;  %3944 = vrot.lane.b32.xlu1 %v3871_v41, %s5552_s14 }
 0x502   : > { %3369 = vrot.lane.b32.xlu0 %v3870_v14, %s5549_s20 }
 0x503   : > { %v3180_v35 = vpop.permute.xlu1 %3179 }
 0x504   : > { %3264 = vst.msk [vmem:[#allocation5 + $0x58] sm:$0xff] %vm1168_vm5, %v3180_v35  ;;  %v3178_v7 = vpop.permute.xlu0 %3177 }
 0x505   : > { %3263 = vst.msk [vmem:[#allocation5 + $0x50] sm:$0xff] %vm1168_vm5, %v3178_v7  ;;  %3371 = vrot.lane.b32.xlu1 %v3871_v41, %s5549_s20  ;;  %v3496_v7 = vld [vmem:[#allocation4 + $0xfa] sm:$0xff] }
 0x506   : > { %4134 = vrot.lane.b32.xlu0 %v7422_v6, %s5553_s29 }
 0x507   : > { %v3184_v38 = vpop.permute.xlu1 %3183 }
 0x508   : > { %3266 = vst.msk [vmem:[#allocation5 + $0x68] sm:$0xff] %vm1168_vm5, %v3184_v38  ;;  %v3182_v43 = vpop.permute.xlu0 %3181 }
 0x509   : > { %3265 = vst.msk [vmem:[#allocation5 + $0x60] sm:$0xff] %vm1168_vm5, %v3182_v43  ;;  %4136 = vrot.lane.b32.xlu1 %v7417_v42, %s5553_s29 }
 0x50a   : > { %3561 = vrot.lane.b32.xlu0 %v7422_v6, %s5550_s13 }
 0x50b   : > { %v3188_v29 = vpop.permute.xlu1 %3187 }
 0x50c   : > { %3268 = vst.msk [vmem:[#allocation5 + $0x78] sm:$0xff] %vm1168_vm5, %v3188_v29  ;;  %v3186_v32 = vpop.permute.xlu0 %3185 }
 0x50d   : > { %3267 = vst.msk [vmem:[#allocation5 + $0x70] sm:$0xff] %vm1168_vm5, %v3186_v32  ;;  %3754 = vrot.lane.b32.xlu1 %v7277_v54, %s5551_s9  ;;  %v3873_v54 = vld [vmem:[#allocation4 + $0xb1] sm:$0xff] }
 0x50e   : > { %3563 = vrot.lane.b32.xlu0 %v7417_v42, %s5550_s13 }
 0x50f   : > { %v3192_v28 = vpop.permute.xlu1 %3191 }
 0x510   : > { %3270 = vst.msk [vmem:[#allocation5 + $0x88] sm:$0xff] %vm1168_vm5, %v3192_v28  ;;  %v3190_v55 = vpop.permute.xlu0 %3189  ;;  %v3880_v28 = vld [vmem:[#allocation4 + $0x109] sm:$0xff] }
 0x511   : > { %3269 = vst.msk [vmem:[#allocation5 + $0x80] sm:$0xff] %vm1168_vm5, %v3190_v55  ;;  %3946 = vrot.lane.b32.xlu1 %v3872_v12, %s5552_s14 }
 0x512   : > { %3756 = vrot.lane.b32.xlu0 %v7271_v25, %s5551_s9 }
 0x513   : > { %v3350_v6 = vpop.permute.xlu1 %3349 }
 0x514   : > { %3445 = vst.msk [vmem:[#allocation5] sm:$0xff] %vm1361_vm6, %v3350_v6  ;;  %v3194_v52 = vpop.permute.xlu0 %3193 }
 0x515   : > { %3271 = vst.msk [vmem:[#allocation5 + $0x90] sm:$0xff] %vm1168_vm5, %v3194_v52  ;;  %3948 = vrot.lane.b32.xlu1 %v3873_v54, %s5552_s14  ;;  %v4072_v52 = vld [vmem:[#allocation4 + $0x10a] sm:$0xff] }
 0x516   : > { %3373 = vrot.lane.b32.xlu0 %v3872_v12, %s5549_s20 }
 0x517   : > { %v3542_v42 = vpop.permute.xlu1 %3541 }
 0x518   : > { %3637 = vst.msk [vmem:[#allocation5] sm:$0xff] %vm1554_vm7, %v3542_v42  ;;  %v3352_v37 = vpop.permute.xlu0 %3351  ;;  %v3881_v42 = vld [vmem:[#allocation4 + $0x111] sm:$0xff] }
 0x519   : > { %3446 = vst.msk [vmem:[#allocation5 + $0x8] sm:$0xff] %vm1361_vm6, %v3352_v37  ;;  %3375 = vrot.lane.b32.xlu1 %v3873_v54, %s5549_s20 }
 0x51a   : > { %4138 = vrot.lane.b32.xlu0 %v7430_v48, %s5553_s29 }
 0x51b   : > { %v3735_v25 = vpop.permute.xlu1 %3734 }
 0x51c   : > { %3830 = vst.msk [vmem:[#allocation5] sm:$0xff] %vm1748_vm8, %v3735_v25  ;;  %v3544_v44 = vpop.permute.xlu0 %3543 }
 0x51d   : > { %3638 = vst.msk [vmem:[#allocation5 + $0x8] sm:$0xff] %vm1554_vm7, %v3544_v44  ;;  %4140 = vrot.lane.b32.xlu1 %v7426_v10, %s5553_s29 }
 0x51e   : > { %3565 = vrot.lane.b32.xlu0 %v7430_v48, %s5550_s13 }
 0x51f   : > { %v3927_v49 = vpop.permute.xlu1 %3926 }
 0x520   : > { %4022 = vst.msk [vmem:[#allocation5] sm:$0xff] %vm1941_vm9, %v3927_v49  ;;  %v3737_v19 = vpop.permute.xlu0 %3736 }
 0x521   : > { %3831 = vst.msk [vmem:[#allocation5 + $0x8] sm:$0xff] %vm1748_vm8, %v3737_v19  ;;  %3758 = vrot.lane.b32.xlu1 %v7291_v58, %s5551_s9  ;;  %v3875_v58 = vld [vmem:[#allocation4 + $0xc9] sm:$0xff]  ;;  %v3498_v19 = vld [vmem:[#allocation4 + $0x112] sm:$0xff] }
 0x522   : > { %3567 = vrot.lane.b32.xlu0 %v7426_v10, %s5550_s13 }
 0x523   : > { %v3929_v5 = vpop.permute.xlu1 %3928 }
 0x524   : > { %4023 = vst.msk [vmem:[#allocation5 + $0x8] sm:$0xff] %vm1941_vm9, %v3929_v5  ;;  %v3354_v60 = vpop.permute.xlu0 %3353 }
 0x525   : > { %3447 = vst.msk [vmem:[#allocation5 + $0x10] sm:$0xff] %vm1361_vm6, %v3354_v60  ;;  %3950 = vrot.lane.b32.xlu1 %v3874_v1, %s5552_s14 }
 0x526   : > { %3760 = vrot.lane.b32.xlu0 %v7285_v9, %s5551_s9 }
 0x527   : > { %v3356_v48 = vpop.permute.xlu1 %3355 }
 0x528   : > { %3448 = vst.msk [vmem:[#allocation5 + $0x18] sm:$0xff] %vm1361_vm6, %v3356_v48  ;;  %v4119_v45 = vpop.permute.xlu0 %4118 }
 0x529   : > { %4214 = vst.msk [vmem:[#allocation5] sm:$0xff] %vm2134_vm10, %v4119_v45  ;;  %3952 = vrot.lane.b32.xlu1 %v3875_v58, %s5552_s14  ;;  %v3882_v45 = vld [vmem:[#allocation4 + $0x121] sm:$0xff] }
 0x52a   : > { %3377 = vrot.lane.b32.xlu0 %v3874_v1, %s5549_s20 }
 0x52b   : > { %v4121_v10 = vpop.permute.xlu1 %4120 }
 0x52c   : > { %4215 = vst.msk [vmem:[#allocation5 + $0x8] sm:$0xff] %vm2134_vm10, %v4121_v10  ;;  %v3546_v36 = vpop.permute.xlu0 %3545 }
 0x52d   : > { %3639 = vst.msk [vmem:[#allocation5 + $0x10] sm:$0xff] %vm1554_vm7, %v3546_v36  ;;  %3379 = vrot.lane.b32.xlu1 %v3875_v58, %s5549_s20  ;;  %v3691_v58 = vld [vmem:[#allocation4 + $0x128] sm:$0xff] }
 0x52e   : > { %4142 = vrot.lane.b32.xlu0 %v7440_v33, %s5553_s29 }
 0x52f   : > { %v3739_v9 = vpop.permute.xlu1 %3738 }
 0x530   : > { %3832 = vst.msk [vmem:[#allocation5 + $0x10] sm:$0xff] %vm1748_vm8, %v3739_v9  ;;  %v3548_v4 = vpop.permute.xlu0 %3547  ;;  %v4246_v57 = vld [vmem:[#allocation5] sm:$0xff] }
 0x531   : > { %3640 = vst.msk [vmem:[#allocation5 + $0x18] sm:$0xff] %vm1554_vm7, %v3548_v4  ;;  %4144 = vrot.lane.b32.xlu1 %v7435_v17, %s5553_s29  ;;  %5098 = vmatprep.mubr.msk.f32.mxu1 %vm2215_vm11, %v4246_v57 }
 0x532   : > { %3569 = vrot.lane.b32.xlu0 %v7440_v33, %s5550_s13  ;;  %v3876_v33 = vld [vmem:[#allocation4 + $0xd9] sm:$0xff] }
 0x533   : > { %v3931_v53 = vpop.permute.xlu1 %3930  ;;  %v4247_v3 = vld [vmem:[#allocation5 + $0x8] sm:$0xff] }
 0x534   : > { %4024 = vst.msk [vmem:[#allocation5 + $0x10] sm:$0xff] %vm1941_vm9, %v3931_v53  ;;  %5099 = vmatmul.mubr.msk.f32.vlgmr.msra.gmra.mrb[0].mxu1 %vm2215_vm11, %v4247_v3  ;;  %v3741_v2 = vpop.permute.xlu0 %3740  ;;  %v4074_v53 = vld [vmem:[#allocation4 + $0x122] sm:$0xff] }
 0x535   : > { %3833 = vst.msk [vmem:[#allocation5 + $0x18] sm:$0xff] %vm1748_vm8, %v3741_v2  ;;  %3762 = vrot.lane.b32.xlu1 %v7305_v56, %s5551_s9  ;;  %v3877_v56 = vld [vmem:[#allocation4 + $0xe1] sm:$0xff]  ;;  %v3883_v3 = vld [vmem:[#allocation4 + $0x129] sm:$0xff] }
 0x536   : > { %3571 = vrot.lane.b32.xlu0 %v7435_v17, %s5550_s13 }
 0x537   : > { %v3933_v8 = vpop.permute.xlu1 %3932 }
 0x538   : > { %4025 = vst.msk [vmem:[#allocation5 + $0x18] sm:$0xff] %vm1941_vm9, %v3933_v8  ;;  %v3358_v26 = vpop.permute.xlu0 %3357 }
 0x539   : > { %3449 = vst.msk [vmem:[#allocation5 + $0x20] sm:$0xff] %vm1361_vm6, %v3358_v26  ;;  %3954 = vrot.lane.b32.xlu1 %v3876_v33, %s5552_s14 }
 0x53a   : > { %3764 = vrot.lane.b32.xlu0 %v7299_v50, %s5551_s9 }
 0x53b   : > { %v3360_v18 = vpop.permute.xlu1 %3359 }
 0x53c   : > { %3450 = vst.msk [vmem:[#allocation5 + $0x28] sm:$0xff] %vm1361_vm6, %v3360_v18  ;;  %v4123_v63 = vpop.permute.xlu0 %4122  ;;  %v3500_v18 = vld [vmem:[#allocation4 + $0x12a] sm:$0xff] }
 0x53d   : > { %4216 = vst.msk [vmem:[#allocation5 + $0x10] sm:$0xff] %vm2134_vm10, %v4123_v63  ;;  %3956 = vrot.lane.b32.xlu1 %v3877_v56, %s5552_s14 }
 0x53e   : > { %3381 = vrot.lane.b32.xlu0 %v3876_v33, %s5549_s20 }
 0x53f   : > { %v4125_v17 = vpop.permute.xlu1 %4124 }
 0x540   : > { %4217 = vst.msk [vmem:[#allocation5 + $0x18] sm:$0xff] %vm2134_vm10, %v4125_v17  ;;  %v3550_v61 = vpop.permute.xlu0 %3549  ;;  %v3117_v17 = vld [vmem:[#allocation4 + $0x138] sm:$0xff] }
 0x541   : > { %3641 = vst.msk [vmem:[#allocation5 + $0x20] sm:$0xff] %vm1554_vm7, %v3550_v61  ;;  %3383 = vrot.lane.b32.xlu1 %v3877_v56, %s5549_s20 }
 0x542   : > { %4146 = vrot.lane.b32.xlu0 %v7448_v20, %s5553_s29 }
 0x543   : > { %v3743_v50 = vpop.permute.xlu1 %3742 }
 0x544   : > { %3834 = vst.msk [vmem:[#allocation5 + $0x20] sm:$0xff] %vm1748_vm8, %v3743_v50  ;;  %v3552_v62 = vpop.permute.xlu0 %3551  ;;  %v4248_v59 = vld [vmem:[#allocation5 + $0x10] sm:$0xff] }
 0x545   : > { %3642 = vst.msk [vmem:[#allocation5 + $0x28] sm:$0xff] %vm1554_vm7, %v3552_v62  ;;  %4148 = vrot.lane.b32.xlu1 %v7444_v0, %s5553_s29  ;;  %5101 = vmatprep.mubr.msk.f32.mxu1 %vm2215_vm11, %v4248_v59  ;;  %v3884_v62 = vld [vmem:[#allocation4 + $0x139] sm:$0xff] }
 0x546   : > { %3573 = vrot.lane.b32.xlu0 %v7448_v20, %s5550_s13  ;;  %v3878_v20 = vld [vmem:[#allocation4 + $0xf1] sm:$0xff] }
 0x547   : > { %v3935_v30 = vpop.permute.xlu1 %3934  ;;  %v4249_v47 = vld [vmem:[#allocation5 + $0x18] sm:$0xff] }
 0x548   : > { %4026 = vst.msk [vmem:[#allocation5 + $0x20] sm:$0xff] %vm1941_vm9, %v3935_v30  ;;  %v3745_v22 = vpop.permute.xlu0 %3744  ;;  %5102 = vmatmul.mubr.msk.f32.gmra.mrb[2].mxu1 %vm2215_vm11, %v4249_v47  ;;  %v3693_v30 = vld [vmem:[#allocation4 + $0x140] sm:$0xff] }
 0x549   : > { %3835 = vst.msk [vmem:[#allocation5 + $0x28] sm:$0xff] %vm1748_vm8, %v3745_v22  ;;  %3766 = vrot.lane.b32.xlu1 %v7319_v40, %s5551_s9 }
 0x54a   : > { %3575 = vrot.lane.b32.xlu0 %v3494_v31, %s5550_s13 }
 0x54b   : > { %v3937_v0 = vpop.permute.xlu1 %3936 }
 0x54c   : > { %4027 = vst.msk [vmem:[#allocation5 + $0x28] sm:$0xff] %vm1941_vm9, %v3937_v0  ;;  %v3362_v23 = vpop.permute.xlu0 %3361 }
 0x54d   : > { %3451 = vst.msk [vmem:[#allocation5 + $0x30] sm:$0xff] %vm1361_vm6, %v3362_v23  ;;  %3958 = vrot.lane.b32.xlu1 %v3878_v20, %s5552_s14 }
 0x54e   : > { %3768 = vrot.lane.b32.xlu0 %v7313_v39, %s5551_s9 }
 0x54f   : > { %v3364_v51 = vpop.permute.xlu1 %3363 }
 0x550   : > { %3452 = vst.msk [vmem:[#allocation5 + $0x38] sm:$0xff] %vm1361_vm6, %v3364_v51  ;;  %v4127_v15 = vpop.permute.xlu0 %4126  ;;  %v3885_v51 = vld [vmem:[#allocation4 + $0x141] sm:$0xff] }
 0x551   : > { %4218 = vst.msk [vmem:[#allocation5 + $0x20] sm:$0xff] %vm2134_vm10, %v4127_v15  ;;  %3385 = vrot.lane.b32.xlu1 %v3878_v20, %s5549_s20  ;;  %v4076_v20 = vld [vmem:[#allocation4 + $0x13a] sm:$0xff] }
 0x552   : > { %3195 = vrot.lane.b32.xlu0 %v7313_v39, %s5548_s17 }
 0x553   : > { %v4129_v40 = vpop.permute.xlu1 %4128 }
 0x554   : > { %4219 = vst.msk [vmem:[#allocation5 + $0x28] sm:$0xff] %vm2134_vm10, %v4129_v40  ;;  %v3554_v21 = vpop.permute.xlu0 %3553 }
 0x555   : > { %3643 = vst.msk [vmem:[#allocation5 + $0x30] sm:$0xff] %vm1554_vm7, %v3554_v21  ;;  %4150 = vrot.lane.b32.xlu1 %v4070_v16, %s5553_s29 }
 0x556   : > { %3960 = vrot.lane.b32.xlu0 %v3879_v11, %s5552_s14 }
 0x557   : > { %v3747_v14 = vpop.permute.xlu1 %3746 }
 0x558   : > { %3836 = vst.msk [vmem:[#allocation5 + $0x30] sm:$0xff] %vm1748_vm8, %v3747_v14  ;;  %v3556_v34 = vpop.permute.xlu0 %3555  ;;  %v4250_v46 = vld [vmem:[#allocation5 + $0x20] sm:$0xff] }
 0x559   : > { %3644 = vst.msk [vmem:[#allocation5 + $0x38] sm:$0xff] %vm1554_vm7, %v3556_v34  ;;  %3577 = vrot.lane.b32.xlu1 %v4070_v16, %s5550_s13  ;;  %5104 = vmatprep.mubr.msk.f32.mxu1 %vm2215_vm11, %v4250_v46  ;;  %v3119_v46 = vld [vmem:[#allocation4 + $0x150] sm:$0xff] }
 0x55a   : > { %3387 = vrot.lane.b32.xlu0 %v3879_v11, %s5549_s20  ;;  %v3502_v11 = vld [vmem:[#allocation4 + $0x142] sm:$0xff] }
 0x55b   : > { %v3939_v39 = vpop.permute.xlu1 %3938  ;;  %v4251_v41 = vld [vmem:[#allocation5 + $0x28] sm:$0xff] }
 0x55c   : > { %4028 = vst.msk [vmem:[#allocation5 + $0x30] sm:$0xff] %vm1941_vm9, %v3939_v39  ;;  %v3749_v35 = vpop.permute.xlu0 %3748  ;;  %5105 = vmatmul.mubr.msk.f32.gmra.mrb[4].mxu1 %vm2215_vm11, %v4251_v41 }
 0x55d   : > { %3837 = vst.msk [vmem:[#allocation5 + $0x38] sm:$0xff] %vm1748_vm8, %v3749_v35  ;;  %3579 = vrot.lane.b32.xlu1 %v3496_v7, %s5550_s13 }
 0x55e   : > { %4152 = vrot.lane.b32.xlu0 %v3496_v7, %s5553_s29 }
 0x55f   : > { %v3941_v38 = vpop.permute.xlu1 %3940 }
 0x560   : > { %4029 = vst.msk [vmem:[#allocation5 + $0x38] sm:$0xff] %vm1941_vm9, %v3941_v38  ;;  %v3366_v43 = vpop.permute.xlu0 %3365  ;;  %v3886_v38 = vld [vmem:[#allocation4 + $0x151] sm:$0xff] }
 0x561   : > { %3453 = vst.msk [vmem:[#allocation5 + $0x40] sm:$0xff] %vm1361_vm6, %v3366_v43  ;;  %3197 = vrot.lane.b32.xlu1 %v7333_v27, %s5548_s17  ;;  %v3695_v43 = vld [vmem:[#allocation4 + $0x158] sm:$0xff] }
 0x562   : > { %3770 = vrot.lane.b32.xlu0 %v7333_v27, %s5551_s9 }
 0x563   : > { %v3368_v29 = vpop.permute.xlu1 %3367 }
 0x564   : > { %3454 = vst.msk [vmem:[#allocation5 + $0x48] sm:$0xff] %vm1361_vm6, %v3368_v29  ;;  %v4131_v32 = vpop.permute.xlu0 %4130 }
 0x565   : > { %4220 = vst.msk [vmem:[#allocation5 + $0x30] sm:$0xff] %vm2134_vm10, %v4131_v32  ;;  %3962 = vrot.lane.b32.xlu1 %v3880_v28, %s5552_s14 }
 0x566   : > { %3772 = vrot.lane.b32.xlu0 %v7327_v24, %s5551_s9 }
 0x567   : > { %v4133_v55 = vpop.permute.xlu1 %4132 }
 0x568   : > { %4221 = vst.msk [vmem:[#allocation5 + $0x38] sm:$0xff] %vm2134_vm10, %v4133_v55  ;;  %v3558_v12 = vpop.permute.xlu0 %3557 }
 0x569   : > { %3645 = vst.msk [vmem:[#allocation5 + $0x40] sm:$0xff] %vm1554_vm7, %v3558_v12  ;;  %3389 = vrot.lane.b32.xlu1 %v3880_v28, %s5549_s20  ;;  %v4078_v12 = vld [vmem:[#allocation4 + $0x152] sm:$0xff] }
 0x56a   : > { %3199 = vrot.lane.b32.xlu0 %v7327_v24, %s5548_s17 }
 0x56b   : > { %v3751_v27 = vpop.permute.xlu1 %3750 }
 0x56c   : > { %3838 = vst.msk [vmem:[#allocation5 + $0x40] sm:$0xff] %vm1748_vm8, %v3751_v27  ;;  %v3560_v6 = vpop.permute.xlu0 %3559  ;;  %v4252_v54 = vld [vmem:[#allocation5 + $0x30] sm:$0xff] }
 0x56d   : > { %3646 = vst.msk [vmem:[#allocation5 + $0x48] sm:$0xff] %vm1554_vm7, %v3560_v6  ;;  %4154 = vrot.lane.b32.xlu1 %v4072_v52, %s5553_s29  ;;  %5107 = vmatprep.mubr.msk.f32.mxu1 %vm2215_vm11, %v4252_v54  ;;  %v3887_v27 = vld [vmem:[#allocation4 + $0x159] sm:$0xff] }
 0x56e   : > { %3964 = vrot.lane.b32.xlu0 %v3881_v42, %s5552_s14 }
 0x56f   : > { %v3943_v37 = vpop.permute.xlu1 %3942  ;;  %v4253_v25 = vld [vmem:[#allocation5 + $0x38] sm:$0xff] }
 0x570   : > { %4030 = vst.msk [vmem:[#allocation5 + $0x40] sm:$0xff] %vm1941_vm9, %v3943_v37  ;;  %v3753_v24 = vpop.permute.xlu0 %3752  ;;  %5108 = vmatmul.mubr.msk.f32.gmra.mrb[6].mxu1 %vm2215_vm11, %v4253_v25  ;;  %v3504_v37 = vld [vmem:[#allocation4 + $0x15a] sm:$0xff] }
 0x571   : > { %3839 = vst.msk [vmem:[#allocation5 + $0x48] sm:$0xff] %vm1748_vm8, %v3753_v24  ;;  %3581 = vrot.lane.b32.xlu1 %v4072_v52, %s5550_s13 }
 0x572   : > { %3391 = vrot.lane.b32.xlu0 %v3881_v42, %s5549_s20 }
 0x573   : > { %v3945_v44 = vpop.permute.xlu1 %3944 }
 0x574   : > { %4031 = vst.msk [vmem:[#allocation5 + $0x48] sm:$0xff] %vm1941_vm9, %v3945_v44  ;;  %v3370_v49 = vpop.permute.xlu0 %3369 }
 0x575   : > { %3455 = vst.msk [vmem:[#allocation5 + $0x50] sm:$0xff] %vm1361_vm6, %v3370_v49  ;;  %3583 = vrot.lane.b32.xlu1 %v3498_v19, %s5550_s13 }
 0x576   : > { %4156 = vrot.lane.b32.xlu0 %v3498_v19, %s5553_s29  ;;  %v3121_v19 = vld [vmem:[#allocation4 + $0x168] sm:$0xff] }
 0x577   : > { %v3372_v5 = vpop.permute.xlu1 %3371 }
 0x578   : > { %3456 = vst.msk [vmem:[#allocation5 + $0x58] sm:$0xff] %vm1361_vm6, %v3372_v5  ;;  %v4135_v60 = vpop.permute.xlu0 %4134 }
 0x579   : > { %4222 = vst.msk [vmem:[#allocation5 + $0x40] sm:$0xff] %vm2134_vm10, %v4135_v60  ;;  %3201 = vrot.lane.b32.xlu1 %v7344_v13, %s5548_s17 }
 0x57a   : > { %3774 = vrot.lane.b32.xlu0 %v7344_v13, %s5551_s9 }
 0x57b   : > { %v4137_v1 = vpop.permute.xlu1 %4136 }
 0x57c   : > { %4223 = vst.msk [vmem:[#allocation5 + $0x48] sm:$0xff] %vm2134_vm10, %v4137_v1  ;;  %v3562_v48 = vpop.permute.xlu0 %3561  ;;  %v3888_v1 = vld [vmem:[#allocation4 + $0x169] sm:$0xff] }
 0x57d   : > { %3647 = vst.msk [vmem:[#allocation5 + $0x50] sm:$0xff] %vm1554_vm7, %v3562_v48  ;;  %3966 = vrot.lane.b32.xlu1 %v3882_v45, %s5552_s14  ;;  %v3697_v48 = vld [vmem:[#allocation4 + $0x170] sm:$0xff] }
 0x57e   : > { %3776 = vrot.lane.b32.xlu0 %v3691_v58, %s5551_s9 }
 0x57f   : > { %v3755_v10 = vpop.permute.xlu1 %3754 }
 0x580   : > { %3840 = vst.msk [vmem:[#allocation5 + $0x50] sm:$0xff] %vm1748_vm8, %v3755_v10  ;;  %v3564_v36 = vpop.permute.xlu0 %3563  ;;  %v4254_v9 = vld [vmem:[#allocation5 + $0x40] sm:$0xff] }
 0x581   : > { %3648 = vst.msk [vmem:[#allocation5 + $0x58] sm:$0xff] %vm1554_vm7, %v3564_v36  ;;  %3393 = vrot.lane.b32.xlu1 %v3882_v45, %s5549_s20  ;;  %5110 = vmatprep.mubr.msk.f32.mxu1 %vm2215_vm11, %v4254_v9  ;;  %v4080_v9 = vld [vmem:[#allocation4 + $0x16a] sm:$0xff] }
 0x582   : > { %3203 = vrot.lane.b32.xlu0 %v3691_v58, %s5548_s17 }
 0x583   : > { %v3947_v13 = vpop.permute.xlu1 %3946  ;;  %v4255_v4 = vld [vmem:[#allocation5 + $0x48] sm:$0xff] }
 0x584   : > { %4032 = vst.msk [vmem:[#allocation5 + $0x50] sm:$0xff] %vm1941_vm9, %v3947_v13  ;;  %v3757_v57 = vpop.permute.xlu0 %3756  ;;  %5111 = vmatmul.mubr.msk.f32.gmra.mrb[8].mxu1 %vm2215_vm11, %v4255_v4  ;;  %v3889_v13 = vld [vmem:[#allocation4 + $0x171] sm:$0xff] }
 0x585   : > { %3841 = vst.msk [vmem:[#allocation5 + $0x58] sm:$0xff] %vm1748_vm8, %v3757_v57  ;;  %4158 = vrot.lane.b32.xlu1 %v4074_v53, %s5553_s29 }
 0x586   : > { %3968 = vrot.lane.b32.xlu0 %v3883_v3, %s5552_s14 }
 0x587   : > { %v3949_v2 = vpop.permute.xlu1 %3948 }
 0x588   : > { %4033 = vst.msk [vmem:[#allocation5 + $0x58] sm:$0xff] %vm1941_vm9, %v3949_v2  ;;  %v3374_v8 = vpop.permute.xlu0 %3373 }
 0x589   : > { %3457 = vst.msk [vmem:[#allocation5 + $0x60] sm:$0xff] %vm1361_vm6, %v3374_v8  ;;  %3585 = vrot.lane.b32.xlu1 %v4074_v53, %s5550_s13  ;;  %v3506_v8 = vld [vmem:[#allocation4 + $0x172] sm:$0xff] }
 0x58a   : > { %3395 = vrot.lane.b32.xlu0 %v3883_v3, %s5549_s20 }
 0x58b   : > { %v3376_v26 = vpop.permute.xlu1 %3375 }
 0x58c   : > { %3458 = vst.msk [vmem:[#allocation5 + $0x68] sm:$0xff] %vm1361_vm6, %v3376_v26  ;;  %v4139_v33 = vpop.permute.xlu0 %4138 }
 0x58d   : > { %4224 = vst.msk [vmem:[#allocation5 + $0x50] sm:$0xff] %vm2134_vm10, %v4139_v33  ;;  %3587 = vrot.lane.b32.xlu1 %v3500_v18, %s5550_s13 }
 0x58e   : > { %4160 = vrot.lane.b32.xlu0 %v3500_v18, %s5553_s29  ;;  %v3123_v18 = vld [vmem:[#allocation4 + $0x180] sm:$0xff] }
 0x58f   : > { %v4141_v63 = vpop.permute.xlu1 %4140 }
 0x590   : > { %4225 = vst.msk [vmem:[#allocation5 + $0x58] sm:$0xff] %vm2134_vm10, %v4141_v63  ;;  %v3566_v56 = vpop.permute.xlu0 %3565 }
 0x591   : > { %3649 = vst.msk [vmem:[#allocation5 + $0x60] sm:$0xff] %vm1554_vm7, %v3566_v56  ;;  %3205 = vrot.lane.b32.xlu1 %v3117_v17, %s5548_s17 }
 0x592   : > { %3778 = vrot.lane.b32.xlu0 %v3117_v17, %s5551_s9 }
 0x593   : > { %v3759_v61 = vpop.permute.xlu1 %3758 }
 0x594   : > { %3842 = vst.msk [vmem:[#allocation5 + $0x60] sm:$0xff] %vm1748_vm8, %v3759_v61  ;;  %v3568_v50 = vpop.permute.xlu0 %3567  ;;  %v4256_v59 = vld [vmem:[#allocation5 + $0x50] sm:$0xff] }
 0x595   : > { %3650 = vst.msk [vmem:[#allocation5 + $0x68] sm:$0xff] %vm1554_vm7, %v3568_v50  ;;  %3970 = vrot.lane.b32.xlu1 %v3884_v62, %s5552_s14  ;;  %5113 = vmatprep.mubr.msk.f32.mxu1 %vm2215_vm11, %v4256_v59  ;;  %v3890_v61 = vld [vmem:[#allocation4 + $0x181] sm:$0xff] }
 0x596   : > { %3780 = vrot.lane.b32.xlu0 %v3693_v30, %s5551_s9  ;;  %v3699_v50 = vld [vmem:[#allocation4 + $0x188] sm:$0xff] }
 0x597   : > { %v3951_v47 = vpop.permute.xlu1 %3950  ;;  %v4257_v22 = vld [vmem:[#allocation5 + $0x58] sm:$0xff] }
 0x598   : > { %4034 = vst.msk [vmem:[#allocation5 + $0x60] sm:$0xff] %vm1941_vm9, %v3951_v47  ;;  %v3761_v31 = vpop.permute.xlu0 %3760  ;;  %5114 = vmatmul.mubr.msk.f32.gmra.mrb[10].mxu1 %vm2215_vm11, %v4257_v22  ;;  %v4082_v22 = vld [vmem:[#allocation4 + $0x182] sm:$0xff] }
 0x599   : > { %3843 = vst.msk [vmem:[#allocation5 + $0x68] sm:$0xff] %vm1748_vm8, %v3761_v31  ;;  %3397 = vrot.lane.b32.xlu1 %v3884_v62, %s5549_s20  ;;  %v3891_v31 = vld [vmem:[#allocation4 + $0x189] sm:$0xff] }
 0x59a   : > { %3207 = vrot.lane.b32.xlu0 %v3693_v30, %s5548_s17 }
 0x59b   : > { %v3953_v0 = vpop.permute.xlu1 %3952 }
 0x59c   : > { %4035 = vst.msk [vmem:[#allocation5 + $0x68] sm:$0xff] %vm1941_vm9, %v3953_v0  ;;  %v3378_v23 = vpop.permute.xlu0 %3377 }
 0x59d   : > { %3459 = vst.msk [vmem:[#allocation5 + $0x70] sm:$0xff] %vm1361_vm6, %v3378_v23  ;;  %4162 = vrot.lane.b32.xlu1 %v4076_v20, %s5553_s29 }
 0x59e   : > { %3972 = vrot.lane.b32.xlu0 %v3885_v51, %s5552_s14 }
 0x59f   : > { %v3380_v15 = vpop.permute.xlu1 %3379 }
 0x5a0   : > { %3460 = vst.msk [vmem:[#allocation5 + $0x78] sm:$0xff] %vm1361_vm6, %v3380_v15  ;;  %v4143_v40 = vpop.permute.xlu0 %4142 }
 0x5a1   : > { %4226 = vst.msk [vmem:[#allocation5 + $0x60] sm:$0xff] %vm2134_vm10, %v4143_v40  ;;  %3589 = vrot.lane.b32.xlu1 %v4076_v20, %s5550_s13  ;;  %v3508_v40 = vld [vmem:[#allocation4 + $0x18a] sm:$0xff] }
 0x5a2   : > { %3399 = vrot.lane.b32.xlu0 %v3885_v51, %s5549_s20 }
 0x5a3   : > { %v4145_v21 = vpop.permute.xlu1 %4144 }
 0x5a4   : > { %4227 = vst.msk [vmem:[#allocation5 + $0x68] sm:$0xff] %vm2134_vm10, %v4145_v21  ;;  %v3570_v16 = vpop.permute.xlu0 %3569  ;;  %v3701_v21 = vld [vmem:[#allocation4 + $0x1a0] sm:$0xff] }
 0x5a5   : > { %3651 = vst.msk [vmem:[#allocation5 + $0x70] sm:$0xff] %vm1554_vm7, %v3570_v16  ;;  %3591 = vrot.lane.b32.xlu1 %v3502_v11, %s5550_s13 }
 0x5a6   : > { %4164 = vrot.lane.b32.xlu0 %v3502_v11, %s5553_s29  ;;  %v3700_v11 = vld [vmem:[#allocation4 + $0x198] sm:$0xff] }
 0x5a7   : > { %v3763_v14 = vpop.permute.xlu1 %3762 }
 0x5a8   : > { %3844 = vst.msk [vmem:[#allocation5 + $0x70] sm:$0xff] %vm1748_vm8, %v3763_v14  ;;  %v3572_v34 = vpop.permute.xlu0 %3571  ;;  %v4258_v39 = vld [vmem:[#allocation5 + $0x60] sm:$0xff] }
 0x5a9   : > { %3652 = vst.msk [vmem:[#allocation5 + $0x78] sm:$0xff] %vm1554_vm7, %v3572_v34  ;;  %3209 = vrot.lane.b32.xlu1 %v3119_v46, %s5548_s17  ;;  %5116 = vmatprep.mubr.msk.f32.mxu1 %vm2215_vm11, %v4258_v39 }
 0x5aa   : > { %3782 = vrot.lane.b32.xlu0 %v3119_v46, %s5551_s9  ;;  %v3893_v46 = vld [vmem:[#allocation4 + $0x1a1] sm:$0xff] }
 0x5ab   : > { %v3955_v41 = vpop.permute.xlu1 %3954  ;;  %v4259_v35 = vld [vmem:[#allocation5 + $0x68] sm:$0xff] }
 0x5ac   : > { %4036 = vst.msk [vmem:[#allocation5 + $0x70] sm:$0xff] %vm1941_vm9, %v3955_v41  ;;  %v3765_v7 = vpop.permute.xlu0 %3764  ;;  %5117 = vmatmul.mubr.msk.f32.gmra.mrb[12].mxu1 %vm2215_vm11, %v4259_v35  ;;  %v3892_v41 = vld [vmem:[#allocation4 + $0x199] sm:$0xff] }
 0x5ad   : > { %3845 = vst.msk [vmem:[#allocation5 + $0x78] sm:$0xff] %vm1748_vm8, %v3765_v7  ;;  %3974 = vrot.lane.b32.xlu1 %v3886_v38, %s5552_s14  ;;  %v4085_v7 = vld [vmem:[#allocation4 + $0x1a2] sm:$0xff] }
 0x5ae   : > { %3784 = vrot.lane.b32.xlu0 %v3695_v43, %s5551_s9 }
 0x5af   : > { %v3957_v29 = vpop.permute.xlu1 %3956 }
 0x5b0   : > { %4037 = vst.msk [vmem:[#allocation5 + $0x78] sm:$0xff] %vm1941_vm9, %v3957_v29  ;;  %v3382_v32 = vpop.permute.xlu0 %3381 }
 0x5b1   : > { %3461 = vst.msk [vmem:[#allocation5 + $0x80] sm:$0xff] %vm1361_vm6, %v3382_v32  ;;  %3401 = vrot.lane.b32.xlu1 %v3886_v38, %s5549_s20 }
 0x5b2   : > { %3211 = vrot.lane.b32.xlu0 %v3695_v43, %s5548_s17  ;;  %v4084_v43 = vld [vmem:[#allocation4 + $0x19a] sm:$0xff] }
 0x5b3   : > { %v3384_v28 = vpop.permute.xlu1 %3383 }
 0x5b4   : > { %3462 = vst.msk [vmem:[#allocation5 + $0x88] sm:$0xff] %vm1361_vm6, %v3384_v28  ;;  %v4147_v55 = vpop.permute.xlu0 %4146 }
 0x5b5   : > { %4228 = vst.msk [vmem:[#allocation5 + $0x70] sm:$0xff] %vm2134_vm10, %v4147_v55  ;;  %4166 = vrot.lane.b32.xlu1 %v4078_v12, %s5553_s29 }
 0x5b6   : > { %3976 = vrot.lane.b32.xlu0 %v3887_v27, %s5552_s14 }
 0x5b7   : > { %v4149_v6 = vpop.permute.xlu1 %4148 }
 0x5b8   : > { %4229 = vst.msk [vmem:[#allocation5 + $0x78] sm:$0xff] %vm2134_vm10, %v4149_v6  ;;  %v3574_v52 = vpop.permute.xlu0 %3573 }
 0x5b9   : > { %3653 = vst.msk [vmem:[#allocation5 + $0x80] sm:$0xff] %vm1554_vm7, %v3574_v52  ;;  %3593 = vrot.lane.b32.xlu1 %v4078_v12, %s5550_s13 }
 0x5ba   : > { %3403 = vrot.lane.b32.xlu0 %v3887_v27, %s5549_s20 }
 0x5bb   : > { %v3767_v54 = vpop.permute.xlu1 %3766 }
 0x5bc   : > { %3846 = vst.msk [vmem:[#allocation5 + $0x80] sm:$0xff] %vm1748_vm8, %v3767_v54  ;;  %v3576_v42 = vpop.permute.xlu0 %3575  ;;  %v4260_v25 = vld [vmem:[#allocation5 + $0x70] sm:$0xff]  ;;  %v4609_v54 = vld [vmem:[%s5839_s7 + $0x8] sm:$0xff] }
 0x5bd   : > { %3654 = vst.msk [vmem:[#allocation5 + $0x88] sm:$0xff] %vm1554_vm7, %v3576_v42  ;;  %3595 = vrot.lane.b32.xlu1 %v3504_v37, %s5550_s13  ;;  %5119 = vmatprep.mubr.msk.f32.mxu1 %vm2215_vm11, %v4260_v25  ;;  %v4608_v42 = vld [vmem:[%s5839_s7] sm:$0xff] }
 0x5be   : > { %4168 = vrot.lane.b32.xlu0 %v3504_v37, %s5553_s29 }
 0x5bf   : > { %v3959_v24 = vpop.permute.xlu1 %3958  ;;  %v4261_v44 = vld [vmem:[#allocation5 + $0x78] sm:$0xff] }
 0x5c0   : > { %4038 = vst.msk [vmem:[#allocation5 + $0x80] sm:$0xff] %vm1941_vm9, %v3959_v24  ;;  %v3769_v49 = vpop.permute.xlu0 %3768  ;;  %5120 = vmatmul.mubr.msk.f32.gmra.mrb[14].mxu1 %vm2215_vm11, %v4261_v44 }
 0x5c1   : > { %3847 = vst.msk [vmem:[#allocation5 + $0x88] sm:$0xff] %vm1748_vm8, %v3769_v49  ;;  %3213 = vrot.lane.b32.xlu1 %v3121_v19, %s5548_s17 }
 0x5c2   : > { %3786 = vrot.lane.b32.xlu0 %v3121_v19, %s5551_s9 }
 0x5c3   : > { %v3386_v5 = vpop.permute.xlu1 %3385 }
 0x5c4   : > { %3463 = vst.msk [vmem:[#allocation5 + $0x90] sm:$0xff] %vm1361_vm6, %v3386_v5  ;;  %v3196_v60 = vpop.permute.xlu0 %3195 }
 0x5c5   : > { %3272 = vst.msk [vmem:[#allocation5 + $0x98] sm:$0xff] %vm1168_vm5, %v3196_v60  ;;  %3978 = vrot.lane.b32.xlu1 %v3888_v1, %s5552_s14 }
 0x5c6   : > { %3788 = vrot.lane.b32.xlu0 %v3697_v48, %s5551_s9 }
 0x5c7   : > { %v4151_v45 = vpop.permute.xlu1 %4150 }
 0x5c8   : > { %4230 = vst.msk [vmem:[#allocation5 + $0x80] sm:$0xff] %vm2134_vm10, %v4151_v45  ;;  %v3961_v58 = vpop.permute.xlu0 %3960 }
 0x5c9   : > { %4039 = vst.msk [vmem:[#allocation5 + $0x88] sm:$0xff] %vm1941_vm9, %v3961_v58  ;;  %3405 = vrot.lane.b32.xlu1 %v3888_v1, %s5549_s20 }
 0x5ca   : > { %3215 = vrot.lane.b32.xlu0 %v3697_v48, %s5548_s17 }
 0x5cb   : > { %v3578_v10 = vpop.permute.xlu1 %3577 }
 0x5cc   : > { %3655 = vst.msk [vmem:[#allocation5 + $0x90] sm:$0xff] %vm1554_vm7, %v3578_v10  ;;  %v3388_v36 = vpop.permute.xlu0 %3387 }
 0x5cd   : > { %3464 = vst.msk [vmem:[#allocation5 + $0x98] sm:$0xff] %vm1361_vm6, %v3388_v36  ;;  %4170 = vrot.lane.b32.xlu1 %v4080_v9, %s5553_s29 }
 0x5ce   : > { %3980 = vrot.lane.b32.xlu0 %v3889_v13, %s5552_s14 }
 0x5cf   : > { %v3580_v4 = vpop.permute.xlu1 %3579  ;;  %v4262_v57 = vld [vmem:[#allocation5 + $0x80] sm:$0xff] }
 0x5d0   : > { %3656 = vst.msk [vmem:[#allocation5 + $0x98] sm:$0xff] %vm1554_vm7, %v3580_v4  ;;  %v4153_v53 = vpop.permute.xlu0 %4152  ;;  %5122 = vmatprep.mubr.msk.f32.mxu1 %vm2215_vm11, %v4262_v57  ;;  %v4611_v4 = vld [vmem:[%s5839_s7 + $0x18] sm:$0xff]  ;;  %v4610_v57 = vld [vmem:[%s5839_s7 + $0x10] sm:$0xff] }
 0x5d1   : > { %4231 = vst.msk [vmem:[#allocation5 + $0x88] sm:$0xff] %vm2134_vm10, %v4153_v53  ;;  %3597 = vrot.lane.b32.xlu1 %v4080_v9, %s5550_s13 }
 0x5d2   : > { %3407 = vrot.lane.b32.xlu0 %v3889_v13, %s5549_s20 }
 0x5d3   : > { %v3198_v3 = vpop.permute.xlu1 %3197 }
 0x5d4   : > { %3273 = vst.msk [vmem:[#allocation5 + $0xa0] sm:$0xff] %vm1168_vm5, %v3198_v3  ;;  %v3771_v2 = vpop.permute.xlu0 %3770 }
 0x5d5   : > { %3848 = vst.msk [vmem:[#allocation5 + $0x90] sm:$0xff] %vm1748_vm8, %v3771_v2  ;;  %3599 = vrot.lane.b32.xlu1 %v3506_v8, %s5550_s13 }
 0x5d6   : > { %4172 = vrot.lane.b32.xlu0 %v3506_v8, %s5553_s29 }
 0x5d7   : > { %v3963_v26 = vpop.permute.xlu1 %3962 }
 0x5d8   : > { %4040 = vst.msk [vmem:[#allocation5 + $0x90] sm:$0xff] %vm1941_vm9, %v3963_v26  ;;  %v3773_v33 = vpop.permute.xlu0 %3772  ;;  %v4263_v63 = vld [vmem:[#allocation5 + $0x88] sm:$0xff] }
 0x5d9   : > { %3849 = vst.msk [vmem:[#allocation5 + $0x98] sm:$0xff] %vm1748_vm8, %v3773_v33  ;;  %3217 = vrot.lane.b32.xlu1 %v3123_v18, %s5548_s17  ;;  %5123 = vmatmul.mubr.msk.f32.gmra.mrb[16].mxu1 %vm2215_vm11, %v4263_v63 }
 0x5da   : > { %3790 = vrot.lane.b32.xlu0 %v3123_v18, %s5551_s9 }
 0x5db   : > { %v3390_v56 = vpop.permute.xlu1 %3389 }
 0x5dc   : > { %3465 = vst.msk [vmem:[#allocation5 + $0xa0] sm:$0xff] %vm1361_vm6, %v3390_v56  ;;  %v3200_v17 = vpop.permute.xlu0 %3199 }
 0x5dd   : > { %3274 = vst.msk [vmem:[#allocation5 + $0xa8] sm:$0xff] %vm1168_vm5, %v3200_v17  ;;  %3982 = vrot.lane.b32.xlu1 %v3890_v61, %s5552_s14 }
 0x5de   : > { %3792 = vrot.lane.b32.xlu0 %v3699_v50, %s5551_s9 }
 0x5df   : > { %v4155_v62 = vpop.permute.xlu1 %4154 }
 0x5e0   : > { %4232 = vst.msk [vmem:[#allocation5 + $0x90] sm:$0xff] %vm2134_vm10, %v4155_v62  ;;  %v3965_v59 = vpop.permute.xlu0 %3964 }
 0x5e1   : > { %4041 = vst.msk [vmem:[#allocation5 + $0x98] sm:$0xff] %vm1941_vm9, %v3965_v59  ;;  %3409 = vrot.lane.b32.xlu1 %v3890_v61, %s5549_s20 }
 0x5e2   : > { %3219 = vrot.lane.b32.xlu0 %v3699_v50, %s5548_s17  ;;  %s5554_s17 = smov [#allocation17]  }
 0x5e3   : > { %v3582_v30 = vpop.permute.xlu1 %3581 }
 0x5e4   : > { %3657 = vst.msk [vmem:[#allocation5 + $0xa0] sm:$0xff] %vm1554_vm7, %v3582_v30  ;;  %v3392_v47 = vpop.permute.xlu0 %3391 }
 0x5e5   : > { %3466 = vst.msk [vmem:[#allocation5 + $0xa8] sm:$0xff] %vm1361_vm6, %v3392_v47  ;;  %4174 = vrot.lane.b32.xlu1 %v4082_v22, %s5553_s29  ;;  %v4613_v47 = vld [vmem:[%s5839_s7 + $0x28] sm:$0xff] }
 0x5e6   : > { %3984 = vrot.lane.b32.xlu0 %v3891_v31, %s5552_s14 }
 0x5e7   : > { %v3584_v0 = vpop.permute.xlu1 %3583  ;;  %v4264_v23 = vld [vmem:[#allocation5 + $0x90] sm:$0xff] }
 0x5e8   : > { %3658 = vst.msk [vmem:[#allocation5 + $0xa8] sm:$0xff] %vm1554_vm7, %v3584_v0  ;;  %v4157_v20 = vpop.permute.xlu0 %4156  ;;  %5125 = vmatprep.mubr.msk.f32.mxu1 %vm2215_vm11, %v4264_v23 }
 0x5e9   : > { %4233 = vst.msk [vmem:[#allocation5 + $0x98] sm:$0xff] %vm2134_vm10, %v4157_v20  ;;  %3601 = vrot.lane.b32.xlu1 %v4082_v22, %s5550_s13  ;;  %v4612_v22 = vld [vmem:[%s5839_s7 + $0x20] sm:$0xff] }
 0x5ea   : > { %3411 = vrot.lane.b32.xlu0 %v3891_v31, %s5549_s20  ;;  %s5461_s20 = sshll.u32 %s5554_s17, 4  ;;  %s5462_s20 = int_to_ptr.vmem [resolvable:$false] %s5461_s20 }
 0x5eb   : > { %v3202_v51 = vpop.permute.xlu1 %3201  ;;  %p5464_p1 = scmp.lt.s32.totalorder %s8134_s30, %s5462_s20 }
 0x5ec   : > { %3275 = vst.msk [vmem:[#allocation5 + $0xb0] sm:$0xff] %vm1168_vm5, %v3202_v51  ;;  %v3775_v15 = vpop.permute.xlu0 %3774 }
 0x5ed   : > { %3850 = vst.msk [vmem:[#allocation5 + $0xa0] sm:$0xff] %vm1748_vm8, %v3775_v15  ;;  %3603 = vrot.lane.b32.xlu1 %v3508_v40, %s5550_s13  ;;  %s5463_s13 = scalar_lea.vmem %s5462_s20, 8192 }
 0x5ee   : > { %4176 = vrot.lane.b32.xlu0 %v3508_v40, %s5553_s29 }
 0x5ef   : > { %v3967_v16 = vpop.permute.xlu1 %3966 }
 0x5f0   : > { %4042 = vst.msk [vmem:[#allocation5 + $0xa0] sm:$0xff] %vm1941_vm9, %v3967_v16  ;;  %v3777_v14 = vpop.permute.xlu0 %3776  ;;  %v4265_v34 = vld [vmem:[#allocation5 + $0x98] sm:$0xff] }
 0x5f1   : > { %3851 = vst.msk [vmem:[#allocation5 + $0xa8] sm:$0xff] %vm1748_vm8, %v3777_v14  ;;  %5126 = vmatmul.mubr.msk.f32.gmra.mrb[18].mxu1 %vm2215_vm11, %v4265_v34  ;;  %3796 = vrot.lane.b32.xlu1 %v3701_v21, %s5551_s9 }
 0x5f2   : > { %3794 = vrot.lane.b32.xlu0 %v3700_v11, %s5551_s9 }
 0x5f3   : > { %v3394_v39 = vpop.permute.xlu1 %3393 }
 0x5f4   : > { %3467 = vst.msk [vmem:[#allocation5 + $0xb0] sm:$0xff] %vm1361_vm6, %v3394_v39  ;;  %v3204_v35 = vpop.permute.xlu0 %3203 }
 0x5f5   : > { %3276 = vst.msk [vmem:[#allocation5 + $0xb8] sm:$0xff] %vm1168_vm5, %v3204_v35  ;;  %3988 = vrot.lane.b32.xlu1 %v3893_v46, %s5552_s14 }
 0x5f6   : > { %3986 = vrot.lane.b32.xlu0 %v3892_v41, %s5552_s14 }
 0x5f7   : > { %v4159_v38 = vpop.permute.xlu1 %4158 }
 0x5f8   : > { %4234 = vst.msk [vmem:[#allocation5 + $0xa0] sm:$0xff] %vm2134_vm10, %v4159_v38  ;;  %v3969_v29 = vpop.permute.xlu0 %3968  ;;  %v4614_v38 = vld [vmem:[%s5839_s7 + $0x30] sm:$0xff] }
 0x5f9   : > { %4043 = vst.msk [vmem:[#allocation5 + $0xa8] sm:$0xff] %vm1941_vm9, %v3969_v29  ;;  %4180 = vrot.lane.b32.xlu1 %v4085_v7, %s5553_s29  ;;  %v4615_v7 = vld [vmem:[%s5839_s7 + $0x38] sm:$0xff] }
 0x5fa   : > { %4178 = vrot.lane.b32.xlu0 %v4084_v43, %s5553_s29 }
 0x5fb   : > { %v3586_v32 = vpop.permute.xlu1 %3585 }
 0x5fc   : > { %3659 = vst.msk [vmem:[#allocation5 + $0xb0] sm:$0xff] %vm1554_vm7, %v3586_v32  ;;  %v3396_v28 = vpop.permute.xlu0 %3395 }
 0x5fd   : > { %3468 = vst.msk [vmem:[#allocation5 + $0xb8] sm:$0xff] %vm1361_vm6, %v3396_v28 }
 0x5ff   : > { %v3588_v55 = vpop.permute.xlu1 %3587  ;;  %v4266_v12 = vld [vmem:[#allocation5 + $0xa0] sm:$0xff] }
 0x600   : > { %3660 = vst.msk [vmem:[#allocation5 + $0xb8] sm:$0xff] %vm1554_vm7, %v3588_v55  ;;  %v4161_v27 = vpop.permute.xlu0 %4160  ;;  %5128 = vmatprep.mubr.msk.f32.mxu1 %vm2215_vm11, %v4266_v12 }
 0x601   : > { %4235 = vst.msk [vmem:[#allocation5 + $0xa8] sm:$0xff] %vm2134_vm10, %v4161_v27 }
 0x603   : > { %v3206_v6 = vpop.permute.xlu1 %3205 }
 0x604   : > { %3277 = vst.msk [vmem:[#allocation5 + $0xc0] sm:$0xff] %vm1168_vm5, %v3206_v6  ;;  %v3779_v52 = vpop.permute.xlu0 %3778 }
 0x605   : > { %3852 = vst.msk [vmem:[#allocation5 + $0xb0] sm:$0xff] %vm1748_vm8, %v3779_v52 }
 0x607   : > { %v3971_v37 = vpop.permute.xlu1 %3970  ;;  %v5100_v25 = vpop.f32.mrb[0].mxu1 }
 0x608   : > { %4044 = vst.msk [vmem:[#allocation5 + $0xb0] sm:$0xff] %vm1941_vm9, %v3971_v37  ;;  %v4641_v24 = vadd.f32 %v5100_v25, %v4609_v54  ;;  %v4449_v44 = vpop.f32.mrb[1].mxu1  ;;  %v3781_v49 = vpop.permute.xlu0 %3780  ;;  %v4267_v19 = vld [vmem:[#allocation5 + $0xa8] sm:$0xff] }
 0x609   : > { %v4640_v5 = vadd.f32 %v4608_v42, %v4449_v44  ;;  %3853 = vst.msk [vmem:[#allocation5 + $0xb8] sm:$0xff] %vm1748_vm8, %v3781_v49  ;;  %5129 = vmatmul.mubr.msk.f32.gmra.mrb[20].mxu1 %vm2215_vm11, %v4267_v19  ;;  %v4617_v19 = vld [vmem:[%s5839_s7 + $0x48] sm:$0xff] }
 0x60a   : > { %4673 = vst.msk [vmem:[%s7975_s10 + $0x8] sm:$0xff] %vm337_vm0, %v4641_v24 }
 0x60b   : > { %4672 = vst.msk [vmem:[%s7975_s10] sm:$0xff] %vm337_vm0, %v4640_v5  ;;  %v3398_v60 = vpop.permute.xlu1 %3397  ;;  %v4616_v5 = vld [vmem:[%s5839_s7 + $0x40] sm:$0xff] }
 0x60c   : > { %3469 = vst.msk [vmem:[#allocation5 + $0xc0] sm:$0xff] %vm1361_vm6, %v3398_v60  ;;  %v3208_v1 = vpop.permute.xlu0 %3207 }
 0x60d   : > { %3278 = vst.msk [vmem:[#allocation5 + $0xc8] sm:$0xff] %vm1168_vm5, %v3208_v1 }
 0x60f   : > { %v4163_v48 = vpop.permute.xlu1 %4162 }
 0x610   : > { %4236 = vst.msk [vmem:[#allocation5 + $0xb0] sm:$0xff] %vm2134_vm10, %v4163_v48  ;;  %v3973_v45 = vpop.permute.xlu0 %3972 }
 0x611   : > { %4045 = vst.msk [vmem:[#allocation5 + $0xb8] sm:$0xff] %vm1941_vm9, %v3973_v45 }
 0x613   : > { %v3590_v58 = vpop.permute.xlu1 %3589 }
 0x614   : > { %3661 = vst.msk [vmem:[#allocation5 + $0xc0] sm:$0xff] %vm1554_vm7, %v3590_v58  ;;  %v3400_v10 = vpop.permute.xlu0 %3399 }
 0x615   : > { %3470 = vst.msk [vmem:[#allocation5 + $0xc8] sm:$0xff] %vm1361_vm6, %v3400_v10 }
 0x617   : > { %v3592_v36 = vpop.permute.xlu1 %3591  ;;  %v4268_v9 = vld [vmem:[#allocation5 + $0xb0] sm:$0xff] }
 0x618   : > { %3662 = vst.msk [vmem:[#allocation5 + $0xc8] sm:$0xff] %vm1554_vm7, %v3592_v36  ;;  %v4165_v13 = vpop.permute.xlu0 %4164  ;;  %5131 = vmatprep.mubr.msk.f32.mxu1 %vm2215_vm11, %v4268_v9 }
 0x619   : > { %4237 = vst.msk [vmem:[#allocation5 + $0xb8] sm:$0xff] %vm2134_vm10, %v4165_v13 }
 0x61b   : > { %v3210_v53 = vpop.permute.xlu1 %3209  ;;  %v5103_v3 = vpop.f32.mrb[2].mxu1 }
 0x61c   : > { %3279 = vst.msk [vmem:[#allocation5 + $0xd0] sm:$0xff] %vm1168_vm5, %v3210_v53  ;;  %v4643_v2 = vadd.f32 %v5103_v3, %v4611_v4  ;;  %v3783_v8 = vpop.permute.xlu0 %3782  ;;  %v4459_v26 = vpop.f32.mrb[3].mxu1 }
 0x61d   : > { %3854 = vst.msk [vmem:[#allocation5 + $0xc0] sm:$0xff] %vm1748_vm8, %v3783_v8  ;;  %v4642_v33 = vadd.f32 %v4610_v57, %v4459_v26 }
 0x61e   : > { %4675 = vst.msk [vmem:[%s7975_s10 + $0x18] sm:$0xff] %vm337_vm0, %v4643_v2 }
 0x61f   : > { %4674 = vst.msk [vmem:[%s7975_s10 + $0x10] sm:$0xff] %vm337_vm0, %v4642_v33  ;;  %v3975_v18 = vpop.permute.xlu1 %3974  ;;  %v4619_v33 = vld [vmem:[%s5839_s7 + $0x58] sm:$0xff] }
 0x620   : > { %4046 = vst.msk [vmem:[#allocation5 + $0xc0] sm:$0xff] %vm1941_vm9, %v3975_v18  ;;  %v3785_v63 = vpop.permute.xlu0 %3784  ;;  %v4269_v56 = vld [vmem:[#allocation5 + $0xb8] sm:$0xff]  ;;  %v4618_v18 = vld [vmem:[%s5839_s7 + $0x50] sm:$0xff] }
 0x621   : > { %3855 = vst.msk [vmem:[#allocation5 + $0xc8] sm:$0xff] %vm1748_vm8, %v3785_v63  ;;  %5132 = vmatmul.mubr.msk.f32.gmra.mrb[22].mxu1 %vm2215_vm11, %v4269_v56 }
 0x623   : > { %v3402_v17 = vpop.permute.xlu1 %3401 }
 0x624   : > { %3471 = vst.msk [vmem:[#allocation5 + $0xd0] sm:$0xff] %vm1361_vm6, %v3402_v17  ;;  %v3212_v61 = vpop.permute.xlu0 %3211 }
 0x625   : > { %3280 = vst.msk [vmem:[#allocation5 + $0xd8] sm:$0xff] %vm1168_vm5, %v3212_v61 }
 0x627   : > { %v4167_v50 = vpop.permute.xlu1 %4166 }
 0x628   : > { %4238 = vst.msk [vmem:[#allocation5 + $0xc0] sm:$0xff] %vm2134_vm10, %v4167_v50  ;;  %v3977_v62 = vpop.permute.xlu0 %3976 }
 0x629   : > { %4047 = vst.msk [vmem:[#allocation5 + $0xc8] sm:$0xff] %vm1941_vm9, %v3977_v62 }
 0x62b   : > { %v3594_v59 = vpop.permute.xlu1 %3593 }
 0x62c   : > { %3663 = vst.msk [vmem:[#allocation5 + $0xd0] sm:$0xff] %vm1554_vm7, %v3594_v59  ;;  %v3404_v30 = vpop.permute.xlu0 %3403 }
 0x62d   : > { %3472 = vst.msk [vmem:[#allocation5 + $0xd8] sm:$0xff] %vm1361_vm6, %v3404_v30 }
 0x62f   : > { %v3596_v31 = vpop.permute.xlu1 %3595  ;;  %v5106_v0 = vpop.f32.mrb[4].mxu1  ;;  %v4270_v23 = vld [vmem:[#allocation5 + $0xc0] sm:$0xff] }
 0x630   : > { %3664 = vst.msk [vmem:[#allocation5 + $0xd8] sm:$0xff] %vm1554_vm7, %v3596_v31  ;;  %v4645_v20 = vadd.f32 %v5106_v0, %v4613_v47  ;;  %v4169_v51 = vpop.permute.xlu0 %4168  ;;  %v4469_v15 = vpop.f32.mrb[5].mxu1  ;;  %5134 = vmatprep.mubr.msk.f32.mxu1 %vm2215_vm11, %v4270_v23  ;;  %v4621_v47 = vld [vmem:[%s5839_s7 + $0x68] sm:$0xff] }
 0x631   : > { %4239 = vst.msk [vmem:[#allocation5 + $0xc8] sm:$0xff] %vm2134_vm10, %v4169_v51  ;;  %v4644_v40 = vadd.f32 %v4612_v22, %v4469_v15  ;;  %v4620_v22 = vld [vmem:[%s5839_s7 + $0x60] sm:$0xff]  ;;  %v4623_v51 = vld [vmem:[%s5839_s7 + $0x78] sm:$0xff]  ;;  %v4622_v15 = vld [vmem:[%s5839_s7 + $0x70] sm:$0xff] }
 0x632   : > { %4677 = vst.msk [vmem:[%s7975_s10 + $0x28] sm:$0xff] %vm337_vm0, %v4645_v20 }
 0x633   : > { %4676 = vst.msk [vmem:[%s7975_s10 + $0x20] sm:$0xff] %vm337_vm0, %v4644_v40  ;;  %v3214_v21 = vpop.permute.xlu1 %3213 }
 0x634   : > { %3281 = vst.msk [vmem:[#allocation5 + $0xe0] sm:$0xff] %vm1168_vm5, %v3214_v21  ;;  %v3787_v16 = vpop.permute.xlu0 %3786 }
 0x635   : > { %3856 = vst.msk [vmem:[#allocation5 + $0xd0] sm:$0xff] %vm1748_vm8, %v3787_v16 }
 0x637   : > { %v3979_v11 = vpop.permute.xlu1 %3978 }
 0x638   : > { %4048 = vst.msk [vmem:[#allocation5 + $0xd0] sm:$0xff] %vm1941_vm9, %v3979_v11  ;;  %v3789_v14 = vpop.permute.xlu0 %3788  ;;  %v4271_v34 = vld [vmem:[#allocation5 + $0xc8] sm:$0xff] }
 0x639   : > { %3857 = vst.msk [vmem:[#allocation5 + $0xd8] sm:$0xff] %vm1748_vm8, %v3789_v14  ;;  %5135 = vmatmul.mubr.msk.f32.gmra.mrb[24].mxu1 %vm2215_vm11, %v4271_v34  ;;  %v4625_v14 = vld [vmem:[%s5839_s7 + $0x88] sm:$0xff]  ;;  %v4624_v34 = vld [vmem:[%s5839_s7 + $0x80] sm:$0xff] }
 0x63b   : > { %v3406_v46 = vpop.permute.xlu1 %3405 }
 0x63c   : > { %3473 = vst.msk [vmem:[#allocation5 + $0xe0] sm:$0xff] %vm1361_vm6, %v3406_v46  ;;  %v3216_v39 = vpop.permute.xlu0 %3215 }
 0x63d   : > { %3282 = vst.msk [vmem:[#allocation5 + $0xe8] sm:$0xff] %vm1168_vm5, %v3216_v39 }
 0x63f   : > { %v4171_v41 = vpop.permute.xlu1 %4170 }
 0x640   : > { %4240 = vst.msk [vmem:[#allocation5 + $0xd0] sm:$0xff] %vm2134_vm10, %v4171_v41  ;;  %v3981_v35 = vpop.permute.xlu0 %3980 }
 0x641   : > { %4049 = vst.msk [vmem:[#allocation5 + $0xd8] sm:$0xff] %vm1941_vm9, %v3981_v35 }
 0x643   : > { %v3598_v43 = vpop.permute.xlu1 %3597  ;;  %v5109_v29 = vpop.f32.mrb[6].mxu1 }
 0x644   : > { %3665 = vst.msk [vmem:[#allocation5 + $0xe0] sm:$0xff] %vm1554_vm7, %v3598_v43  ;;  %v4647_v32 = vadd.f32 %v5109_v29, %v4615_v7  ;;  %v3408_v28 = vpop.permute.xlu0 %3407  ;;  %v4479_v55 = vpop.f32.mrb[7].mxu1  ;;  %v4627_v7 = vld [vmem:[%s5839_s7 + $0x98] sm:$0xff] }
 0x645   : > { %3474 = vst.msk [vmem:[#allocation5 + $0xe8] sm:$0xff] %vm1361_vm6, %v3408_v28  ;;  %v4646_v12 = vadd.f32 %v4614_v38, %v4479_v55  ;;  %v4626_v38 = vld [vmem:[%s5839_s7 + $0x90] sm:$0xff]  ;;  %v4629_v55 = vld [vmem:[%s5839_s7 + $0xa8] sm:$0xff] }
 0x646   : > { %4679 = vst.msk [vmem:[%s7975_s10 + $0x38] sm:$0xff] %vm337_vm0, %v4647_v32 }
 0x647   : > { %4678 = vst.msk [vmem:[%s7975_s10 + $0x30] sm:$0xff] %vm337_vm0, %v4646_v12  ;;  %v3600_v27 = vpop.permute.xlu1 %3599  ;;  %v4272_v6 = vld [vmem:[#allocation5 + $0xd0] sm:$0xff]  ;;  %v4628_v12 = vld [vmem:[%s5839_s7 + $0xa0] sm:$0xff] }
 0x648   : > { %3666 = vst.msk [vmem:[#allocation5 + $0xe8] sm:$0xff] %vm1554_vm7, %v3600_v27  ;;  %v4173_v52 = vpop.permute.xlu0 %4172  ;;  %5137 = vmatprep.mubr.msk.f32.mxu1 %vm2215_vm11, %v4272_v6 }
 0x649   : > { %4241 = vst.msk [vmem:[#allocation5 + $0xd8] sm:$0xff] %vm2134_vm10, %v4173_v52 }
 0x64b   : > { %v3218_v54 = vpop.permute.xlu1 %3217 }
 0x64c   : > { %3283 = vst.msk [vmem:[#allocation5 + $0xf0] sm:$0xff] %vm1168_vm5, %v3218_v54  ;;  %v3791_v42 = vpop.permute.xlu0 %3790 }
 0x64d   : > { %3858 = vst.msk [vmem:[#allocation5 + $0xe0] sm:$0xff] %vm1748_vm8, %v3791_v42  ;;  %v4631_v42 = vld [vmem:[%s5839_s7 + $0xb8] sm:$0xff] }
 0x64f   : > { %v3983_v37 = vpop.permute.xlu1 %3982 }
 0x650   : > { %4050 = vst.msk [vmem:[#allocation5 + $0xe0] sm:$0xff] %vm1941_vm9, %v3983_v37  ;;  %v3793_v25 = vpop.permute.xlu0 %3792  ;;  %v4273_v24 = vld [vmem:[#allocation5 + $0xd8] sm:$0xff]  ;;  %v4630_v37 = vld [vmem:[%s5839_s7 + $0xb0] sm:$0xff] }
 0x651   : > { %3859 = vst.msk [vmem:[#allocation5 + $0xe8] sm:$0xff] %vm1748_vm8, %v3793_v25  ;;  %5138 = vmatmul.mubr.msk.f32.gmra.mrb[26].mxu1 %vm2215_vm11, %v4273_v24 }
 0x653   : > { %v3410_v44 = vpop.permute.xlu1 %3409 }
 0x654   : > { %3475 = vst.msk [vmem:[#allocation5 + $0xf0] sm:$0xff] %vm1361_vm6, %v3410_v44  ;;  %v3220_v49 = vpop.permute.xlu0 %3219 }
 0x655   : > { %3284 = vst.msk [vmem:[#allocation5 + $0xf8] sm:$0xff] %vm1168_vm5, %v3220_v49 }
 0x657   : > { %v4175_v60 = vpop.permute.xlu1 %4174  ;;  %v5112_v1 = vpop.f32.mrb[8].mxu1 }
 0x658   : > { %4242 = vst.msk [vmem:[#allocation5 + $0xe0] sm:$0xff] %vm2134_vm10, %v4175_v60  ;;  %v4649_v48 = vadd.f32 %v5112_v1, %v4617_v19  ;;  %v3985_v45 = vpop.permute.xlu0 %3984  ;;  %v4489_v58 = vpop.f32.mrb[9].mxu1  ;;  %v4633_v19 = vld [vmem:[%s5839_s7 + $0xc8] sm:$0xff] }
 0x659   : > { %4051 = vst.msk [vmem:[#allocation5 + $0xe8] sm:$0xff] %vm1941_vm9, %v3985_v45  ;;  %v4648_v10 = vadd.f32 %v4616_v5, %v4489_v58  ;;  %v4632_v5 = vld [vmem:[%s5839_s7 + $0xc0] sm:$0xff]  ;;  %v4635_v58 = vld [vmem:[%s5839_s7 + $0xd8] sm:$0xff] }
 0x65a   : > { %4681 = vst.msk [vmem:[%s7975_s10 + $0x48] sm:$0xff] %vm337_vm0, %v4649_v48 }
 0x65b   : > { %4680 = vst.msk [vmem:[%s7975_s10 + $0x40] sm:$0xff] %vm337_vm0, %v4648_v10  ;;  %v3602_v36 = vpop.permute.xlu1 %3601  ;;  %v4634_v10 = vld [vmem:[%s5839_s7 + $0xd0] sm:$0xff] }
 0x65c   : > { %3667 = vst.msk [vmem:[#allocation5 + $0xf0] sm:$0xff] %vm1554_vm7, %v3602_v36  ;;  %v3412_v9 = vpop.permute.xlu0 %3411 }
 0x65d   : > { %3476 = vst.msk [vmem:[#allocation5 + $0xf8] sm:$0xff] %vm1361_vm6, %v3412_v9 }
 0x65f   : > { %v3604_v13 = vpop.permute.xlu1 %3603  ;;  %v4274_v4 = vld [vmem:[#allocation5 + $0xe0] sm:$0xff] }
 0x660   : > { %3668 = vst.msk [vmem:[#allocation5 + $0xf8] sm:$0xff] %vm1554_vm7, %v3604_v13  ;;  %v4177_v57 = vpop.permute.xlu0 %4176  ;;  %5140 = vmatprep.mubr.msk.f32.mxu1 %vm2215_vm11, %v4274_v4 }
 0x661   : > { %4243 = vst.msk [vmem:[#allocation5 + $0xe8] sm:$0xff] %vm2134_vm10, %v4177_v57  ;;  %v4637_v57 = vld [vmem:[%s5839_s7 + $0xe8] sm:$0xff] }
 0x663   : > { %v3797_v53 = vpop.permute.xlu1 %3796 }
 0x664   : > { %v3795_v3 = vpop.permute.xlu0 %3794  ;;  %3861 = vst.msk [vmem:[#allocation5 + $0xf8] sm:$0xff] %vm1748_vm8, %v3797_v53  ;;  %v4636_v53 = vld [vmem:[%s5839_s7 + $0xe0] sm:$0xff] }
 0x665   : > { %3860 = vst.msk [vmem:[#allocation5 + $0xf0] sm:$0xff] %vm1748_vm8, %v3795_v3 }
 0x667   : > { %v3989_v2 = vpop.permute.xlu1 %3988 }
 0x668   : > { %v3987_v8 = vpop.permute.xlu0 %3986  ;;  %4053 = vst.msk [vmem:[#allocation5 + $0xf8] sm:$0xff] %vm1941_vm9, %v3989_v2  ;;  %v4275_v26 = vld [vmem:[#allocation5 + $0xe8] sm:$0xff] }
 0x669   : > { %4052 = vst.msk [vmem:[#allocation5 + $0xf0] sm:$0xff] %vm1941_vm9, %v3987_v8  ;;  %5141 = vmatmul.mubr.msk.f32.gmra.mrb[28].mxu1 %vm2215_vm11, %v4275_v26 }
 0x66b   : > { %v5115_v63 = vpop.f32.mrb[10].mxu1  ;;  %v4181_v56 = vpop.permute.xlu1 %4180 }
 0x66c   : > { %v4651_v17 = vadd.f32 %v5115_v63, %v4619_v33  ;;  %v4179_v61 = vpop.permute.xlu0 %4178  ;;  %v4499_v50 = vpop.f32.mrb[11].mxu1  ;;  %4245 = vst.msk [vmem:[#allocation5 + $0xf8] sm:$0xff] %vm2134_vm10, %v4181_v56  ;;  %v4639_v33 = vld [vmem:[%s5839_s7 + $0xf8] sm:$0xff] }
 0x66d   : > { %4244 = vst.msk [vmem:[#allocation5 + $0xf0] sm:$0xff] %vm2134_vm10, %v4179_v61  ;;  %v4650_v62 = vadd.f32 %v4618_v18, %v4499_v50  ;;  %v4638_v18 = vld [vmem:[%s5839_s7 + $0xf0] sm:$0xff]  ;;  %s5457_s7 = scalar_lea.vmem %s8134_s30, 4096 }
 0x66e   : > { %4683 = vst.msk [vmem:[%s7975_s10 + $0x58] sm:$0xff] %vm337_vm0, %v4651_v17  ;;  %p5458_p7 = scmp.ne.s32.totalorder %s8134_s30, %s5457_s7  ;;  %p5465_p3 = scmp.lt.s32.totalorder %s5463_s13, %s5457_s7 }
 0x66f   : > { %4682 = vst.msk [vmem:[%s7975_s10 + $0x50] sm:$0xff] %vm337_vm0, %v4650_v62 }
 0x670   : > { %p5459_p4 = pnand %p5458_p7, %p8298_p10  ;;  %p5466_p2 = por %p5465_p3, %p5464_p1 }
 0x672   : > { %p5460_p13 = pneg %p5459_p4 }
 0x673   : > { %v4277_v59 = vld [vmem:[#allocation5 + $0xf8] sm:$0xff] }
 0x674   : > { %v4276_v30 = vld [vmem:[#allocation5 + $0xf0] sm:$0xff]  ;;  %p5467_p8 = pnand %p5466_p2, %p5460_p13 }
 0x675   : > { %5143 = vmatprep.mubr.msk.f32.mxu1 %vm2215_vm11, %v4276_v30 }
 0x676   : > { %5144 = vmatmul.mubr.msk.f32.gmra.mrb[30].mxu1 %vm2215_vm11, %v4277_v59 }
 0x67f   : > { %v5118_v31 = vpop.f32.mrb[12].mxu1 }
 0x680   : > { %v4653_v0 = vadd.f32 %v5118_v31, %v4621_v47  ;;  %v4509_v23 = vpop.f32.mrb[13].mxu1 }
 0x681   : > { %v4652_v20 = vadd.f32 %v4620_v22, %v4509_v23 }
 0x682   : > { %4685 = vst.msk [vmem:[%s7975_s10 + $0x68] sm:$0xff] %vm337_vm0, %v4653_v0 }
 0x683   : > { %4684 = vst.msk [vmem:[%s7975_s10 + $0x60] sm:$0xff] %vm337_vm0, %v4652_v20 }
 0x693   : > { %v5121_v40 = vpop.f32.mrb[14].mxu1 }
 0x694   : > { %v4655_v21 = vadd.f32 %v5121_v40, %v4623_v51  ;;  %v4519_v16 = vpop.f32.mrb[15].mxu1 }
 0x695   : > { %v4654_v11 = vadd.f32 %v4622_v15, %v4519_v16 }
 0x696   : > { %4687 = vst.msk [vmem:[%s7975_s10 + $0x78] sm:$0xff] %vm337_vm0, %v4655_v21 }
 0x697   : > { %4686 = vst.msk [vmem:[%s7975_s10 + $0x70] sm:$0xff] %vm337_vm0, %v4654_v11 }
 0x6ac   : > { %v5124_v46 = vpop.f32.mrb[16].mxu1 }
 0x6ad   : > { %v4657_v39 = vadd.f32 %v5124_v46, %v4625_v14  ;;  %v4529_v41 = vpop.f32.mrb[17].mxu1 }
 0x6ae   : > { %v4656_v35 = vadd.f32 %v4624_v34, %v4529_v41 }
 0x6af   : > { %4689 = vst.msk [vmem:[%s7975_s10 + $0x88] sm:$0xff] %vm337_vm0, %v4657_v39 }
 0x6b0   : > { %4688 = vst.msk [vmem:[%s7975_s10 + $0x80] sm:$0xff] %vm337_vm0, %v4656_v35 }
 0x6c4   : > { %v5127_v43 = vpop.f32.mrb[18].mxu1 }
 0x6c5   : > { %v4659_v29 = vadd.f32 %v5127_v43, %v4627_v7  ;;  %v4539_v32 = vpop.f32.mrb[19].mxu1 }
 0x6c6   : > { %v4658_v28 = vadd.f32 %v4626_v38, %v4539_v32 }
 0x6c7   : > { %4691 = vst.msk [vmem:[%s7975_s10 + $0x98] sm:$0xff] %vm337_vm0, %v4659_v29 }
 0x6c8   : > { %4690 = vst.msk [vmem:[%s7975_s10 + $0x90] sm:$0xff] %vm337_vm0, %v4658_v28 }
 0x6dc   : > { %v5130_v27 = vpop.f32.mrb[20].mxu1 }
 0x6dd   : > { %v4661_v6 = vadd.f32 %v5130_v27, %v4629_v55  ;;  %v4549_v52 = vpop.f32.mrb[21].mxu1 }
 0x6de   : > { %v4660_v54 = vadd.f32 %v4628_v12, %v4549_v52 }
 0x6df   : > { %4693 = vst.msk [vmem:[%s7975_s10 + $0xa8] sm:$0xff] %vm337_vm0, %v4661_v6 }
 0x6e0   : > { %4692 = vst.msk [vmem:[%s7975_s10 + $0xa0] sm:$0xff] %vm337_vm0, %v4660_v54 }
 0x6f4   : > { %v5133_v25 = vpop.f32.mrb[22].mxu1 }
 0x6f5   : > { %v4663_v24 = vadd.f32 %v5133_v25, %v4631_v42  ;;  %v4559_v44 = vpop.f32.mrb[23].mxu1 }
 0x6f6   : > { %v4662_v49 = vadd.f32 %v4630_v37, %v4559_v44 }
 0x6f7   : > { %4695 = vst.msk [vmem:[%s7975_s10 + $0xb8] sm:$0xff] %vm337_vm0, %v4663_v24 }
 0x6f8   : > { %4694 = vst.msk [vmem:[%s7975_s10 + $0xb0] sm:$0xff] %vm337_vm0, %v4662_v49 }
 0x70c   : > { %v5136_v60 = vpop.f32.mrb[24].mxu1 }
 0x70d   : > { %v4665_v1 = vadd.f32 %v5136_v60, %v4633_v19  ;;  %v4569_v48 = vpop.f32.mrb[25].mxu1 }
 0x70e   : > { %v4664_v45 = vadd.f32 %v4632_v5, %v4569_v48 }
 0x70f   : > { %4697 = vst.msk [vmem:[%s7975_s10 + $0xc8] sm:$0xff] %vm337_vm0, %v4665_v1 }
 0x710   : > { %4696 = vst.msk [vmem:[%s7975_s10 + $0xc0] sm:$0xff] %vm337_vm0, %v4664_v45 }
 0x724   : > { %v5139_v36 = vpop.f32.mrb[26].mxu1 }
 0x725   : > { %v4667_v9 = vadd.f32 %v5139_v36, %v4635_v58  ;;  %v4579_v13 = vpop.f32.mrb[27].mxu1 }
 0x726   : > { %v4666_v4 = vadd.f32 %v4634_v10, %v4579_v13 }
 0x727   : > { %4699 = vst.msk [vmem:[%s7975_s10 + $0xd8] sm:$0xff] %vm337_vm0, %v4667_v9 }
 0x728   : > { %4698 = vst.msk [vmem:[%s7975_s10 + $0xd0] sm:$0xff] %vm337_vm0, %v4666_v4 }
 0x73c   : > { %v5142_v3 = vpop.f32.mrb[28].mxu1 }
 0x73d   : > { %v4669_v2 = vadd.f32 %v5142_v3, %v4637_v57  ;;  %v4589_v8 = vpop.f32.mrb[29].mxu1 }
 0x73e   : > { %v4668_v26 = vadd.f32 %v4636_v53, %v4589_v8 }
 0x73f   : > { %4701 = vst.msk [vmem:[%s7975_s10 + $0xe8] sm:$0xff] %vm337_vm0, %v4669_v2 }
 0x740   : > { %4700 = vst.msk [vmem:[%s7975_s10 + $0xe0] sm:$0xff] %vm337_vm0, %v4668_v26 }
 0x749   : > { %v5145_v63 = vpop.f32.mrb[30].mxu1 }
 0x74a   : > { %v4671_v56 = vadd.f32 %v5145_v63, %v4639_v33  ;;  %v4599_v17 = vpop.f32.mrb[31].mxu1 }
 0x74b   : > { %v4670_v61 = vadd.f32 %v4638_v18, %v4599_v17 }
 0x74c   : > { %4703 = vst.msk [vmem:[%s7975_s10 + $0xf8] sm:$0xff] %vm337_vm0, %v4671_v56 }
 0x74d   : > { %4702 = vst.msk [vmem:[%s7975_s10 + $0xf0] sm:$0xff] %vm337_vm0, %v4670_v61 }
 0x74e   : > { %5470 = shalt.err (!%p5467_p8)
}
 0x74f   : > { %s5471_s9 = scalar_lea.hbm %s8132_s16, 4096  ;;  %s5475_s10 = scalar_lea.hbm %s8189_s6, 8192 }
 0x750   : > { %p5472_p6 = scmp.ne.s32.totalorder %s8132_s16, %s5471_s9  ;;  %p5476_p0 = scmp.lt.u32.totalorder %s8132_s16, %s8189_s6 }
 0x751   : > { %p5477_p5 = scmp.lt.u32.totalorder %s5475_s10, %s5471_s9  ;;  %p5479_p7 = scmp.lt.u32.totalorder %s5471_s9, %s8132_s16 }
 0x752   : > { %p5473_p11 = pnand %p5472_p6, %p8298_p10 }
 0x753   : > { %p5478_p9 = por %p5477_p5, %p5476_p0 }
 0x754   : > { %p5474_p12 = pneg %p5473_p11 }
 0x755   : > { %p5480_p4 = por %p5479_p7, %p5478_p9 }
 0x757   : > { %p5481_p13 = pnand %p5480_p4, %p5474_p12 }
 0x759   : > { %5484 = shalt.err (!%p5481_p13)
}
 0x75a   : > { %s5555_s19 = smov 128  }
 0x75b   : > { %5200 = dma.vmem_to_hbm [thread:$0]  (%p8298_p10), %s8134_s30, 4096, %s8132_s16, %s4705_s27, %s5555_s19, %s5555_s19, %s5546_s28  }
 0x75c PF: > { %s4733_s7 = sand.u32 1, %s5523_s21   ;;  %p8299_p1 = scmp.ne.s32.totalorder %s8229_s8, 0 }
 0x75d   : > { %p8300_p3 = scmp.ge.s32.totalorder %s5535_s24, 2  ;;  %s4734_s17 = scalar_lea.sflag [#allocation8], %s4733_s7 }
 0x75f   : > { %p5223_p2 = pnand %p8300_p3, %p8299_p1 }
 0x761   : > { %5518 = dma.done.wait (!%p5223_p2), %s4734_s17, 4096  }
 0x762   : > { %5520 = vsyncadd (!%p5223_p2), %s4734_s17, 4294963200  ;;  %p22_p8 = scmp.ge.s32.totalorder %s5757_s15, 4   ;;  %s8301_s21 = smov %s5527_s22 }
 0x763   : > { %s8302_s22 = smov %s5531_s23  ;;  %s8303_s23 = smov %s5769_s18 }
 0x764   : > { %s8304_s24 = smov %s5757_s15  ;;  %24 = sbr.rel (!%p22_p8) target bundleno = 8 (0x8), region = 115 }
 0x76b   :  { %4739 = vsyncpa [#allocation7], 1 }
 0x76c   :  { %4741 = vsyncpa [#allocation7 + $0x1], 1 }
 0x76d   :  { %4742 = vsyncpa [#allocation10], 1 }
 0x76e   :  { %4743 = vsyncpa [#allocation13], 1 }
 0x76f   :  { %4744 = vsyncpa [#allocation16], 1 }
 0x770   :  { %4745 = vsyncpa [#allocation8], 1 }
 0x771   :  { %4747 = vsyncpa [#allocation8 + $0x1], 1 }

</bundles_post_ra>
